<compile_context>
chip_gen: v7x
topology: tpu7x:2x2x1
jax: 0.10.0
libtpu: 0.0.40
codegen_flags: <defaults>
</compile_context>

<pallas_src>
import functools
import math

import jax
import jax.numpy as jnp
from jax.experimental import pallas as pl
from jax.experimental.pallas import tpu as pltpu


# ----------------------------------------------------------------------------
# helpers
# ----------------------------------------------------------------------------
def _tile(dim, cap, align):
    """Largest tile <= cap that divides `dim` and is a multiple of `align`.
    Falls back to the full dim (always a legal Pallas block size)."""
    if dim <= cap:
        return dim
    t = (cap // align) * align
    while t >= align:
        if dim % t == 0:
            return t
        t -= align
    return dim


# ----------------------------------------------------------------------------
# Tiled matmul (+ bias, + optional ReLU)  — bf16 in / bf16 (or f32) out
# ----------------------------------------------------------------------------
def _matmul_kernel(x_ref, w_ref, b_ref, o_ref, acc_ref, *, relu, nk):
    k = pl.program_id(2)

    @pl.when(k == 0)
    def _():
        acc_ref[...] = jnp.zeros_like(acc_ref)

    acc_ref[...] += jnp.dot(x_ref[...], w_ref[...],
                            preferred_element_type=jnp.float32)

    @pl.when(k == nk - 1)
    def _():
        y = acc_ref[...] + b_ref[...]
        if relu:
            y = jnp.maximum(y, 0.0)
        o_ref[...] = y.astype(o_ref.dtype)


def linear(x, w, b, relu=False, out_dtype=jnp.bfloat16, tm=256, tn=256, tk=512):
    """x: (M, K) bf16, w: (K, N) bf16, b: (N,) f32 -> (M, N) out_dtype."""
    x = x.astype(jnp.bfloat16)
    M, K = x.shape
    N = w.shape[1]
    tm = _tile(M, tm, 8)
    tn = _tile(N, tn, 128)
    tk = _tile(K, tk, 128)
    nk = K // tk
    cost = pl.CostEstimate(
        flops=2 * M * N * K, transcendentals=0,
        bytes_accessed=int(M * K * 2 + K * N * 2 + N * 4
                           + M * N * jnp.dtype(out_dtype).itemsize))
    return pl.pallas_call(
        functools.partial(_matmul_kernel, relu=relu, nk=nk),
        out_shape=jax.ShapeDtypeStruct((M, N), out_dtype),
        grid=(M // tm, N // tn, nk),
        in_specs=[
            pl.BlockSpec((tm, tk), lambda i, j, k: (i, k)),
            pl.BlockSpec((tk, tn), lambda i, j, k: (k, j)),
            pl.BlockSpec((1, tn), lambda i, j, k: (0, j)),
        ],
        out_specs=pl.BlockSpec((tm, tn), lambda i, j, k: (i, j)),
        scratch_shapes=[pltpu.VMEM((tm, tn), jnp.float32)],
        compiler_params=pltpu.CompilerParams(
            dimension_semantics=("parallel", "parallel", "arbitrary")),
        cost_estimate=cost,
    )(x, w, b.reshape(1, N))


# ----------------------------------------------------------------------------
# Fused sublayer tail: LayerNorm(res + x @ w + b) — bf16 in/out, f32 math
# ----------------------------------------------------------------------------
def _matmul_add_ln_kernel(x_ref, w_ref, b_ref, r_ref, g_ref, bb_ref,
                          o_ref, acc_ref, *, nk, eps):
    k = pl.program_id(1)

    @pl.when(k == 0)
    def _():
        acc_ref[...] = jnp.zeros_like(acc_ref)

    acc_ref[...] += jnp.dot(x_ref[...], w_ref[...],
                            preferred_element_type=jnp.float32)

    @pl.when(k == nk - 1)
    def _():
        y = acc_ref[...] + b_ref[...] + r_ref[...].astype(jnp.float32)
        mu = jnp.mean(y, axis=-1, keepdims=True)
        yc = y - mu
        var = jnp.mean(yc * yc, axis=-1, keepdims=True)
        o_ref[...] = (yc * jax.lax.rsqrt(var + eps) * g_ref[...]
                      + bb_ref[...]).astype(o_ref.dtype)


def linear_add_ln(x, w, b, res, gamma, beta, eps, tm=128, tk=512):
    """x: (M, K) bf16, w: (K, N) bf16, res: (M, N) bf16 -> (M, N) bf16.
    N (== d_model) is kept whole so the LayerNorm row reduction is one tile;
    tm defaults to 128 to stay inside v7x's 64-MiB VMEM at large d_model."""
    x = x.astype(jnp.bfloat16)
    M, K = x.shape
    N = w.shape[1]
    tm = _tile(M, tm, 8)
    tk = _tile(K, tk, 128)
    nk = K // tk
    cost = pl.CostEstimate(
        flops=2 * M * N * K + 10 * M * N, transcendentals=M,
        bytes_accessed=int(M * K * 2 + K * N * 2 + N * 4
                           + 2 * M * N * 2 + 2 * N * 4))
    return pl.pallas_call(
        functools.partial(_matmul_add_ln_kernel, nk=nk, eps=eps),
        out_shape=jax.ShapeDtypeStruct((M, N), jnp.bfloat16),
        grid=(M // tm, nk),
        in_specs=[
            pl.BlockSpec((tm, tk), lambda i, k: (i, k)),
            pl.BlockSpec((tk, N), lambda i, k: (k, 0)),
            pl.BlockSpec((1, N), lambda i, k: (0, 0)),
            pl.BlockSpec((tm, N), lambda i, k: (i, 0)),
            pl.BlockSpec((1, N), lambda i, k: (0, 0)),
            pl.BlockSpec((1, N), lambda i, k: (0, 0)),
        ],
        out_specs=pl.BlockSpec((tm, N), lambda i, k: (i, 0)),
        scratch_shapes=[pltpu.VMEM((tm, N), jnp.float32)],
        compiler_params=pltpu.CompilerParams(
            dimension_semantics=("parallel", "arbitrary")),
        cost_estimate=cost,
    )(x, w, b.reshape(1, N), res, gamma.reshape(1, N), beta.reshape(1, N))


# ----------------------------------------------------------------------------
# Flash-style multi-head attention (online softmax, KV tiling, in-kernel mask)
# ----------------------------------------------------------------------------
def _flash_attn_kernel(q_ref, k_ref, v_ref, kpad_ref, o_ref,
                       m_sc, l_sc, acc_sc, *, num_heads, scale, causal):
    ki = pl.program_id(2)
    nk = pl.num_programs(2)
    tq = q_ref.shape[0]
    tk = k_ref.shape[0]
    D = q_ref.shape[1]
    Dh = D // num_heads

    @pl.when(ki == 0)
    def _():
        m_sc[...] = jnp.full_like(m_sc, -1e30)
        l_sc[...] = jnp.zeros_like(l_sc)
        acc_sc[...] = jnp.zeros_like(acc_sc)

    # key-side mask, shared by all heads: padding vector (+ causal via iota)
    mask = kpad_ref[...] > 0.0                                       # (1, tk)
    if causal:
        row = (pl.program_id(1) * tq
               + jax.lax.broadcasted_iota(jnp.int32, (tq, tk), 0))
        col = ki * tk + jax.lax.broadcasted_iota(jnp.int32, (tq, tk), 1)
        mask = jnp.logical_and(mask, col <= row)                     # (tq, tk)

    q = q_ref[...]                                                   # (tq, D) bf16
    k = k_ref[...]                                                   # (tk, D) bf16
    v = v_ref[...]                                                   # (tk, D) bf16
    neg = jnp.float32(-1e9)

    for h in range(num_heads):                                       # static unroll
        lo = h * Dh
        # q @ k^T via dot_general contraction on Dh (no materialized transpose)
        s = jax.lax.dot_general(q[:, lo:lo + Dh], k[:, lo:lo + Dh],
                                (((1,), (1,)), ((), ())),
                                preferred_element_type=jnp.float32) * scale
        s = jnp.where(mask, s, neg)
        m_old = m_sc[h]                                              # (tq, 1)
        m_new = jnp.maximum(m_old, jnp.max(s, axis=-1, keepdims=True))
        alpha = jnp.exp(m_old - m_new)
        p = jnp.exp(s - m_new)
        l_sc[h] = alpha * l_sc[h] + jnp.sum(p, axis=-1, keepdims=True)
        acc_sc[h] = alpha * acc_sc[h] + jnp.dot(
            p.astype(jnp.bfloat16), v[:, lo:lo + Dh],
            preferred_element_type=jnp.float32)
        m_sc[h] = m_new

    @pl.when(ki == nk - 1)
    def _():
        for h in range(num_heads):
            lo = h * Dh
            inv = pl.reciprocal(l_sc[h], approx=True)
            # direct per-head store into the lane-dense output block
            o_ref[:, lo:lo + Dh] = (acc_sc[h] * inv).astype(o_ref.dtype)


def _attn_pallas(args, in_specs, B, Sq, Sk, D, tq, tk, num_heads, scale,
                 causal, dtype):
    Dh = D // num_heads
    cost = pl.CostEstimate(
        flops=4 * B * Sq * Sk * D,
        transcendentals=B * num_heads * Sq * Sk,
        bytes_accessed=int(B * (Sq * D + 2 * Sk * D) * 2
                           + B * Sk * 4 + B * Sq * D * 2))
    return pl.pallas_call(
        functools.partial(_flash_attn_kernel, num_heads=num_heads,
                          scale=scale, causal=causal),
        out_shape=jax.ShapeDtypeStruct((B, Sq, D), dtype),
        grid=(B, Sq // tq, Sk // tk),
        in_specs=in_specs,
        out_specs=pl.BlockSpec((pl.Squeezed(), tq, D),
                               lambda b, qi, ki: (b, qi, 0)),
        scratch_shapes=[pltpu.VMEM((num_heads, tq, 1), jnp.float32),
                        pltpu.VMEM((num_heads, tq, 1), jnp.float32),
                        pltpu.VMEM((num_heads, tq, Dh), jnp.float32)],
        compiler_params=pltpu.CompilerParams(
            dimension_semantics=("parallel", "parallel", "arbitrary")),
        cost_estimate=cost,
    )(*args)


def self_attention(qkv, kpad, *, num_heads, scale, causal, tq=256, tk=256):
    """qkv: (B, S, 3D) bf16 fused projection, kpad: (B, S) key-pad (1=keep)."""
    B, S, D3 = qkv.shape
    D = D3 // 3
    tq = _tile(S, tq, 8)
    tk = _tile(S, tk, 128)
    kpad3 = kpad.reshape(B, 1, S)
    kpspec = pl.BlockSpec((pl.Squeezed(), 1, tk), lambda b, qi, ki: (b, 0, ki))
    if D % 128 == 0:
        # lane-aligned: read Q/K/V straight out of the fused slab (no copies)
        in_specs = [
            pl.BlockSpec((pl.Squeezed(), tq, D), lambda b, qi, ki: (b, qi, 0)),
            pl.BlockSpec((pl.Squeezed(), tk, D), lambda b, qi, ki: (b, ki, 1)),
            pl.BlockSpec((pl.Squeezed(), tk, D), lambda b, qi, ki: (b, ki, 2)),
            kpspec,
        ]
        args = (qkv, qkv, qkv, kpad3)
    else:
        # D not a multiple of 128: split with tiny XLA slices so every block
        # keeps a full-width (legal) last dim.
        q, k, v = qkv[..., :D], qkv[..., D:2 * D], qkv[..., 2 * D:]
        in_specs = [
            pl.BlockSpec((pl.Squeezed(), tq, D), lambda b, qi, ki: (b, qi, 0)),
            pl.BlockSpec((pl.Squeezed(), tk, D), lambda b, qi, ki: (b, ki, 0)),
            pl.BlockSpec((pl.Squeezed(), tk, D), lambda b, qi, ki: (b, ki, 0)),
            kpspec,
        ]
        args = (q, k, v, kpad3)
    return _attn_pallas(args, in_specs, B, S, S, D, tq, tk, num_heads, scale,
                        causal, qkv.dtype)


def cross_attention(q, kv, kpad, *, num_heads, scale, tq=256, tk=256):
    """q: (B, Sq, D) bf16, kv: (B, Sk, 2D) bf16 fused K/V, kpad: (B, Sk)."""
    B, Sq, D = q.shape
    Sk = kv.shape[1]
    tq = _tile(Sq, tq, 8)
    tk = _tile(Sk, tk, 128)
    kpad3 = kpad.reshape(B, 1, Sk)
    qspec = pl.BlockSpec((pl.Squeezed(), tq, D), lambda b, qi, ki: (b, qi, 0))
    kpspec = pl.BlockSpec((pl.Squeezed(), 1, tk), lambda b, qi, ki: (b, 0, ki))
    if D % 128 == 0:
        in_specs = [
            qspec,
            pl.BlockSpec((pl.Squeezed(), tk, D), lambda b, qi, ki: (b, ki, 0)),
            pl.BlockSpec((pl.Squeezed(), tk, D), lambda b, qi, ki: (b, ki, 1)),
            kpspec,
        ]
        args = (q, kv, kv, kpad3)
    else:
        k, v = kv[..., :D], kv[..., D:]
        in_specs = [
            qspec,
            pl.BlockSpec((pl.Squeezed(), tk, D), lambda b, qi, ki: (b, ki, 0)),
            pl.BlockSpec((pl.Squeezed(), tk, D), lambda b, qi, ki: (b, ki, 0)),
            kpspec,
        ]
        args = (q, k, v, kpad3)
    return _attn_pallas(args, in_specs, B, Sq, Sk, D, tq, tk, num_heads, scale,
                        False, q.dtype)


# ----------------------------------------------------------------------------
# Model glue (parameter init + forward pass wiring)
# ----------------------------------------------------------------------------
def sinusoidal_pe(max_len, d_model):
    pos = jnp.arange(max_len, dtype=jnp.float32)[:, None]
    i = jnp.arange(0, d_model, 2, dtype=jnp.float32)
    div = jnp.exp(-math.log(10000.0) * i / d_model)
    pe = jnp.zeros((max_len, d_model), jnp.float32)
    pe = pe.at[:, 0::2].set(jnp.sin(pos * div))
    pe = pe.at[:, 1::2].set(jnp.cos(pos * div))
    return pe


def _w(key, shape, dtype=jnp.bfloat16):
    return (0.02 * jax.random.normal(key, shape, jnp.float32)).astype(dtype)


def _init_self_attn(key, d):
    k1, k2 = jax.random.split(key)
    return {"w_qkv": _w(k1, (d, 3 * d)), "b_qkv": jnp.zeros((3 * d,), jnp.float32),
            "w_o": _w(k2, (d, d)), "b_o": jnp.zeros((d,), jnp.float32)}


def _init_cross_attn(key, d):
    k1, k2, k3 = jax.random.split(key, 3)
    return {"w_q": _w(k1, (d, d)), "b_q": jnp.zeros((d,), jnp.float32),
            "w_kv": _w(k2, (d, 2 * d)), "b_kv": jnp.zeros((2 * d,), jnp.float32),
            "w_o": _w(k3, (d, d)), "b_o": jnp.zeros((d,), jnp.float32)}


def init_params(key, vocab_size, d_model, num_heads, num_layers, d_ff, max_seq_len):
    n_keys = 3 + num_layers * 3 + num_layers * 4
    keys = iter(jax.random.split(key, n_keys))
    # pad vocab projection to a 128-lane multiple (lane-dense output tiles)
    vpad = ((vocab_size + 127) // 128) * 128
    params = {
        "enc_emb": _w(next(keys), (vocab_size, d_model), jnp.float32),
        "dec_emb": _w(next(keys), (vocab_size, d_model), jnp.float32),
        "pe": sinusoidal_pe(max_seq_len, d_model),
        "out_w": _w(next(keys), (d_model, vpad)),
        "out_b": jnp.zeros((vpad,), jnp.float32),
        "enc_layers": [],
        "dec_layers": [],
    }
    for _ in range(num_layers):
        params["enc_layers"].append({
            "self": _init_self_attn(next(keys), d_model),
            "w1": _w(next(keys), (d_model, d_ff)), "b1": jnp.zeros((d_ff,), jnp.float32),
            "w2": _w(next(keys), (d_ff, d_model)), "b2": jnp.zeros((d_model,), jnp.float32),
            "ln1_g": jnp.ones((d_model,), jnp.float32), "ln1_b": jnp.zeros((d_model,), jnp.float32),
            "ln2_g": jnp.ones((d_model,), jnp.float32), "ln2_b": jnp.zeros((d_model,), jnp.float32),
        })
    for _ in range(num_layers):
        params["dec_layers"].append({
            "self": _init_self_attn(next(keys), d_model),
            "cross": _init_cross_attn(next(keys), d_model),
            "w1": _w(next(keys), (d_model, d_ff)), "b1": jnp.zeros((d_ff,), jnp.float32),
            "w2": _w(next(keys), (d_ff, d_model)), "b2": jnp.zeros((d_model,), jnp.float32),
            "ln1_g": jnp.ones((d_model,), jnp.float32), "ln1_b": jnp.zeros((d_model,), jnp.float32),
            "ln2_g": jnp.ones((d_model,), jnp.float32), "ln2_b": jnp.zeros((d_model,), jnp.float32),
            "ln3_g": jnp.ones((d_model,), jnp.float32), "ln3_b": jnp.zeros((d_model,), jnp.float32),
        })
    return params


def transformer_forward(params, src, tgt, src_kpad, tgt_kpad, *,
                        d_model, num_heads, vocab_size, eps):
    B, S = src.shape
    _, T = tgt.shape
    D = d_model
    Dh = D // num_heads
    attn_scale = 1.0 / math.sqrt(Dh)
    emb_scale = math.sqrt(D)

    # ---- Encoder ----
    x = (jnp.take(params["enc_emb"], src, axis=0) * emb_scale
         + params["pe"][:S]).astype(jnp.bfloat16).reshape(B * S, D)
    for lp in params["enc_layers"]:
        sa = lp["self"]
        qkv = linear(x, sa["w_qkv"], sa["b_qkv"])                        # (M, 3D) bf16
        a = self_attention(qkv.reshape(B, S, 3 * D), src_kpad,
                           num_heads=num_heads, scale=attn_scale,
                           causal=False)                                 # (B, S, D) bf16
        x = linear_add_ln(a.reshape(B * S, D), sa["w_o"], sa["b_o"],
                          x, lp["ln1_g"], lp["ln1_b"], eps)
        h = linear(x, lp["w1"], lp["b1"], relu=True)
        x = linear_add_ln(h, lp["w2"], lp["b2"],
                          x, lp["ln2_g"], lp["ln2_b"], eps)
    enc = x                                                              # (B*S, D) bf16

    # ---- Decoder ----
    y = (jnp.take(params["dec_emb"], tgt, axis=0) * emb_scale
         + params["pe"][:T]).astype(jnp.bfloat16).reshape(B * T, D)
    for lp in params["dec_layers"]:
        sa = lp["self"]
        qkv = linear(y, sa["w_qkv"], sa["b_qkv"])
        a = self_attention(qkv.reshape(B, T, 3 * D), tgt_kpad,
                           num_heads=num_heads, scale=attn_scale, causal=True)
        y = linear_add_ln(a.reshape(B * T, D), sa["w_o"], sa["b_o"],
                          y, lp["ln1_g"], lp["ln1_b"], eps)
        ca = lp["cross"]
        qc = linear(y, ca["w_q"], ca["b_q"])                             # (B*T, D)
        kvc = linear(enc, ca["w_kv"], ca["b_kv"])                        # (B*S, 2D)
        c = cross_attention(qc.reshape(B, T, D), kvc.reshape(B, S, 2 * D),
                            src_kpad, num_heads=num_heads, scale=attn_scale)
        y = linear_add_ln(c.reshape(B * T, D), ca["w_o"], ca["b_o"],
                          y, lp["ln2_g"], lp["ln2_b"], eps)
        h = linear(y, lp["w1"], lp["b1"], relu=True)
        y = linear_add_ln(h, lp["w2"], lp["b2"],
                          y, lp["ln3_g"], lp["ln3_b"], eps)

    logits = linear(y, params["out_w"], params["out_b"],
                    out_dtype=jnp.float32)                               # (B*T, Vpad)
    # TODO(synk): reference docstring says "output probability distribution";
    # Encoder/Decoder internals are unspecified, so logits are returned (no
    # final softmax), matching the common convention for such implementations.
    return logits[:, :vocab_size].reshape(B, T, vocab_size)


# ----------------------------------------------------------------------------
# Main
# ----------------------------------------------------------------------------
if __name__ == "__main__":
    vocab_size = 50
    d_model = 32
    num_heads = 4
    num_layers = 2
    d_ff = 4 * d_model
    max_seq_len = 64
    eps = 1e-6

    B, S, T = 2, 8, 8
    assert d_model % num_heads == 0

    key = jax.random.PRNGKey(0)
    kp, ks, kt = jax.random.split(key, 3)
    params = init_params(kp, vocab_size, d_model, num_heads, num_layers,
                         d_ff, max_seq_len)

    src = jax.random.randint(ks, (B, S), 1, vocab_size, dtype=jnp.int32)
    tgt = jax.random.randint(kt, (B, T), 1, vocab_size, dtype=jnp.int32)
    # mark last two source tokens of batch 1 as padding (id 0)
    src = src.at[1, -2:].set(0)

    # key-padding vectors only (1 = keep, 0 = mask); the causal mask for the
    # decoder self-attention is generated in-kernel with broadcasted_iota.
    src_kpad = (src != 0).astype(jnp.float32)                            # (B, S)
    tgt_kpad = (tgt != 0).astype(jnp.float32)                            # (B, T)

    fwd = jax.jit(functools.partial(transformer_forward,
                                    d_model=d_model, num_heads=num_heads,
                                    vocab_size=vocab_size, eps=eps))
    out = fwd(params, src, tgt, src_kpad, tgt_kpad)
    out = jax.block_until_ready(out)

    assert out.shape == (B, T, vocab_size), out.shape
    assert bool(jnp.all(jnp.isfinite(out)))
    print("KERNEL_OK")
</pallas_src>

<mosaic_0001>
module attributes {stable_mosaic.version = 11 : i64} {
  func.func @_matmul_kernel(%arg0: i32, %arg1: i32, %arg2: i32, %arg3: memref<16x32xbf16, #tpu.memory_space<vmem>>, %arg4: memref<32x96xbf16, #tpu.memory_space<vmem>>, %arg5: memref<1x96xf32, #tpu.memory_space<vmem>>, %arg6: memref<16x96xbf16, #tpu.memory_space<vmem>>, %arg7: memref<16x96xf32, #tpu.memory_space<vmem>>) attributes {dimension_semantics = [#tpu.dimension_semantics<parallel>, #tpu.dimension_semantics<parallel>, #tpu.dimension_semantics<arbitrary>], iteration_bounds = array<i64: 1, 1, 1>, scalar_prefetch = 0 : i64, scratch_operands = 1 : i64, tpu.core_type = #tpu.core_type<tc>, window_params = [{transform_indices = @transform_0, window_bounds = array<i64: 16, 32>}, {transform_indices = @transform_1, window_bounds = array<i64: 32, 96>}, {transform_indices = @transform_2, window_bounds = array<i64: 1, 96>}, {transform_indices = @transform_3, window_bounds = array<i64: 16, 96>}]} {
    %c0_i32 = arith.constant 0 : i32
    %0 = arith.cmpi eq, %arg2, %c0_i32 : i32
    %1 = arith.extui %0 : i1 to i32
    %c0_i32_0 = arith.constant 0 : i32
    %2 = arith.cmpi ne, %1, %c0_i32_0 : i32
    scf.if %2 {
      %cst_10 = arith.constant 0.000000e+00 : f32
      %12 = vector.broadcast %cst_10 : f32 to vector<16x96xf32>
      %c0_11 = arith.constant 0 : index
      %c0_12 = arith.constant 0 : index
      %13 = vector.load %arg7[%c0_11, %c0_12] : memref<16x96xf32, #tpu.memory_space<vmem>>, vector<16x96xf32>
      tpu.vector_store %arg7[%c0_11, %c0_12], %12 {strides = array<i32>} : memref<16x96xf32, #tpu.memory_space<vmem>>, vector<16x96xf32>,
    } else {
    }
    %c0 = arith.constant 0 : index
    %c0_1 = arith.constant 0 : index
    %3 = vector.load %arg7[%c0, %c0_1] : memref<16x96xf32, #tpu.memory_space<vmem>>, vector<16x96xf32>
    %c0_2 = arith.constant 0 : index
    %c0_3 = arith.constant 0 : index
    %4 = vector.load %arg3[%c0_2, %c0_3] : memref<16x32xbf16, #tpu.memory_space<vmem>>, vector<16x32xbf16>
    %c0_4 = arith.constant 0 : index
    %c0_5 = arith.constant 0 : index
    %5 = vector.load %arg4[%c0_4, %c0_5] : memref<32x96xbf16, #tpu.memory_space<vmem>>, vector<32x96xbf16>
    %cst = arith.constant dense<0.000000e+00> : vector<16x96xf32>
    %6 = tpu.matmul %4, %5, %cst {dimension_numbers = #tpu.dot_dimension_numbers<[1], [0], [0], [1], [0, 0, 1, 1], [], []>} : vector<16x32xbf16>, vector<32x96xbf16>, vector<16x96xf32> -> vector<16x96xf32>
    %7 = arith.addf %3, %6 : vector<16x96xf32>
    %c0_6 = arith.constant 0 : index
    %c0_7 = arith.constant 0 : index
    %8 = vector.load %arg7[%c0_6, %c0_7] : memref<16x96xf32, #tpu.memory_space<vmem>>, vector<16x96xf32>
    tpu.vector_store %arg7[%c0_6, %c0_7], %7 {strides = array<i32>} : memref<16x96xf32, #tpu.memory_space<vmem>>, vector<16x96xf32>,
    %c0_i32_8 = arith.constant 0 : i32
    %9 = arith.cmpi eq, %arg2, %c0_i32_8 : i32
    %10 = arith.extui %9 : i1 to i32
    %c0_i32_9 = arith.constant 0 : i32
    %11 = arith.cmpi ne, %10, %c0_i32_9 : i32
    scf.if %11 {
      %c0_10 = arith.constant 0 : index
      %c0_11 = arith.constant 0 : index
      %12 = vector.load %arg7[%c0_10, %c0_11] : memref<16x96xf32, #tpu.memory_space<vmem>>, vector<16x96xf32>
      %c0_12 = arith.constant 0 : index
      %c0_13 = arith.constant 0 : index
      %13 = vector.load %arg5[%c0_12, %c0_13] : memref<1x96xf32, #tpu.memory_space<vmem>>, vector<1x96xf32>
      %14 = vector.broadcast %13 : vector<1x96xf32> to vector<16x96xf32>
      %15 = arith.addf %12, %14 : vector<16x96xf32>
      %16 = arith.truncf %15 : vector<16x96xf32> to vector<16x96xbf16>
      %c0_14 = arith.constant 0 : index
      %c0_15 = arith.constant 0 : index
      %17 = vector.load %arg6[%c0_14, %c0_15] : memref<16x96xbf16, #tpu.memory_space<vmem>>, vector<16x96xbf16>
      tpu.vector_store %arg6[%c0_14, %c0_15], %16 {strides = array<i32>} : memref<16x96xbf16, #tpu.memory_space<vmem>>, vector<16x96xbf16>,
    } else {
    }
    return
  }
  func.func @transform_0(%arg0: i32, %arg1: i32, %arg2: i32) -> (i32, i32) {
    %c0_i32 = arith.constant 0 : i32
    return %arg0, %arg2 : i32, i32
  }
  func.func @transform_1(%arg0: i32, %arg1: i32, %arg2: i32) -> (i32, i32) {
    %c0_i32 = arith.constant 0 : i32
    return %arg2, %arg1 : i32, i32
  }
  func.func @transform_2(%arg0: i32, %arg1: i32, %arg2: i32) -> (i32, i32) {
    %c0_i32 = arith.constant 0 : i32
    %c0_i32_0 = arith.constant 0 : i32
    return %c0_i32, %arg1 : i32, i32
  }
  func.func @transform_3(%arg0: i32, %arg1: i32, %arg2: i32) -> (i32, i32) {
    %c0_i32 = arith.constant 0 : i32
    return %arg0, %arg1 : i32, i32
  }
}

module attributes {stable_mosaic.version = 11 : i64} {
  func.func @_matmul_add_ln_kernel(%arg0: i32, %arg1: i32, %arg2: memref<16x32xbf16, #tpu.memory_space<vmem>>, %arg3: memref<32x32xbf16, #tpu.memory_space<vmem>>, %arg4: memref<1x32xf32, #tpu.memory_space<vmem>>, %arg5: memref<16x32xbf16, #tpu.memory_space<vmem>>, %arg6: memref<1x32xf32, #tpu.memory_space<vmem>>, %arg7: memref<1x32xf32, #tpu.memory_space<vmem>>, %arg8: memref<16x32xbf16, #tpu.memory_space<vmem>>, %arg9: memref<16x32xf32, #tpu.memory_space<vmem>>) attributes {dimension_semantics = [#tpu.dimension_semantics<parallel>, #tpu.dimension_semantics<arbitrary>], iteration_bounds = array<i64: 1, 1>, scalar_prefetch = 0 : i64, scratch_operands = 1 : i64, tpu.core_type = #tpu.core_type<tc>, window_params = [{transform_indices = @transform_0, window_bounds = array<i64: 16, 32>}, {transform_indices = @transform_1, window_bounds = array<i64: 32, 32>}, {pipeline_mode = #tpu.pipeline_mode<synchronous>, transform_indices = @transform_2, window_bounds = array<i64: 1, 32>}, {transform_indices = @transform_3, window_bounds = array<i64: 16, 32>}, {pipeline_mode = #tpu.pipeline_mode<synchronous>, transform_indices = @transform_4, window_bounds = array<i64: 1, 32>}, {pipeline_mode = #tpu.pipeline_mode<synchronous>, transform_indices = @transform_5, window_bounds = array<i64: 1, 32>}, {transform_indices = @transform_6, window_bounds = array<i64: 16, 32>}]} {
    %c0_i32 = arith.constant 0 : i32
    %0 = arith.cmpi eq, %arg1, %c0_i32 : i32
    %1 = arith.extui %0 : i1 to i32
    %c0_i32_0 = arith.constant 0 : i32
    %2 = arith.cmpi ne, %1, %c0_i32_0 : i32
    scf.if %2 {
      %cst_10 = arith.constant 0.000000e+00 : f32
      %12 = vector.broadcast %cst_10 : f32 to vector<16x32xf32>
      %c0_11 = arith.constant 0 : index
      %c0_12 = arith.constant 0 : index
      %13 = vector.load %arg9[%c0_11, %c0_12] : memref<16x32xf32, #tpu.memory_space<vmem>>, vector<16x32xf32>
      tpu.vector_store %arg9[%c0_11, %c0_12], %12 {strides = array<i32>} : memref<16x32xf32, #tpu.memory_space<vmem>>, vector<16x32xf32>,
    } else {
    }
    %c0 = arith.constant 0 : index
    %c0_1 = arith.constant 0 : index
    %3 = vector.load %arg9[%c0, %c0_1] : memref<16x32xf32, #tpu.memory_space<vmem>>, vector<16x32xf32>
    %c0_2 = arith.constant 0 : index
    %c0_3 = arith.constant 0 : index
    %4 = vector.load %arg2[%c0_2, %c0_3] : memref<16x32xbf16, #tpu.memory_space<vmem>>, vector<16x32xbf16>
    %c0_4 = arith.constant 0 : index
    %c0_5 = arith.constant 0 : index
    %5 = vector.load %arg3[%c0_4, %c0_5] : memref<32x32xbf16, #tpu.memory_space<vmem>>, vector<32x32xbf16>
    %cst = arith.constant dense<0.000000e+00> : vector<16x32xf32>
    %6 = tpu.matmul %4, %5, %cst {dimension_numbers = #tpu.dot_dimension_numbers<[1], [0], [0], [1], [0, 0, 1, 1], [], []>} : vector<16x32xbf16>, vector<32x32xbf16>, vector<16x32xf32> -> vector<16x32xf32>
    %7 = arith.addf %3, %6 : vector<16x32xf32>
    %c0_6 = arith.constant 0 : index
    %c0_7 = arith.constant 0 : index
    %8 = vector.load %arg9[%c0_6, %c0_7] : memref<16x32xf32, #tpu.memory_space<vmem>>, vector<16x32xf32>
    tpu.vector_store %arg9[%c0_6, %c0_7], %7 {strides = array<i32>} : memref<16x32xf32, #tpu.memory_space<vmem>>, vector<16x32xf32>,
    %c0_i32_8 = arith.constant 0 : i32
    %9 = arith.cmpi eq, %arg1, %c0_i32_8 : i32
    %10 = arith.extui %9 : i1 to i32
    %c0_i32_9 = arith.constant 0 : i32
    %11 = arith.cmpi ne, %10, %c0_i32_9 : i32
    scf.if %11 {
      %c0_10 = arith.constant 0 : index
      %c0_11 = arith.constant 0 : index
      %12 = vector.load %arg9[%c0_10, %c0_11] : memref<16x32xf32, #tpu.memory_space<vmem>>, vector<16x32xf32>
      %c0_12 = arith.constant 0 : index
      %c0_13 = arith.constant 0 : index
      %13 = vector.load %arg4[%c0_12, %c0_13] : memref<1x32xf32, #tpu.memory_space<vmem>>, vector<1x32xf32>
      %14 = vector.broadcast %13 : vector<1x32xf32> to vector<16x32xf32>
      %15 = arith.addf %12, %14 : vector<16x32xf32>
      %c0_14 = arith.constant 0 : index
      %c0_15 = arith.constant 0 : index
      %16 = vector.load %arg5[%c0_14, %c0_15] : memref<16x32xbf16, #tpu.memory_space<vmem>>, vector<16x32xbf16>
      %17 = arith.extf %16 : vector<16x32xbf16> to vector<16x32xf32>
      %18 = arith.addf %15, %17 : vector<16x32xf32>
      %cst_16 = arith.constant dense<0.000000e+00> : vector<16xf32>
      %19 = vector.multi_reduction <add>, %18, %cst_16 [1] : vector<16x32xf32> to vector<16xf32>
      %20 = vector.shape_cast %19 : vector<16xf32> to vector<16x1xf32>
      %cst_17 = arith.constant 3.200000e+01 : f32
      %21 = vector.broadcast %cst_17 : f32 to vector<16x1xf32>
      %22 = arith.divf %20, %21 : vector<16x1xf32>
      %23 = vector.broadcast %22 : vector<16x1xf32> to vector<16x32xf32>
      %24 = arith.subf %18, %23 : vector<16x32xf32>
      %25 = arith.mulf %24, %24 : vector<16x32xf32>
      %cst_18 = arith.constant dense<0.000000e+00> : vector<16xf32>
      %26 = vector.multi_reduction <add>, %25, %cst_18 [1] : vector<16x32xf32> to vector<16xf32>
      %27 = vector.shape_cast %26 : vector<16xf32> to vector<16x1xf32>
      %cst_19 = arith.constant 3.200000e+01 : f32
      %28 = vector.broadcast %cst_19 : f32 to vector<16x1xf32>
      %29 = arith.divf %27, %28 : vector<16x1xf32>
      %cst_20 = arith.constant 9.99999997E-7 : f32
      %30 = vector.broadcast %cst_20 : f32 to vector<16x1xf32>
      %31 = arith.addf %29, %30 : vector<16x1xf32>
      %32 = math.rsqrt %31 : vector<16x1xf32>
      %33 = vector.broadcast %32 : vector<16x1xf32> to vector<16x32xf32>
      %34 = arith.mulf %24, %33 : vector<16x32xf32>
      %c0_21 = arith.constant 0 : index
      %c0_22 = arith.constant 0 : index
      %35 = vector.load %arg6[%c0_21, %c0_22] : memref<1x32xf32, #tpu.memory_space<vmem>>, vector<1x32xf32>
      %36 = vector.broadcast %35 : vector<1x32xf32> to vector<16x32xf32>
      %37 = arith.mulf %34, %36 : vector<16x32xf32>
      %c0_23 = arith.constant 0 : index
      %c0_24 = arith.constant 0 : index
      %38 = vector.load %arg7[%c0_23, %c0_24] : memref<1x32xf32, #tpu.memory_space<vmem>>, vector<1x32xf32>
      %39 = vector.broadcast %38 : vector<1x32xf32> to vector<16x32xf32>
      %40 = arith.addf %37, %39 : vector<16x32xf32>
      %41 = arith.truncf %40 : vector<16x32xf32> to vector<16x32xbf16>
      %c0_25 = arith.constant 0 : index
      %c0_26 = arith.constant 0 : index
      %42 = vector.load %arg8[%c0_25, %c0_26] : memref<16x32xbf16, #tpu.memory_space<vmem>>, vector<16x32xbf16>
      tpu.vector_store %arg8[%c0_25, %c0_26], %41 {strides = array<i32>} : memref<16x32xbf16, #tpu.memory_space<vmem>>, vector<16x32xbf16>,
    } else {
    }
    return
  }
  func.func @transform_0(%arg0: i32, %arg1: i32) -> (i32, i32) {
    %c0_i32 = arith.constant 0 : i32
    return %arg0, %arg1 : i32, i32
  }
  func.func @transform_1(%arg0: i32, %arg1: i32) -> (i32, i32) {
    %c0_i32 = arith.constant 0 : i32
    %c0_i32_0 = arith.constant 0 : i32
    return %arg1, %c0_i32 : i32, i32
  }
  func.func @transform_2(%arg0: i32, %arg1: i32) -> (i32, i32) {
    %c0_i32 = arith.constant 0 : i32
    %c0_i32_0 = arith.constant 0 : i32
    %c0_i32_1 = arith.constant 0 : i32
    return %c0_i32, %c0_i32_0 : i32, i32
  }
  func.func @transform_3(%arg0: i32, %arg1: i32) -> (i32, i32) {
    %c0_i32 = arith.constant 0 : i32
    %c0_i32_0 = arith.constant 0 : i32
    return %arg0, %c0_i32 : i32, i32
  }
  func.func @transform_4(%arg0: i32, %arg1: i32) -> (i32, i32) {
    %c0_i32 = arith.constant 0 : i32
    %c0_i32_0 = arith.constant 0 : i32
    %c0_i32_1 = arith.constant 0 : i32
    return %c0_i32, %c0_i32_0 : i32, i32
  }
  func.func @transform_5(%arg0: i32, %arg1: i32) -> (i32, i32) {
    %c0_i32 = arith.constant 0 : i32
    %c0_i32_0 = arith.constant 0 : i32
    %c0_i32_1 = arith.constant 0 : i32
    return %c0_i32, %c0_i32_0 : i32, i32
  }
  func.func @transform_6(%arg0: i32, %arg1: i32) -> (i32, i32) {
    %c0_i32 = arith.constant 0 : i32
    %c0_i32_0 = arith.constant 0 : i32
    return %arg0, %c0_i32 : i32, i32
  }
}

module attributes {stable_mosaic.version = 11 : i64} {
  func.func @_flash_attn_kernel(%arg0: i32, %arg1: i32, %arg2: i32, %arg3: memref<1x8x32xbf16, #tpu.memory_space<vmem>>, %arg4: memref<1x8x32xbf16, #tpu.memory_space<vmem>>, %arg5: memref<1x8x32xbf16, #tpu.memory_space<vmem>>, %arg6: memref<1x1x8xf32, #tpu.memory_space<vmem>>, %arg7: memref<1x8x32xbf16, #tpu.memory_space<vmem>>, %arg8: memref<4x8x1xf32, #tpu.memory_space<vmem>>, %arg9: memref<4x8x1xf32, #tpu.memory_space<vmem>>, %arg10: memref<4x8x8xf32, #tpu.memory_space<vmem>>) attributes {dimension_semantics = [#tpu.dimension_semantics<parallel>, #tpu.dimension_semantics<parallel>, #tpu.dimension_semantics<arbitrary>], iteration_bounds = array<i64: 2, 1, 1>, scalar_prefetch = 0 : i64, scratch_operands = 3 : i64, tpu.core_type = #tpu.core_type<tc>, window_params = [{transform_indices = @transform_0, window_bounds = array<i64: 1, 8, 32>}, {transform_indices = @transform_1, window_bounds = array<i64: 1, 8, 32>}, {transform_indices = @transform_2, window_bounds = array<i64: 1, 8, 32>}, {transform_indices = @transform_3, window_bounds = array<i64: 1, 1, 8>}, {transform_indices = @transform_4, window_bounds = array<i64: 1, 8, 32>}]} {
    %c0_i32 = arith.constant 0 : i32
    %0 = arith.cmpi eq, %arg2, %c0_i32 : i32
    %1 = arith.extui %0 : i1 to i32
    %c0_i32_0 = arith.constant 0 : i32
    %2 = arith.cmpi ne, %1, %c0_i32_0 : i32
    scf.if %2 {
      %cst_107 = arith.constant -1.000000e+30 : f32
      %184 = vector.broadcast %cst_107 : f32 to vector<4x8x1xf32>
      %c0_108 = arith.constant 0 : index
      %c0_109 = arith.constant 0 : index
      %c0_110 = arith.constant 0 : index
      %185 = vector.load %arg8[%c0_108, %c0_109, %c0_110] : memref<4x8x1xf32, #tpu.memory_space<vmem>>, vector<4x8x1xf32>
      tpu.vector_store %arg8[%c0_108, %c0_109, %c0_110], %184 {strides = array<i32>} : memref<4x8x1xf32, #tpu.memory_space<vmem>>, vector<4x8x1xf32>,
      %cst_111 = arith.constant 0.000000e+00 : f32
      %186 = vector.broadcast %cst_111 : f32 to vector<4x8x1xf32>
      %c0_112 = arith.constant 0 : index
      %c0_113 = arith.constant 0 : index
      %c0_114 = arith.constant 0 : index
      %187 = vector.load %arg9[%c0_112, %c0_113, %c0_114] : memref<4x8x1xf32, #tpu.memory_space<vmem>>, vector<4x8x1xf32>
      tpu.vector_store %arg9[%c0_112, %c0_113, %c0_114], %186 {strides = array<i32>} : memref<4x8x1xf32, #tpu.memory_space<vmem>>, vector<4x8x1xf32>,
      %cst_115 = arith.constant 0.000000e+00 : f32
      %188 = vector.broadcast %cst_115 : f32 to vector<4x8x8xf32>
      %c0_116 = arith.constant 0 : index
      %c0_117 = arith.constant 0 : index
      %c0_118 = arith.constant 0 : index
      %189 = vector.load %arg10[%c0_116, %c0_117, %c0_118] : memref<4x8x8xf32, #tpu.memory_space<vmem>>, vector<4x8x8xf32>
      tpu.vector_store %arg10[%c0_116, %c0_117, %c0_118], %188 {strides = array<i32>} : memref<4x8x8xf32, #tpu.memory_space<vmem>>, vector<4x8x8xf32>,
    } else {
    }
    %c0 = arith.constant 0 : index
    %c0_1 = arith.constant 0 : index
    %c0_2 = arith.constant 0 : index
    %3 = vector.load %arg6[%c0, %c0_1, %c0_2] : memref<1x1x8xf32, #tpu.memory_space<vmem>>, vector<1x1x8xf32>
    %4 = vector.shape_cast %3 : vector<1x1x8xf32> to vector<1x8xf32>
    %cst = arith.constant 0.000000e+00 : f32
    %5 = vector.broadcast %cst : f32 to vector<1x8xf32>
    %6 = arith.cmpf ogt, %4, %5 : vector<1x8xf32>
    %c0_3 = arith.constant 0 : index
    %c0_4 = arith.constant 0 : index
    %c0_5 = arith.constant 0 : index
    %7 = vector.load %arg3[%c0_3, %c0_4, %c0_5] : memref<1x8x32xbf16, #tpu.memory_space<vmem>>, vector<1x8x32xbf16>
    %8 = vector.shape_cast %7 : vector<1x8x32xbf16> to vector<8x32xbf16>
    %c0_6 = arith.constant 0 : index
    %c0_7 = arith.constant 0 : index
    %c0_8 = arith.constant 0 : index
    %9 = vector.load %arg4[%c0_6, %c0_7, %c0_8] : memref<1x8x32xbf16, #tpu.memory_space<vmem>>, vector<1x8x32xbf16>
    %10 = vector.shape_cast %9 : vector<1x8x32xbf16> to vector<8x32xbf16>
    %c0_9 = arith.constant 0 : index
    %c0_10 = arith.constant 0 : index
    %c0_11 = arith.constant 0 : index
    %11 = vector.load %arg5[%c0_9, %c0_10, %c0_11] : memref<1x8x32xbf16, #tpu.memory_space<vmem>>, vector<1x8x32xbf16>
    %12 = vector.shape_cast %11 : vector<1x8x32xbf16> to vector<8x32xbf16>
    %13 = vector.extract_strided_slice %8 {offsets = [0, 0], sizes = [8, 8], strides = [1, 1]} : vector<8x32xbf16> to vector<8x8xbf16>
    %14 = vector.extract_strided_slice %10 {offsets = [0, 0], sizes = [8, 8], strides = [1, 1]} : vector<8x32xbf16> to vector<8x8xbf16>
    %cst_12 = arith.constant dense<0.000000e+00> : vector<8x8xf32>
    %15 = tpu.matmul %13, %14, %cst_12 {dimension_numbers = #tpu.dot_dimension_numbers<[1], [1], [0], [0], [0, 0, 1, 0], [], []>} : vector<8x8xbf16>, vector<8x8xbf16>, vector<8x8xf32> -> vector<8x8xf32>
    %cst_13 = arith.constant 0.353553385 : f32
    %16 = vector.broadcast %cst_13 : f32 to vector<8x8xf32>
    %17 = arith.mulf %15, %16 : vector<8x8xf32>
    %cst_14 = arith.constant -1.000000e+09 : f32
    %18 = vector.shape_cast %6 : vector<1x8xi1> to vector<1x8xi1>
    %19 = vector.broadcast %18 : vector<1x8xi1> to vector<8x8xi1>
    %20 = vector.broadcast %cst_14 : f32 to vector<8x8xf32>
    %21 = arith.select %19, %17, %20 : vector<8x8xi1>, vector<8x8xf32>
    %c0_15 = arith.constant 0 : index
    %c0_16 = arith.constant 0 : index
    %c0_17 = arith.constant 0 : index
    %22 = vector.load %arg8[%c0_15, %c0_16, %c0_17] : memref<4x8x1xf32, #tpu.memory_space<vmem>>, vector<1x8x1xf32>
    %23 = vector.shape_cast %22 : vector<1x8x1xf32> to vector<8x1xf32>
    %cst_18 = arith.constant dense<0xFF800000> : vector<8xf32>
    %24 = vector.multi_reduction <maximumf>, %21, %cst_18 [1] : vector<8x8xf32> to vector<8xf32>
    %25 = vector.shape_cast %24 : vector<8xf32> to vector<8x1xf32>
    %26 = arith.maximumf %23, %25 : vector<8x1xf32>
    %27 = arith.subf %23, %26 : vector<8x1xf32>
    %28 = math.exp %27 : vector<8x1xf32>
    %29 = vector.broadcast %26 : vector<8x1xf32> to vector<8x8xf32>
    %30 = arith.subf %21, %29 : vector<8x8xf32>
    %31 = math.exp %30 : vector<8x8xf32>
    %c0_19 = arith.constant 0 : index
    %c0_20 = arith.constant 0 : index
    %c0_21 = arith.constant 0 : index
    %32 = vector.load %arg9[%c0_19, %c0_20, %c0_21] : memref<4x8x1xf32, #tpu.memory_space<vmem>>, vector<1x8x1xf32>
    %33 = vector.shape_cast %32 : vector<1x8x1xf32> to vector<8x1xf32>
    %34 = arith.mulf %28, %33 : vector<8x1xf32>
    %cst_22 = arith.constant dense<0.000000e+00> : vector<8xf32>
    %35 = vector.multi_reduction <add>, %31, %cst_22 [1] : vector<8x8xf32> to vector<8xf32>
    %36 = vector.shape_cast %35 : vector<8xf32> to vector<8x1xf32>
    %37 = arith.addf %34, %36 : vector<8x1xf32>
    %c0_23 = arith.constant 0 : index
    %c0_24 = arith.constant 0 : index
    %c0_25 = arith.constant 0 : index
    %38 = vector.load %arg9[%c0_23, %c0_24, %c0_25] : memref<4x8x1xf32, #tpu.memory_space<vmem>>, vector<1x8x1xf32>
    %39 = vector.shape_cast %38 : vector<1x8x1xf32> to vector<8x1xf32>
    %40 = vector.shape_cast %37 : vector<8x1xf32> to vector<1x8x1xf32>
    tpu.vector_store %arg9[%c0_23, %c0_24, %c0_25], %40 {strides = array<i32>} : memref<4x8x1xf32, #tpu.memory_space<vmem>>, vector<1x8x1xf32>,
    %c0_26 = arith.constant 0 : index
    %c0_27 = arith.constant 0 : index
    %c0_28 = arith.constant 0 : index
    %41 = vector.load %arg10[%c0_26, %c0_27, %c0_28] : memref<4x8x8xf32, #tpu.memory_space<vmem>>, vector<1x8x8xf32>
    %42 = vector.shape_cast %41 : vector<1x8x8xf32> to vector<8x8xf32>
    %43 = vector.broadcast %28 : vector<8x1xf32> to vector<8x8xf32>
    %44 = arith.mulf %43, %42 : vector<8x8xf32>
    %45 = arith.truncf %31 : vector<8x8xf32> to vector<8x8xbf16>
    %46 = vector.extract_strided_slice %12 {offsets = [0, 0], sizes = [8, 8], strides = [1, 1]} : vector<8x32xbf16> to vector<8x8xbf16>
    %cst_29 = arith.constant dense<0.000000e+00> : vector<8x8xf32>
    %47 = tpu.matmul %45, %46, %cst_29 {dimension_numbers = #tpu.dot_dimension_numbers<[1], [0], [0], [1], [0, 0, 1, 1], [], []>} : vector<8x8xbf16>, vector<8x8xbf16>, vector<8x8xf32> -> vector<8x8xf32>
    %48 = arith.addf %44, %47 : vector<8x8xf32>
    %c0_30 = arith.constant 0 : index
    %c0_31 = arith.constant 0 : index
    %c0_32 = arith.constant 0 : index
    %49 = vector.load %arg10[%c0_30, %c0_31, %c0_32] : memref<4x8x8xf32, #tpu.memory_space<vmem>>, vector<1x8x8xf32>
    %50 = vector.shape_cast %49 : vector<1x8x8xf32> to vector<8x8xf32>
    %51 = vector.shape_cast %48 : vector<8x8xf32> to vector<1x8x8xf32>
    tpu.vector_store %arg10[%c0_30, %c0_31, %c0_32], %51 {strides = array<i32>} : memref<4x8x8xf32, #tpu.memory_space<vmem>>, vector<1x8x8xf32>,
    %c0_33 = arith.constant 0 : index
    %c0_34 = arith.constant 0 : index
    %c0_35 = arith.constant 0 : index
    %52 = vector.load %arg8[%c0_33, %c0_34, %c0_35] : memref<4x8x1xf32, #tpu.memory_space<vmem>>, vector<1x8x1xf32>
    %53 = vector.shape_cast %52 : vector<1x8x1xf32> to vector<8x1xf32>
    %54 = vector.shape_cast %26 : vector<8x1xf32> to vector<1x8x1xf32>
    tpu.vector_store %arg8[%c0_33, %c0_34, %c0_35], %54 {strides = array<i32>} : memref<4x8x1xf32, #tpu.memory_space<vmem>>, vector<1x8x1xf32>,
    %55 = vector.extract_strided_slice %8 {offsets = [0, 8], sizes = [8, 8], strides = [1, 1]} : vector<8x32xbf16> to vector<8x8xbf16>
    %56 = vector.extract_strided_slice %10 {offsets = [0, 8], sizes = [8, 8], strides = [1, 1]} : vector<8x32xbf16> to vector<8x8xbf16>
    %cst_36 = arith.constant dense<0.000000e+00> : vector<8x8xf32>
    %57 = tpu.matmul %55, %56, %cst_36 {dimension_numbers = #tpu.dot_dimension_numbers<[1], [1], [0], [0], [0, 0, 1, 0], [], []>} : vector<8x8xbf16>, vector<8x8xbf16>, vector<8x8xf32> -> vector<8x8xf32>
    %cst_37 = arith.constant 0.353553385 : f32
    %58 = vector.broadcast %cst_37 : f32 to vector<8x8xf32>
    %59 = arith.mulf %57, %58 : vector<8x8xf32>
    %cst_38 = arith.constant -1.000000e+09 : f32
    %60 = vector.shape_cast %6 : vector<1x8xi1> to vector<1x8xi1>
    %61 = vector.broadcast %60 : vector<1x8xi1> to vector<8x8xi1>
    %62 = vector.broadcast %cst_38 : f32 to vector<8x8xf32>
    %63 = arith.select %61, %59, %62 : vector<8x8xi1>, vector<8x8xf32>
    %c1 = arith.constant 1 : index
    %c0_39 = arith.constant 0 : index
    %c0_40 = arith.constant 0 : index
    %64 = vector.load %arg8[%c1, %c0_39, %c0_40] : memref<4x8x1xf32, #tpu.memory_space<vmem>>, vector<1x8x1xf32>
    %65 = vector.shape_cast %64 : vector<1x8x1xf32> to vector<8x1xf32>
    %cst_41 = arith.constant dense<0xFF800000> : vector<8xf32>
    %66 = vector.multi_reduction <maximumf>, %63, %cst_41 [1] : vector<8x8xf32> to vector<8xf32>
    %67 = vector.shape_cast %66 : vector<8xf32> to vector<8x1xf32>
    %68 = arith.maximumf %65, %67 : vector<8x1xf32>
    %69 = arith.subf %65, %68 : vector<8x1xf32>
    %70 = math.exp %69 : vector<8x1xf32>
    %71 = vector.broadcast %68 : vector<8x1xf32> to vector<8x8xf32>
    %72 = arith.subf %63, %71 : vector<8x8xf32>
    %73 = math.exp %72 : vector<8x8xf32>
    %c1_42 = arith.constant 1 : index
    %c0_43 = arith.constant 0 : index
    %c0_44 = arith.constant 0 : index
    %74 = vector.load %arg9[%c1_42, %c0_43, %c0_44] : memref<4x8x1xf32, #tpu.memory_space<vmem>>, vector<1x8x1xf32>
    %75 = vector.shape_cast %74 : vector<1x8x1xf32> to vector<8x1xf32>
    %76 = arith.mulf %70, %75 : vector<8x1xf32>
    %cst_45 = arith.constant dense<0.000000e+00> : vector<8xf32>
    %77 = vector.multi_reduction <add>, %73, %cst_45 [1] : vector<8x8xf32> to vector<8xf32>
    %78 = vector.shape_cast %77 : vector<8xf32> to vector<8x1xf32>
    %79 = arith.addf %76, %78 : vector<8x1xf32>
    %c1_46 = arith.constant 1 : index
    %c0_47 = arith.constant 0 : index
    %c0_48 = arith.constant 0 : index
    %80 = vector.load %arg9[%c1_46, %c0_47, %c0_48] : memref<4x8x1xf32, #tpu.memory_space<vmem>>, vector<1x8x1xf32>
    %81 = vector.shape_cast %80 : vector<1x8x1xf32> to vector<8x1xf32>
    %82 = vector.shape_cast %79 : vector<8x1xf32> to vector<1x8x1xf32>
    tpu.vector_store %arg9[%c1_46, %c0_47, %c0_48], %82 {strides = array<i32>} : memref<4x8x1xf32, #tpu.memory_space<vmem>>, vector<1x8x1xf32>,
    %c1_49 = arith.constant 1 : index
    %c0_50 = arith.constant 0 : index
    %c0_51 = arith.constant 0 : index
    %83 = vector.load %arg10[%c1_49, %c0_50, %c0_51] : memref<4x8x8xf32, #tpu.memory_space<vmem>>, vector<1x8x8xf32>
    %84 = vector.shape_cast %83 : vector<1x8x8xf32> to vector<8x8xf32>
    %85 = vector.broadcast %70 : vector<8x1xf32> to vector<8x8xf32>
    %86 = arith.mulf %85, %84 : vector<8x8xf32>
    %87 = arith.truncf %73 : vector<8x8xf32> to vector<8x8xbf16>
    %88 = vector.extract_strided_slice %12 {offsets = [0, 8], sizes = [8, 8], strides = [1, 1]} : vector<8x32xbf16> to vector<8x8xbf16>
    %cst_52 = arith.constant dense<0.000000e+00> : vector<8x8xf32>
    %89 = tpu.matmul %87, %88, %cst_52 {dimension_numbers = #tpu.dot_dimension_numbers<[1], [0], [0], [1], [0, 0, 1, 1], [], []>} : vector<8x8xbf16>, vector<8x8xbf16>, vector<8x8xf32> -> vector<8x8xf32>
    %90 = arith.addf %86, %89 : vector<8x8xf32>
    %c1_53 = arith.constant 1 : index
    %c0_54 = arith.constant 0 : index
    %c0_55 = arith.constant 0 : index
    %91 = vector.load %arg10[%c1_53, %c0_54, %c0_55] : memref<4x8x8xf32, #tpu.memory_space<vmem>>, vector<1x8x8xf32>
    %92 = vector.shape_cast %91 : vector<1x8x8xf32> to vector<8x8xf32>
    %93 = vector.shape_cast %90 : vector<8x8xf32> to vector<1x8x8xf32>
    tpu.vector_store %arg10[%c1_53, %c0_54, %c0_55], %93 {strides = array<i32>} : memref<4x8x8xf32, #tpu.memory_space<vmem>>, vector<1x8x8xf32>,
    %c1_56 = arith.constant 1 : index
    %c0_57 = arith.constant 0 : index
    %c0_58 = arith.constant 0 : index
    %94 = vector.load %arg8[%c1_56, %c0_57, %c0_58] : memref<4x8x1xf32, #tpu.memory_space<vmem>>, vector<1x8x1xf32>
    %95 = vector.shape_cast %94 : vector<1x8x1xf32> to vector<8x1xf32>
    %96 = vector.shape_cast %68 : vector<8x1xf32> to vector<1x8x1xf32>
    tpu.vector_store %arg8[%c1_56, %c0_57, %c0_58], %96 {strides = array<i32>} : memref<4x8x1xf32, #tpu.memory_space<vmem>>, vector<1x8x1xf32>,
    %97 = vector.extract_strided_slice %8 {offsets = [0, 16], sizes = [8, 8], strides = [1, 1]} : vector<8x32xbf16> to vector<8x8xbf16>
    %98 = vector.extract_strided_slice %10 {offsets = [0, 16], sizes = [8, 8], strides = [1, 1]} : vector<8x32xbf16> to vector<8x8xbf16>
    %cst_59 = arith.constant dense<0.000000e+00> : vector<8x8xf32>
    %99 = tpu.matmul %97, %98, %cst_59 {dimension_numbers = #tpu.dot_dimension_numbers<[1], [1], [0], [0], [0, 0, 1, 0], [], []>} : vector<8x8xbf16>, vector<8x8xbf16>, vector<8x8xf32> -> vector<8x8xf32>
    %cst_60 = arith.constant 0.353553385 : f32
    %100 = vector.broadcast %cst_60 : f32 to vector<8x8xf32>
    %101 = arith.mulf %99, %100 : vector<8x8xf32>
    %cst_61 = arith.constant -1.000000e+09 : f32
    %102 = vector.shape_cast %6 : vector<1x8xi1> to vector<1x8xi1>
    %103 = vector.broadcast %102 : vector<1x8xi1> to vector<8x8xi1>
    %104 = vector.broadcast %cst_61 : f32 to vector<8x8xf32>
    %105 = arith.select %103, %101, %104 : vector<8x8xi1>, vector<8x8xf32>
    %c2 = arith.constant 2 : index
    %c0_62 = arith.constant 0 : index
    %c0_63 = arith.constant 0 : index
    %106 = vector.load %arg8[%c2, %c0_62, %c0_63] : memref<4x8x1xf32, #tpu.memory_space<vmem>>, vector<1x8x1xf32>
    %107 = vector.shape_cast %106 : vector<1x8x1xf32> to vector<8x1xf32>
    %cst_64 = arith.constant dense<0xFF800000> : vector<8xf32>
    %108 = vector.multi_reduction <maximumf>, %105, %cst_64 [1] : vector<8x8xf32> to vector<8xf32>
    %109 = vector.shape_cast %108 : vector<8xf32> to vector<8x1xf32>
    %110 = arith.maximumf %107, %109 : vector<8x1xf32>
    %111 = arith.subf %107, %110 : vector<8x1xf32>
    %112 = math.exp %111 : vector<8x1xf32>
    %113 = vector.broadcast %110 : vector<8x1xf32> to vector<8x8xf32>
    %114 = arith.subf %105, %113 : vector<8x8xf32>
    %115 = math.exp %114 : vector<8x8xf32>
    %c2_65 = arith.constant 2 : index
    %c0_66 = arith.constant 0 : index
    %c0_67 = arith.constant 0 : index
    %116 = vector.load %arg9[%c2_65, %c0_66, %c0_67] : memref<4x8x1xf32, #tpu.memory_space<vmem>>, vector<1x8x1xf32>
    %117 = vector.shape_cast %116 : vector<1x8x1xf32> to vector<8x1xf32>
    %118 = arith.mulf %112, %117 : vector<8x1xf32>
    %cst_68 = arith.constant dense<0.000000e+00> : vector<8xf32>
    %119 = vector.multi_reduction <add>, %115, %cst_68 [1] : vector<8x8xf32> to vector<8xf32>
    %120 = vector.shape_cast %119 : vector<8xf32> to vector<8x1xf32>
    %121 = arith.addf %118, %120 : vector<8x1xf32>
    %c2_69 = arith.constant 2 : index
    %c0_70 = arith.constant 0 : index
    %c0_71 = arith.constant 0 : index
    %122 = vector.load %arg9[%c2_69, %c0_70, %c0_71] : memref<4x8x1xf32, #tpu.memory_space<vmem>>, vector<1x8x1xf32>
    %123 = vector.shape_cast %122 : vector<1x8x1xf32> to vector<8x1xf32>
    %124 = vector.shape_cast %121 : vector<8x1xf32> to vector<1x8x1xf32>
    tpu.vector_store %arg9[%c2_69, %c0_70, %c0_71], %124 {strides = array<i32>} : memref<4x8x1xf32, #tpu.memory_space<vmem>>, vector<1x8x1xf32>,
    %c2_72 = arith.constant 2 : index
    %c0_73 = arith.constant 0 : index
    %c0_74 = arith.constant 0 : index
    %125 = vector.load %arg10[%c2_72, %c0_73, %c0_74] : memref<4x8x8xf32, #tpu.memory_space<vmem>>, vector<1x8x8xf32>
    %126 = vector.shape_cast %125 : vector<1x8x8xf32> to vector<8x8xf32>
    %127 = vector.broadcast %112 : vector<8x1xf32> to vector<8x8xf32>
    %128 = arith.mulf %127, %126 : vector<8x8xf32>
    %129 = arith.truncf %115 : vector<8x8xf32> to vector<8x8xbf16>
    %130 = vector.extract_strided_slice %12 {offsets = [0, 16], sizes = [8, 8], strides = [1, 1]} : vector<8x32xbf16> to vector<8x8xbf16>
    %cst_75 = arith.constant dense<0.000000e+00> : vector<8x8xf32>
    %131 = tpu.matmul %129, %130, %cst_75 {dimension_numbers = #tpu.dot_dimension_numbers<[1], [0], [0], [1], [0, 0, 1, 1], [], []>} : vector<8x8xbf16>, vector<8x8xbf16>, vector<8x8xf32> -> vector<8x8xf32>
    %132 = arith.addf %128, %131 : vector<8x8xf32>
    %c2_76 = arith.constant 2 : index
    %c0_77 = arith.constant 0 : index
    %c0_78 = arith.constant 0 : index
    %133 = vector.load %arg10[%c2_76, %c0_77, %c0_78] : memref<4x8x8xf32, #tpu.memory_space<vmem>>, vector<1x8x8xf32>
    %134 = vector.shape_cast %133 : vector<1x8x8xf32> to vector<8x8xf32>
    %135 = vector.shape_cast %132 : vector<8x8xf32> to vector<1x8x8xf32>
    tpu.vector_store %arg10[%c2_76, %c0_77, %c0_78], %135 {strides = array<i32>} : memref<4x8x8xf32, #tpu.memory_space<vmem>>, vector<1x8x8xf32>,
    %c2_79 = arith.constant 2 : index
    %c0_80 = arith.constant 0 : index
    %c0_81 = arith.constant 0 : index
    %136 = vector.load %arg8[%c2_79, %c0_80, %c0_81] : memref<4x8x1xf32, #tpu.memory_space<vmem>>, vector<1x8x1xf32>
    %137 = vector.shape_cast %136 : vector<1x8x1xf32> to vector<8x1xf32>
    %138 = vector.shape_cast %110 : vector<8x1xf32> to vector<1x8x1xf32>
    tpu.vector_store %arg8[%c2_79, %c0_80, %c0_81], %138 {strides = array<i32>} : memref<4x8x1xf32, #tpu.memory_space<vmem>>, vector<1x8x1xf32>,
    %139 = vector.extract_strided_slice %8 {offsets = [0, 24], sizes = [8, 8], strides = [1, 1]} : vector<8x32xbf16> to vector<8x8xbf16>
    %140 = vector.extract_strided_slice %10 {offsets = [0, 24], sizes = [8, 8], strides = [1, 1]} : vector<8x32xbf16> to vector<8x8xbf16>
    %cst_82 = arith.constant dense<0.000000e+00> : vector<8x8xf32>
    %141 = tpu.matmul %139, %140, %cst_82 {dimension_numbers = #tpu.dot_dimension_numbers<[1], [1], [0], [0], [0, 0, 1, 0], [], []>} : vector<8x8xbf16>, vector<8x8xbf16>, vector<8x8xf32> -> vector<8x8xf32>
    %cst_83 = arith.constant 0.353553385 : f32
    %142 = vector.broadcast %cst_83 : f32 to vector<8x8xf32>
    %143 = arith.mulf %141, %142 : vector<8x8xf32>
    %cst_84 = arith.constant -1.000000e+09 : f32
    %144 = vector.shape_cast %6 : vector<1x8xi1> to vector<1x8xi1>
    %145 = vector.broadcast %144 : vector<1x8xi1> to vector<8x8xi1>
    %146 = vector.broadcast %cst_84 : f32 to vector<8x8xf32>
    %147 = arith.select %145, %143, %146 : vector<8x8xi1>, vector<8x8xf32>
    %c3 = arith.constant 3 : index
    %c0_85 = arith.constant 0 : index
    %c0_86 = arith.constant 0 : index
    %148 = vector.load %arg8[%c3, %c0_85, %c0_86] : memref<4x8x1xf32, #tpu.memory_space<vmem>>, vector<1x8x1xf32>
    %149 = vector.shape_cast %148 : vector<1x8x1xf32> to vector<8x1xf32>
    %cst_87 = arith.constant dense<0xFF800000> : vector<8xf32>
    %150 = vector.multi_reduction <maximumf>, %147, %cst_87 [1] : vector<8x8xf32> to vector<8xf32>
    %151 = vector.shape_cast %150 : vector<8xf32> to vector<8x1xf32>
    %152 = arith.maximumf %149, %151 : vector<8x1xf32>
    %153 = arith.subf %149, %152 : vector<8x1xf32>
    %154 = math.exp %153 : vector<8x1xf32>
    %155 = vector.broadcast %152 : vector<8x1xf32> to vector<8x8xf32>
    %156 = arith.subf %147, %155 : vector<8x8xf32>
    %157 = math.exp %156 : vector<8x8xf32>
    %c3_88 = arith.constant 3 : index
    %c0_89 = arith.constant 0 : index
    %c0_90 = arith.constant 0 : index
    %158 = vector.load %arg9[%c3_88, %c0_89, %c0_90] : memref<4x8x1xf32, #tpu.memory_space<vmem>>, vector<1x8x1xf32>
    %159 = vector.shape_cast %158 : vector<1x8x1xf32> to vector<8x1xf32>
    %160 = arith.mulf %154, %159 : vector<8x1xf32>
    %cst_91 = arith.constant dense<0.000000e+00> : vector<8xf32>
    %161 = vector.multi_reduction <add>, %157, %cst_91 [1] : vector<8x8xf32> to vector<8xf32>
    %162 = vector.shape_cast %161 : vector<8xf32> to vector<8x1xf32>
    %163 = arith.addf %160, %162 : vector<8x1xf32>
    %c3_92 = arith.constant 3 : index
    %c0_93 = arith.constant 0 : index
    %c0_94 = arith.constant 0 : index
    %164 = vector.load %arg9[%c3_92, %c0_93, %c0_94] : memref<4x8x1xf32, #tpu.memory_space<vmem>>, vector<1x8x1xf32>
    %165 = vector.shape_cast %164 : vector<1x8x1xf32> to vector<8x1xf32>
    %166 = vector.shape_cast %163 : vector<8x1xf32> to vector<1x8x1xf32>
    tpu.vector_store %arg9[%c3_92, %c0_93, %c0_94], %166 {strides = array<i32>} : memref<4x8x1xf32, #tpu.memory_space<vmem>>, vector<1x8x1xf32>,
    %c3_95 = arith.constant 3 : index
    %c0_96 = arith.constant 0 : index
    %c0_97 = arith.constant 0 : index
    %167 = vector.load %arg10[%c3_95, %c0_96, %c0_97] : memref<4x8x8xf32, #tpu.memory_space<vmem>>, vector<1x8x8xf32>
    %168 = vector.shape_cast %167 : vector<1x8x8xf32> to vector<8x8xf32>
    %169 = vector.broadcast %154 : vector<8x1xf32> to vector<8x8xf32>
    %170 = arith.mulf %169, %168 : vector<8x8xf32>
    %171 = arith.truncf %157 : vector<8x8xf32> to vector<8x8xbf16>
    %172 = vector.extract_strided_slice %12 {offsets = [0, 24], sizes = [8, 8], strides = [1, 1]} : vector<8x32xbf16> to vector<8x8xbf16>
    %cst_98 = arith.constant dense<0.000000e+00> : vector<8x8xf32>
    %173 = tpu.matmul %171, %172, %cst_98 {dimension_numbers = #tpu.dot_dimension_numbers<[1], [0], [0], [1], [0, 0, 1, 1], [], []>} : vector<8x8xbf16>, vector<8x8xbf16>, vector<8x8xf32> -> vector<8x8xf32>
    %174 = arith.addf %170, %173 : vector<8x8xf32>
    %c3_99 = arith.constant 3 : index
    %c0_100 = arith.constant 0 : index
    %c0_101 = arith.constant 0 : index
    %175 = vector.load %arg10[%c3_99, %c0_100, %c0_101] : memref<4x8x8xf32, #tpu.memory_space<vmem>>, vector<1x8x8xf32>
    %176 = vector.shape_cast %175 : vector<1x8x8xf32> to vector<8x8xf32>
    %177 = vector.shape_cast %174 : vector<8x8xf32> to vector<1x8x8xf32>
    tpu.vector_store %arg10[%c3_99, %c0_100, %c0_101], %177 {strides = array<i32>} : memref<4x8x8xf32, #tpu.memory_space<vmem>>, vector<1x8x8xf32>,
    %c3_102 = arith.constant 3 : index
    %c0_103 = arith.constant 0 : index
    %c0_104 = arith.constant 0 : index
    %178 = vector.load %arg8[%c3_102, %c0_103, %c0_104] : memref<4x8x1xf32, #tpu.memory_space<vmem>>, vector<1x8x1xf32>
    %179 = vector.shape_cast %178 : vector<1x8x1xf32> to vector<8x1xf32>
    %180 = vector.shape_cast %152 : vector<8x1xf32> to vector<1x8x1xf32>
    tpu.vector_store %arg8[%c3_102, %c0_103, %c0_104], %180 {strides = array<i32>} : memref<4x8x1xf32, #tpu.memory_space<vmem>>, vector<1x8x1xf32>,
    %c0_i32_105 = arith.constant 0 : i32
    %181 = arith.cmpi eq, %arg2, %c0_i32_105 : i32
    %182 = arith.extui %181 : i1 to i32
    %c0_i32_106 = arith.constant 0 : i32
    %183 = arith.cmpi ne, %182, %c0_i32_106 : i32
    scf.if %183 {
      %c0_107 = arith.constant 0 : index
      %c0_108 = arith.constant 0 : index
      %c0_109 = arith.constant 0 : index
      %184 = vector.load %arg9[%c0_107, %c0_108, %c0_109] : memref<4x8x1xf32, #tpu.memory_space<vmem>>, vector<1x8x1xf32>
      %185 = vector.shape_cast %184 : vector<1x8x1xf32> to vector<8x1xf32>
      %186 = tpu.reciprocal %185 {approx = true} : vector<8x1xf32> -> vector<8x1xf32>
      %c0_110 = arith.constant 0 : index
      %c0_111 = arith.constant 0 : index
      %c0_112 = arith.constant 0 : index
      %187 = vector.load %arg10[%c0_110, %c0_111, %c0_112] : memref<4x8x8xf32, #tpu.memory_space<vmem>>, vector<1x8x8xf32>
      %188 = vector.shape_cast %187 : vector<1x8x8xf32> to vector<8x8xf32>
      %189 = vector.broadcast %186 : vector<8x1xf32> to vector<8x8xf32>
      %190 = arith.mulf %188, %189 : vector<8x8xf32>
      %191 = arith.truncf %190 : vector<8x8xf32> to vector<8x8xbf16>
      %c0_113 = arith.constant 0 : index
      %c0_114 = arith.constant 0 : index
      %c0_115 = arith.constant 0 : index
      %192 = vector.load %arg7[%c0_113, %c0_114, %c0_115] : memref<1x8x32xbf16, #tpu.memory_space<vmem>>, vector<1x8x8xbf16>
      %193 = vector.shape_cast %192 : vector<1x8x8xbf16> to vector<8x8xbf16>
      %194 = vector.shape_cast %191 : vector<8x8xbf16> to vector<1x8x8xbf16>
      tpu.vector_store %arg7[%c0_113, %c0_114, %c0_115], %194 {strides = array<i32>} : memref<1x8x32xbf16, #tpu.memory_space<vmem>>, vector<1x8x8xbf16>,
      %c1_116 = arith.constant 1 : index
      %c0_117 = arith.constant 0 : index
      %c0_118 = arith.constant 0 : index
      %195 = vector.load %arg9[%c1_116, %c0_117, %c0_118] : memref<4x8x1xf32, #tpu.memory_space<vmem>>, vector<1x8x1xf32>
      %196 = vector.shape_cast %195 : vector<1x8x1xf32> to vector<8x1xf32>
      %197 = tpu.reciprocal %196 {approx = true} : vector<8x1xf32> -> vector<8x1xf32>
      %c1_119 = arith.constant 1 : index
      %c0_120 = arith.constant 0 : index
      %c0_121 = arith.constant 0 : index
      %198 = vector.load %arg10[%c1_119, %c0_120, %c0_121] : memref<4x8x8xf32, #tpu.memory_space<vmem>>, vector<1x8x8xf32>
      %199 = vector.shape_cast %198 : vector<1x8x8xf32> to vector<8x8xf32>
      %200 = vector.broadcast %197 : vector<8x1xf32> to vector<8x8xf32>
      %201 = arith.mulf %199, %200 : vector<8x8xf32>
      %202 = arith.truncf %201 : vector<8x8xf32> to vector<8x8xbf16>
      %c0_122 = arith.constant 0 : index
      %c0_123 = arith.constant 0 : index
      %c8 = arith.constant 8 : index
      %203 = vector.load %arg7[%c0_122, %c0_123, %c8] : memref<1x8x32xbf16, #tpu.memory_space<vmem>>, vector<1x8x8xbf16>
      %204 = vector.shape_cast %203 : vector<1x8x8xbf16> to vector<8x8xbf16>
      %205 = vector.shape_cast %202 : vector<8x8xbf16> to vector<1x8x8xbf16>
      tpu.vector_store %arg7[%c0_122, %c0_123, %c8], %205 {strides = array<i32>} : memref<1x8x32xbf16, #tpu.memory_space<vmem>>, vector<1x8x8xbf16>,
      %c2_124 = arith.constant 2 : index
      %c0_125 = arith.constant 0 : index
      %c0_126 = arith.constant 0 : index
      %206 = vector.load %arg9[%c2_124, %c0_125, %c0_126] : memref<4x8x1xf32, #tpu.memory_space<vmem>>, vector<1x8x1xf32>
      %207 = vector.shape_cast %206 : vector<1x8x1xf32> to vector<8x1xf32>
      %208 = tpu.reciprocal %207 {approx = true} : vector<8x1xf32> -> vector<8x1xf32>
      %c2_127 = arith.constant 2 : index
      %c0_128 = arith.constant 0 : index
      %c0_129 = arith.constant 0 : index
      %209 = vector.load %arg10[%c2_127, %c0_128, %c0_129] : memref<4x8x8xf32, #tpu.memory_space<vmem>>, vector<1x8x8xf32>
      %210 = vector.shape_cast %209 : vector<1x8x8xf32> to vector<8x8xf32>
      %211 = vector.broadcast %208 : vector<8x1xf32> to vector<8x8xf32>
      %212 = arith.mulf %210, %211 : vector<8x8xf32>
      %213 = arith.truncf %212 : vector<8x8xf32> to vector<8x8xbf16>
      %c0_130 = arith.constant 0 : index
      %c0_131 = arith.constant 0 : index
      %c16 = arith.constant 16 : index
      %214 = vector.load %arg7[%c0_130, %c0_131, %c16] : memref<1x8x32xbf16, #tpu.memory_space<vmem>>, vector<1x8x8xbf16>
      %215 = vector.shape_cast %214 : vector<1x8x8xbf16> to vector<8x8xbf16>
      %216 = vector.shape_cast %213 : vector<8x8xbf16> to vector<1x8x8xbf16>
      tpu.vector_store %arg7[%c0_130, %c0_131, %c16], %216 {strides = array<i32>} : memref<1x8x32xbf16, #tpu.memory_space<vmem>>, vector<1x8x8xbf16>,
      %c3_132 = arith.constant 3 : index
      %c0_133 = arith.constant 0 : index
      %c0_134 = arith.constant 0 : index
      %217 = vector.load %arg9[%c3_132, %c0_133, %c0_134] : memref<4x8x1xf32, #tpu.memory_space<vmem>>, vector<1x8x1xf32>
      %218 = vector.shape_cast %217 : vector<1x8x1xf32> to vector<8x1xf32>
      %219 = tpu.reciprocal %218 {approx = true} : vector<8x1xf32> -> vector<8x1xf32>
      %c3_135 = arith.constant 3 : index
      %c0_136 = arith.constant 0 : index
      %c0_137 = arith.constant 0 : index
      %220 = vector.load %arg10[%c3_135, %c0_136, %c0_137] : memref<4x8x8xf32, #tpu.memory_space<vmem>>, vector<1x8x8xf32>
      %221 = vector.shape_cast %220 : vector<1x8x8xf32> to vector<8x8xf32>
      %222 = vector.broadcast %219 : vector<8x1xf32> to vector<8x8xf32>
      %223 = arith.mulf %221, %222 : vector<8x8xf32>
      %224 = arith.truncf %223 : vector<8x8xf32> to vector<8x8xbf16>
      %c0_138 = arith.constant 0 : index
      %c0_139 = arith.constant 0 : index
      %c24 = arith.constant 24 : index
      %225 = vector.load %arg7[%c0_138, %c0_139, %c24] : memref<1x8x32xbf16, #tpu.memory_space<vmem>>, vector<1x8x8xbf16>
      %226 = vector.shape_cast %225 : vector<1x8x8xbf16> to vector<8x8xbf16>
      %227 = vector.shape_cast %224 : vector<8x8xbf16> to vector<1x8x8xbf16>
      tpu.vector_store %arg7[%c0_138, %c0_139, %c24], %227 {strides = array<i32>} : memref<1x8x32xbf16, #tpu.memory_space<vmem>>, vector<1x8x8xbf16>,
    } else {
    }
    return
  }
  func.func @transform_0(%arg0: i32, %arg1: i32, %arg2: i32) -> (i32, i32, i32) {
    %c0_i32 = arith.constant 0 : i32
    %c0_i32_0 = arith.constant 0 : i32
    return %arg0, %arg1, %c0_i32 : i32, i32, i32
  }
  func.func @transform_1(%arg0: i32, %arg1: i32, %arg2: i32) -> (i32, i32, i32) {
    %c0_i32 = arith.constant 0 : i32
    %c0_i32_0 = arith.constant 0 : i32
    return %arg0, %arg2, %c0_i32 : i32, i32, i32
  }
  func.func @transform_2(%arg0: i32, %arg1: i32, %arg2: i32) -> (i32, i32, i32) {
    %c0_i32 = arith.constant 0 : i32
    %c0_i32_0 = arith.constant 0 : i32
    return %arg0, %arg2, %c0_i32 : i32, i32, i32
  }
  func.func @transform_3(%arg0: i32, %arg1: i32, %arg2: i32) -> (i32, i32, i32) {
    %c0_i32 = arith.constant 0 : i32
    %c0_i32_0 = arith.constant 0 : i32
    return %arg0, %c0_i32, %arg2 : i32, i32, i32
  }
  func.func @transform_4(%arg0: i32, %arg1: i32, %arg2: i32) -> (i32, i32, i32) {
    %c0_i32 = arith.constant 0 : i32
    %c0_i32_0 = arith.constant 0 : i32
    return %arg0, %arg1, %c0_i32 : i32, i32, i32
  }
}

module attributes {stable_mosaic.version = 11 : i64} {
  func.func @_matmul_kernel(%arg0: i32, %arg1: i32, %arg2: i32, %arg3: memref<16x32xbf16, #tpu.memory_space<vmem>>, %arg4: memref<32x128xbf16, #tpu.memory_space<vmem>>, %arg5: memref<1x128xf32, #tpu.memory_space<vmem>>, %arg6: memref<16x128xbf16, #tpu.memory_space<vmem>>, %arg7: memref<16x128xf32, #tpu.memory_space<vmem>>) attributes {dimension_semantics = [#tpu.dimension_semantics<parallel>, #tpu.dimension_semantics<parallel>, #tpu.dimension_semantics<arbitrary>], iteration_bounds = array<i64: 1, 1, 1>, scalar_prefetch = 0 : i64, scratch_operands = 1 : i64, tpu.core_type = #tpu.core_type<tc>, window_params = [{transform_indices = @transform_0, window_bounds = array<i64: 16, 32>}, {transform_indices = @transform_1, window_bounds = array<i64: 32, 128>}, {transform_indices = @transform_2, window_bounds = array<i64: 1, 128>}, {transform_indices = @transform_3, window_bounds = array<i64: 16, 128>}]} {
    %c0_i32 = arith.constant 0 : i32
    %0 = arith.cmpi eq, %arg2, %c0_i32 : i32
    %1 = arith.extui %0 : i1 to i32
    %c0_i32_0 = arith.constant 0 : i32
    %2 = arith.cmpi ne, %1, %c0_i32_0 : i32
    scf.if %2 {
      %cst_10 = arith.constant 0.000000e+00 : f32
      %12 = vector.broadcast %cst_10 : f32 to vector<16x128xf32>
      %c0_11 = arith.constant 0 : index
      %c0_12 = arith.constant 0 : index
      %13 = vector.load %arg7[%c0_11, %c0_12] : memref<16x128xf32, #tpu.memory_space<vmem>>, vector<16x128xf32>
      tpu.vector_store %arg7[%c0_11, %c0_12], %12 {strides = array<i32>} : memref<16x128xf32, #tpu.memory_space<vmem>>, vector<16x128xf32>,
    } else {
    }
    %c0 = arith.constant 0 : index
    %c0_1 = arith.constant 0 : index
    %3 = vector.load %arg7[%c0, %c0_1] : memref<16x128xf32, #tpu.memory_space<vmem>>, vector<16x128xf32>
    %c0_2 = arith.constant 0 : index
    %c0_3 = arith.constant 0 : index
    %4 = vector.load %arg3[%c0_2, %c0_3] : memref<16x32xbf16, #tpu.memory_space<vmem>>, vector<16x32xbf16>
    %c0_4 = arith.constant 0 : index
    %c0_5 = arith.constant 0 : index
    %5 = vector.load %arg4[%c0_4, %c0_5] : memref<32x128xbf16, #tpu.memory_space<vmem>>, vector<32x128xbf16>
    %cst = arith.constant dense<0.000000e+00> : vector<16x128xf32>
    %6 = tpu.matmul %4, %5, %cst {dimension_numbers = #tpu.dot_dimension_numbers<[1], [0], [0], [1], [0, 0, 1, 1], [], []>} : vector<16x32xbf16>, vector<32x128xbf16>, vector<16x128xf32> -> vector<16x128xf32>
    %7 = arith.addf %3, %6 : vector<16x128xf32>
    %c0_6 = arith.constant 0 : index
    %c0_7 = arith.constant 0 : index
    %8 = vector.load %arg7[%c0_6, %c0_7] : memref<16x128xf32, #tpu.memory_space<vmem>>, vector<16x128xf32>
    tpu.vector_store %arg7[%c0_6, %c0_7], %7 {strides = array<i32>} : memref<16x128xf32, #tpu.memory_space<vmem>>, vector<16x128xf32>,
    %c0_i32_8 = arith.constant 0 : i32
    %9 = arith.cmpi eq, %arg2, %c0_i32_8 : i32
    %10 = arith.extui %9 : i1 to i32
    %c0_i32_9 = arith.constant 0 : i32
    %11 = arith.cmpi ne, %10, %c0_i32_9 : i32
    scf.if %11 {
      %c0_10 = arith.constant 0 : index
      %c0_11 = arith.constant 0 : index
      %12 = vector.load %arg7[%c0_10, %c0_11] : memref<16x128xf32, #tpu.memory_space<vmem>>, vector<16x128xf32>
      %c0_12 = arith.constant 0 : index
      %c0_13 = arith.constant 0 : index
      %13 = vector.load %arg5[%c0_12, %c0_13] : memref<1x128xf32, #tpu.memory_space<vmem>>, vector<1x128xf32>
      %14 = vector.broadcast %13 : vector<1x128xf32> to vector<16x128xf32>
      %15 = arith.addf %12, %14 : vector<16x128xf32>
      %cst_14 = arith.constant 0.000000e+00 : f32
      %16 = vector.broadcast %cst_14 : f32 to vector<16x128xf32>
      %17 = arith.maximumf %15, %16 : vector<16x128xf32>
      %18 = arith.truncf %17 : vector<16x128xf32> to vector<16x128xbf16>
      %c0_15 = arith.constant 0 : index
      %c0_16 = arith.constant 0 : index
      %19 = vector.load %arg6[%c0_15, %c0_16] : memref<16x128xbf16, #tpu.memory_space<vmem>>, vector<16x128xbf16>
      tpu.vector_store %arg6[%c0_15, %c0_16], %18 {strides = array<i32>} : memref<16x128xbf16, #tpu.memory_space<vmem>>, vector<16x128xbf16>,
    } else {
    }
    return
  }
  func.func @transform_0(%arg0: i32, %arg1: i32, %arg2: i32) -> (i32, i32) {
    %c0_i32 = arith.constant 0 : i32
    return %arg0, %arg2 : i32, i32
  }
  func.func @transform_1(%arg0: i32, %arg1: i32, %arg2: i32) -> (i32, i32) {
    %c0_i32 = arith.constant 0 : i32
    return %arg2, %arg1 : i32, i32
  }
  func.func @transform_2(%arg0: i32, %arg1: i32, %arg2: i32) -> (i32, i32) {
    %c0_i32 = arith.constant 0 : i32
    %c0_i32_0 = arith.constant 0 : i32
    return %c0_i32, %arg1 : i32, i32
  }
  func.func @transform_3(%arg0: i32, %arg1: i32, %arg2: i32) -> (i32, i32) {
    %c0_i32 = arith.constant 0 : i32
    return %arg0, %arg1 : i32, i32
  }
}

module attributes {stable_mosaic.version = 11 : i64} {
  func.func @_matmul_kernel(%arg0: i32, %arg1: i32, %arg2: i32, %arg3: memref<16x32xbf16, #tpu.memory_space<vmem>>, %arg4: memref<32x64xbf16, #tpu.memory_space<vmem>>, %arg5: memref<1x64xf32, #tpu.memory_space<vmem>>, %arg6: memref<16x64xbf16, #tpu.memory_space<vmem>>, %arg7: memref<16x64xf32, #tpu.memory_space<vmem>>) attributes {dimension_semantics = [#tpu.dimension_semantics<parallel>, #tpu.dimension_semantics<parallel>, #tpu.dimension_semantics<arbitrary>], iteration_bounds = array<i64: 1, 1, 1>, scalar_prefetch = 0 : i64, scratch_operands = 1 : i64, tpu.core_type = #tpu.core_type<tc>, window_params = [{transform_indices = @transform_0, window_bounds = array<i64: 16, 32>}, {transform_indices = @transform_1, window_bounds = array<i64: 32, 64>}, {transform_indices = @transform_2, window_bounds = array<i64: 1, 64>}, {transform_indices = @transform_3, window_bounds = array<i64: 16, 64>}]} {
    %c0_i32 = arith.constant 0 : i32
    %0 = arith.cmpi eq, %arg2, %c0_i32 : i32
    %1 = arith.extui %0 : i1 to i32
    %c0_i32_0 = arith.constant 0 : i32
    %2 = arith.cmpi ne, %1, %c0_i32_0 : i32
    scf.if %2 {
      %cst_10 = arith.constant 0.000000e+00 : f32
      %12 = vector.broadcast %cst_10 : f32 to vector<16x64xf32>
      %c0_11 = arith.constant 0 : index
      %c0_12 = arith.constant 0 : index
      %13 = vector.load %arg7[%c0_11, %c0_12] : memref<16x64xf32, #tpu.memory_space<vmem>>, vector<16x64xf32>
      tpu.vector_store %arg7[%c0_11, %c0_12], %12 {strides = array<i32>} : memref<16x64xf32, #tpu.memory_space<vmem>>, vector<16x64xf32>,
    } else {
    }
    %c0 = arith.constant 0 : index
    %c0_1 = arith.constant 0 : index
    %3 = vector.load %arg7[%c0, %c0_1] : memref<16x64xf32, #tpu.memory_space<vmem>>, vector<16x64xf32>
    %c0_2 = arith.constant 0 : index
    %c0_3 = arith.constant 0 : index
    %4 = vector.load %arg3[%c0_2, %c0_3] : memref<16x32xbf16, #tpu.memory_space<vmem>>, vector<16x32xbf16>
    %c0_4 = arith.constant 0 : index
    %c0_5 = arith.constant 0 : index
    %5 = vector.load %arg4[%c0_4, %c0_5] : memref<32x64xbf16, #tpu.memory_space<vmem>>, vector<32x64xbf16>
    %cst = arith.constant dense<0.000000e+00> : vector<16x64xf32>
    %6 = tpu.matmul %4, %5, %cst {dimension_numbers = #tpu.dot_dimension_numbers<[1], [0], [0], [1], [0, 0, 1, 1], [], []>} : vector<16x32xbf16>, vector<32x64xbf16>, vector<16x64xf32> -> vector<16x64xf32>
    %7 = arith.addf %3, %6 : vector<16x64xf32>
    %c0_6 = arith.constant 0 : index
    %c0_7 = arith.constant 0 : index
    %8 = vector.load %arg7[%c0_6, %c0_7] : memref<16x64xf32, #tpu.memory_space<vmem>>, vector<16x64xf32>
    tpu.vector_store %arg7[%c0_6, %c0_7], %7 {strides = array<i32>} : memref<16x64xf32, #tpu.memory_space<vmem>>, vector<16x64xf32>,
    %c0_i32_8 = arith.constant 0 : i32
    %9 = arith.cmpi eq, %arg2, %c0_i32_8 : i32
    %10 = arith.extui %9 : i1 to i32
    %c0_i32_9 = arith.constant 0 : i32
    %11 = arith.cmpi ne, %10, %c0_i32_9 : i32
    scf.if %11 {
      %c0_10 = arith.constant 0 : index
      %c0_11 = arith.constant 0 : index
      %12 = vector.load %arg7[%c0_10, %c0_11] : memref<16x64xf32, #tpu.memory_space<vmem>>, vector<16x64xf32>
      %c0_12 = arith.constant 0 : index
      %c0_13 = arith.constant 0 : index
      %13 = vector.load %arg5[%c0_12, %c0_13] : memref<1x64xf32, #tpu.memory_space<vmem>>, vector<1x64xf32>
      %14 = vector.broadcast %13 : vector<1x64xf32> to vector<16x64xf32>
      %15 = arith.addf %12, %14 : vector<16x64xf32>
      %16 = arith.truncf %15 : vector<16x64xf32> to vector<16x64xbf16>
      %c0_14 = arith.constant 0 : index
      %c0_15 = arith.constant 0 : index
      %17 = vector.load %arg6[%c0_14, %c0_15] : memref<16x64xbf16, #tpu.memory_space<vmem>>, vector<16x64xbf16>
      tpu.vector_store %arg6[%c0_14, %c0_15], %16 {strides = array<i32>} : memref<16x64xbf16, #tpu.memory_space<vmem>>, vector<16x64xbf16>,
    } else {
    }
    return
  }
  func.func @transform_0(%arg0: i32, %arg1: i32, %arg2: i32) -> (i32, i32) {
    %c0_i32 = arith.constant 0 : i32
    return %arg0, %arg2 : i32, i32
  }
  func.func @transform_1(%arg0: i32, %arg1: i32, %arg2: i32) -> (i32, i32) {
    %c0_i32 = arith.constant 0 : i32
    return %arg2, %arg1 : i32, i32
  }
  func.func @transform_2(%arg0: i32, %arg1: i32, %arg2: i32) -> (i32, i32) {
    %c0_i32 = arith.constant 0 : i32
    %c0_i32_0 = arith.constant 0 : i32
    return %c0_i32, %arg1 : i32, i32
  }
  func.func @transform_3(%arg0: i32, %arg1: i32, %arg2: i32) -> (i32, i32) {
    %c0_i32 = arith.constant 0 : i32
    return %arg0, %arg1 : i32, i32
  }
}

module attributes {stable_mosaic.version = 11 : i64} {
  func.func @_matmul_add_ln_kernel(%arg0: i32, %arg1: i32, %arg2: memref<16x128xbf16, #tpu.memory_space<vmem>>, %arg3: memref<128x32xbf16, #tpu.memory_space<vmem>>, %arg4: memref<1x32xf32, #tpu.memory_space<vmem>>, %arg5: memref<16x32xbf16, #tpu.memory_space<vmem>>, %arg6: memref<1x32xf32, #tpu.memory_space<vmem>>, %arg7: memref<1x32xf32, #tpu.memory_space<vmem>>, %arg8: memref<16x32xbf16, #tpu.memory_space<vmem>>, %arg9: memref<16x32xf32, #tpu.memory_space<vmem>>) attributes {dimension_semantics = [#tpu.dimension_semantics<parallel>, #tpu.dimension_semantics<arbitrary>], iteration_bounds = array<i64: 1, 1>, scalar_prefetch = 0 : i64, scratch_operands = 1 : i64, tpu.core_type = #tpu.core_type<tc>, window_params = [{transform_indices = @transform_0, window_bounds = array<i64: 16, 128>}, {transform_indices = @transform_1, window_bounds = array<i64: 128, 32>}, {pipeline_mode = #tpu.pipeline_mode<synchronous>, transform_indices = @transform_2, window_bounds = array<i64: 1, 32>}, {transform_indices = @transform_3, window_bounds = array<i64: 16, 32>}, {pipeline_mode = #tpu.pipeline_mode<synchronous>, transform_indices = @transform_4, window_bounds = array<i64: 1, 32>}, {pipeline_mode = #tpu.pipeline_mode<synchronous>, transform_indices = @transform_5, window_bounds = array<i64: 1, 32>}, {transform_indices = @transform_6, window_bounds = array<i64: 16, 32>}]} {
    %c0_i32 = arith.constant 0 : i32
    %0 = arith.cmpi eq, %arg1, %c0_i32 : i32
    %1 = arith.extui %0 : i1 to i32
    %c0_i32_0 = arith.constant 0 : i32
    %2 = arith.cmpi ne, %1, %c0_i32_0 : i32
    scf.if %2 {
      %cst_10 = arith.constant 0.000000e+00 : f32
      %12 = vector.broadcast %cst_10 : f32 to vector<16x32xf32>
      %c0_11 = arith.constant 0 : index
      %c0_12 = arith.constant 0 : index
      %13 = vector.load %arg9[%c0_11, %c0_12] : memref<16x32xf32, #tpu.memory_space<vmem>>, vector<16x32xf32>
      tpu.vector_store %arg9[%c0_11, %c0_12], %12 {strides = array<i32>} : memref<16x32xf32, #tpu.memory_space<vmem>>, vector<16x32xf32>,
    } else {
    }
    %c0 = arith.constant 0 : index
    %c0_1 = arith.constant 0 : index
    %3 = vector.load %arg9[%c0, %c0_1] : memref<16x32xf32, #tpu.memory_space<vmem>>, vector<16x32xf32>
    %c0_2 = arith.constant 0 : index
    %c0_3 = arith.constant 0 : index
    %4 = vector.load %arg2[%c0_2, %c0_3] : memref<16x128xbf16, #tpu.memory_space<vmem>>, vector<16x128xbf16>
    %c0_4 = arith.constant 0 : index
    %c0_5 = arith.constant 0 : index
    %5 = vector.load %arg3[%c0_4, %c0_5] : memref<128x32xbf16, #tpu.memory_space<vmem>>, vector<128x32xbf16>
    %cst = arith.constant dense<0.000000e+00> : vector<16x32xf32>
    %6 = tpu.matmul %4, %5, %cst {dimension_numbers = #tpu.dot_dimension_numbers<[1], [0], [0], [1], [0, 0, 1, 1], [], []>} : vector<16x128xbf16>, vector<128x32xbf16>, vector<16x32xf32> -> vector<16x32xf32>
    %7 = arith.addf %3, %6 : vector<16x32xf32>
    %c0_6 = arith.constant 0 : index
    %c0_7 = arith.constant 0 : index
    %8 = vector.load %arg9[%c0_6, %c0_7] : memref<16x32xf32, #tpu.memory_space<vmem>>, vector<16x32xf32>
    tpu.vector_store %arg9[%c0_6, %c0_7], %7 {strides = array<i32>} : memref<16x32xf32, #tpu.memory_space<vmem>>, vector<16x32xf32>,
    %c0_i32_8 = arith.constant 0 : i32
    %9 = arith.cmpi eq, %arg1, %c0_i32_8 : i32
    %10 = arith.extui %9 : i1 to i32
    %c0_i32_9 = arith.constant 0 : i32
    %11 = arith.cmpi ne, %10, %c0_i32_9 : i32
    scf.if %11 {
      %c0_10 = arith.constant 0 : index
      %c0_11 = arith.constant 0 : index
      %12 = vector.load %arg9[%c0_10, %c0_11] : memref<16x32xf32, #tpu.memory_space<vmem>>, vector<16x32xf32>
      %c0_12 = arith.constant 0 : index
      %c0_13 = arith.constant 0 : index
      %13 = vector.load %arg4[%c0_12, %c0_13] : memref<1x32xf32, #tpu.memory_space<vmem>>, vector<1x32xf32>
      %14 = vector.broadcast %13 : vector<1x32xf32> to vector<16x32xf32>
      %15 = arith.addf %12, %14 : vector<16x32xf32>
      %c0_14 = arith.constant 0 : index
      %c0_15 = arith.constant 0 : index
      %16 = vector.load %arg5[%c0_14, %c0_15] : memref<16x32xbf16, #tpu.memory_space<vmem>>, vector<16x32xbf16>
      %17 = arith.extf %16 : vector<16x32xbf16> to vector<16x32xf32>
      %18 = arith.addf %15, %17 : vector<16x32xf32>
      %cst_16 = arith.constant dense<0.000000e+00> : vector<16xf32>
      %19 = vector.multi_reduction <add>, %18, %cst_16 [1] : vector<16x32xf32> to vector<16xf32>
      %20 = vector.shape_cast %19 : vector<16xf32> to vector<16x1xf32>
      %cst_17 = arith.constant 3.200000e+01 : f32
      %21 = vector.broadcast %cst_17 : f32 to vector<16x1xf32>
      %22 = arith.divf %20, %21 : vector<16x1xf32>
      %23 = vector.broadcast %22 : vector<16x1xf32> to vector<16x32xf32>
      %24 = arith.subf %18, %23 : vector<16x32xf32>
      %25 = arith.mulf %24, %24 : vector<16x32xf32>
      %cst_18 = arith.constant dense<0.000000e+00> : vector<16xf32>
      %26 = vector.multi_reduction <add>, %25, %cst_18 [1] : vector<16x32xf32> to vector<16xf32>
      %27 = vector.shape_cast %26 : vector<16xf32> to vector<16x1xf32>
      %cst_19 = arith.constant 3.200000e+01 : f32
      %28 = vector.broadcast %cst_19 : f32 to vector<16x1xf32>
      %29 = arith.divf %27, %28 : vector<16x1xf32>
      %cst_20 = arith.constant 9.99999997E-7 : f32
      %30 = vector.broadcast %cst_20 : f32 to vector<16x1xf32>
      %31 = arith.addf %29, %30 : vector<16x1xf32>
      %32 = math.rsqrt %31 : vector<16x1xf32>
      %33 = vector.broadcast %32 : vector<16x1xf32> to vector<16x32xf32>
      %34 = arith.mulf %24, %33 : vector<16x32xf32>
      %c0_21 = arith.constant 0 : index
      %c0_22 = arith.constant 0 : index
      %35 = vector.load %arg6[%c0_21, %c0_22] : memref<1x32xf32, #tpu.memory_space<vmem>>, vector<1x32xf32>
      %36 = vector.broadcast %35 : vector<1x32xf32> to vector<16x32xf32>
      %37 = arith.mulf %34, %36 : vector<16x32xf32>
      %c0_23 = arith.constant 0 : index
      %c0_24 = arith.constant 0 : index
      %38 = vector.load %arg7[%c0_23, %c0_24] : memref<1x32xf32, #tpu.memory_space<vmem>>, vector<1x32xf32>
      %39 = vector.broadcast %38 : vector<1x32xf32> to vector<16x32xf32>
      %40 = arith.addf %37, %39 : vector<16x32xf32>
      %41 = arith.truncf %40 : vector<16x32xf32> to vector<16x32xbf16>
      %c0_25 = arith.constant 0 : index
      %c0_26 = arith.constant 0 : index
      %42 = vector.load %arg8[%c0_25, %c0_26] : memref<16x32xbf16, #tpu.memory_space<vmem>>, vector<16x32xbf16>
      tpu.vector_store %arg8[%c0_25, %c0_26], %41 {strides = array<i32>} : memref<16x32xbf16, #tpu.memory_space<vmem>>, vector<16x32xbf16>,
    } else {
    }
    return
  }
  func.func @transform_0(%arg0: i32, %arg1: i32) -> (i32, i32) {
    %c0_i32 = arith.constant 0 : i32
    return %arg0, %arg1 : i32, i32
  }
  func.func @transform_1(%arg0: i32, %arg1: i32) -> (i32, i32) {
    %c0_i32 = arith.constant 0 : i32
    %c0_i32_0 = arith.constant 0 : i32
    return %arg1, %c0_i32 : i32, i32
  }
  func.func @transform_2(%arg0: i32, %arg1: i32) -> (i32, i32) {
    %c0_i32 = arith.constant 0 : i32
    %c0_i32_0 = arith.constant 0 : i32
    %c0_i32_1 = arith.constant 0 : i32
    return %c0_i32, %c0_i32_0 : i32, i32
  }
  func.func @transform_3(%arg0: i32, %arg1: i32) -> (i32, i32) {
    %c0_i32 = arith.constant 0 : i32
    %c0_i32_0 = arith.constant 0 : i32
    return %arg0, %c0_i32 : i32, i32
  }
  func.func @transform_4(%arg0: i32, %arg1: i32) -> (i32, i32) {
    %c0_i32 = arith.constant 0 : i32
    %c0_i32_0 = arith.constant 0 : i32
    %c0_i32_1 = arith.constant 0 : i32
    return %c0_i32, %c0_i32_0 : i32, i32
  }
  func.func @transform_5(%arg0: i32, %arg1: i32) -> (i32, i32) {
    %c0_i32 = arith.constant 0 : i32
    %c0_i32_0 = arith.constant 0 : i32
    %c0_i32_1 = arith.constant 0 : i32
    return %c0_i32, %c0_i32_0 : i32, i32
  }
  func.func @transform_6(%arg0: i32, %arg1: i32) -> (i32, i32) {
    %c0_i32 = arith.constant 0 : i32
    %c0_i32_0 = arith.constant 0 : i32
    return %arg0, %c0_i32 : i32, i32
  }
}

module attributes {stable_mosaic.version = 11 : i64} {
  func.func @_flash_attn_kernel(%arg0: i32, %arg1: i32, %arg2: i32, %arg3: memref<1x8x32xbf16, #tpu.memory_space<vmem>>, %arg4: memref<1x8x32xbf16, #tpu.memory_space<vmem>>, %arg5: memref<1x8x32xbf16, #tpu.memory_space<vmem>>, %arg6: memref<1x1x8xf32, #tpu.memory_space<vmem>>, %arg7: memref<1x8x32xbf16, #tpu.memory_space<vmem>>, %arg8: memref<4x8x1xf32, #tpu.memory_space<vmem>>, %arg9: memref<4x8x1xf32, #tpu.memory_space<vmem>>, %arg10: memref<4x8x8xf32, #tpu.memory_space<vmem>>) attributes {dimension_semantics = [#tpu.dimension_semantics<parallel>, #tpu.dimension_semantics<parallel>, #tpu.dimension_semantics<arbitrary>], iteration_bounds = array<i64: 2, 1, 1>, scalar_prefetch = 0 : i64, scratch_operands = 3 : i64, tpu.core_type = #tpu.core_type<tc>, window_params = [{transform_indices = @transform_0, window_bounds = array<i64: 1, 8, 32>}, {transform_indices = @transform_1, window_bounds = array<i64: 1, 8, 32>}, {transform_indices = @transform_2, window_bounds = array<i64: 1, 8, 32>}, {transform_indices = @transform_3, window_bounds = array<i64: 1, 1, 8>}, {transform_indices = @transform_4, window_bounds = array<i64: 1, 8, 32>}]} {
    %c0_i32 = arith.constant 0 : i32
    %0 = arith.cmpi eq, %arg2, %c0_i32 : i32
    %1 = arith.extui %0 : i1 to i32
    %c0_i32_0 = arith.constant 0 : i32
    %2 = arith.cmpi ne, %1, %c0_i32_0 : i32
    scf.if %2 {
      %cst_108 = arith.constant -1.000000e+30 : f32
      %187 = vector.broadcast %cst_108 : f32 to vector<4x8x1xf32>
      %c0_109 = arith.constant 0 : index
      %c0_110 = arith.constant 0 : index
      %c0_111 = arith.constant 0 : index
      %188 = vector.load %arg8[%c0_109, %c0_110, %c0_111] : memref<4x8x1xf32, #tpu.memory_space<vmem>>, vector<4x8x1xf32>
      tpu.vector_store %arg8[%c0_109, %c0_110, %c0_111], %187 {strides = array<i32>} : memref<4x8x1xf32, #tpu.memory_space<vmem>>, vector<4x8x1xf32>,
      %cst_112 = arith.constant 0.000000e+00 : f32
      %189 = vector.broadcast %cst_112 : f32 to vector<4x8x1xf32>
      %c0_113 = arith.constant 0 : index
      %c0_114 = arith.constant 0 : index
      %c0_115 = arith.constant 0 : index
      %190 = vector.load %arg9[%c0_113, %c0_114, %c0_115] : memref<4x8x1xf32, #tpu.memory_space<vmem>>, vector<4x8x1xf32>
      tpu.vector_store %arg9[%c0_113, %c0_114, %c0_115], %189 {strides = array<i32>} : memref<4x8x1xf32, #tpu.memory_space<vmem>>, vector<4x8x1xf32>,
      %cst_116 = arith.constant 0.000000e+00 : f32
      %191 = vector.broadcast %cst_116 : f32 to vector<4x8x8xf32>
      %c0_117 = arith.constant 0 : index
      %c0_118 = arith.constant 0 : index
      %c0_119 = arith.constant 0 : index
      %192 = vector.load %arg10[%c0_117, %c0_118, %c0_119] : memref<4x8x8xf32, #tpu.memory_space<vmem>>, vector<4x8x8xf32>
      tpu.vector_store %arg10[%c0_117, %c0_118, %c0_119], %191 {strides = array<i32>} : memref<4x8x8xf32, #tpu.memory_space<vmem>>, vector<4x8x8xf32>,
    } else {
    }
    %c0 = arith.constant 0 : index
    %c0_1 = arith.constant 0 : index
    %c0_2 = arith.constant 0 : index
    %3 = vector.load %arg6[%c0, %c0_1, %c0_2] : memref<1x1x8xf32, #tpu.memory_space<vmem>>, vector<1x1x8xf32>
    %4 = vector.shape_cast %3 : vector<1x1x8xf32> to vector<1x8xf32>
    %cst = arith.constant 0.000000e+00 : f32
    %5 = vector.broadcast %cst : f32 to vector<1x8xf32>
    %6 = arith.cmpf ogt, %4, %5 : vector<1x8xf32>
    %c8_i32 = arith.constant 8 : i32
    %7 = arith.muli %arg1, %c8_i32 : i32
    %8 = tpu.iota {dimensions = array<i32: 0>} : vector<8x8xi32>
    %9 = vector.broadcast %7 : i32 to vector<8x8xi32>
    %10 = arith.addi %9, %8 : vector<8x8xi32>
    %c8_i32_3 = arith.constant 8 : i32
    %11 = arith.muli %arg2, %c8_i32_3 : i32
    %12 = tpu.iota {dimensions = array<i32: 1>} : vector<8x8xi32>
    %13 = vector.broadcast %11 : i32 to vector<8x8xi32>
    %14 = arith.addi %13, %12 : vector<8x8xi32>
    %15 = arith.cmpi sle, %14, %10 : vector<8x8xi32>
    %16 = vector.broadcast %6 : vector<1x8xi1> to vector<8x8xi1>
    %17 = arith.andi %16, %15 : vector<8x8xi1>
    %c0_4 = arith.constant 0 : index
    %c0_5 = arith.constant 0 : index
    %c0_6 = arith.constant 0 : index
    %18 = vector.load %arg3[%c0_4, %c0_5, %c0_6] : memref<1x8x32xbf16, #tpu.memory_space<vmem>>, vector<1x8x32xbf16>
    %19 = vector.shape_cast %18 : vector<1x8x32xbf16> to vector<8x32xbf16>
    %c0_7 = arith.constant 0 : index
    %c0_8 = arith.constant 0 : index
    %c0_9 = arith.constant 0 : index
    %20 = vector.load %arg4[%c0_7, %c0_8, %c0_9] : memref<1x8x32xbf16, #tpu.memory_space<vmem>>, vector<1x8x32xbf16>
    %21 = vector.shape_cast %20 : vector<1x8x32xbf16> to vector<8x32xbf16>
    %c0_10 = arith.constant 0 : index
    %c0_11 = arith.constant 0 : index
    %c0_12 = arith.constant 0 : index
    %22 = vector.load %arg5[%c0_10, %c0_11, %c0_12] : memref<1x8x32xbf16, #tpu.memory_space<vmem>>, vector<1x8x32xbf16>
    %23 = vector.shape_cast %22 : vector<1x8x32xbf16> to vector<8x32xbf16>
    %24 = vector.extract_strided_slice %19 {offsets = [0, 0], sizes = [8, 8], strides = [1, 1]} : vector<8x32xbf16> to vector<8x8xbf16>
    %25 = vector.extract_strided_slice %21 {offsets = [0, 0], sizes = [8, 8], strides = [1, 1]} : vector<8x32xbf16> to vector<8x8xbf16>
    %cst_13 = arith.constant dense<0.000000e+00> : vector<8x8xf32>
    %26 = tpu.matmul %24, %25, %cst_13 {dimension_numbers = #tpu.dot_dimension_numbers<[1], [1], [0], [0], [0, 0, 1, 0], [], []>} : vector<8x8xbf16>, vector<8x8xbf16>, vector<8x8xf32> -> vector<8x8xf32>
    %cst_14 = arith.constant 0.353553385 : f32
    %27 = vector.broadcast %cst_14 : f32 to vector<8x8xf32>
    %28 = arith.mulf %26, %27 : vector<8x8xf32>
    %cst_15 = arith.constant -1.000000e+09 : f32
    %29 = vector.broadcast %cst_15 : f32 to vector<8x8xf32>
    %30 = arith.select %17, %28, %29 : vector<8x8xi1>, vector<8x8xf32>
    %c0_16 = arith.constant 0 : index
    %c0_17 = arith.constant 0 : index
    %c0_18 = arith.constant 0 : index
    %31 = vector.load %arg8[%c0_16, %c0_17, %c0_18] : memref<4x8x1xf32, #tpu.memory_space<vmem>>, vector<1x8x1xf32>
    %32 = vector.shape_cast %31 : vector<1x8x1xf32> to vector<8x1xf32>
    %cst_19 = arith.constant dense<0xFF800000> : vector<8xf32>
    %33 = vector.multi_reduction <maximumf>, %30, %cst_19 [1] : vector<8x8xf32> to vector<8xf32>
    %34 = vector.shape_cast %33 : vector<8xf32> to vector<8x1xf32>
    %35 = arith.maximumf %32, %34 : vector<8x1xf32>
    %36 = arith.subf %32, %35 : vector<8x1xf32>
    %37 = math.exp %36 : vector<8x1xf32>
    %38 = vector.broadcast %35 : vector<8x1xf32> to vector<8x8xf32>
    %39 = arith.subf %30, %38 : vector<8x8xf32>
    %40 = math.exp %39 : vector<8x8xf32>
    %c0_20 = arith.constant 0 : index
    %c0_21 = arith.constant 0 : index
    %c0_22 = arith.constant 0 : index
    %41 = vector.load %arg9[%c0_20, %c0_21, %c0_22] : memref<4x8x1xf32, #tpu.memory_space<vmem>>, vector<1x8x1xf32>
    %42 = vector.shape_cast %41 : vector<1x8x1xf32> to vector<8x1xf32>
    %43 = arith.mulf %37, %42 : vector<8x1xf32>
    %cst_23 = arith.constant dense<0.000000e+00> : vector<8xf32>
    %44 = vector.multi_reduction <add>, %40, %cst_23 [1] : vector<8x8xf32> to vector<8xf32>
    %45 = vector.shape_cast %44 : vector<8xf32> to vector<8x1xf32>
    %46 = arith.addf %43, %45 : vector<8x1xf32>
    %c0_24 = arith.constant 0 : index
    %c0_25 = arith.constant 0 : index
    %c0_26 = arith.constant 0 : index
    %47 = vector.load %arg9[%c0_24, %c0_25, %c0_26] : memref<4x8x1xf32, #tpu.memory_space<vmem>>, vector<1x8x1xf32>
    %48 = vector.shape_cast %47 : vector<1x8x1xf32> to vector<8x1xf32>
    %49 = vector.shape_cast %46 : vector<8x1xf32> to vector<1x8x1xf32>
    tpu.vector_store %arg9[%c0_24, %c0_25, %c0_26], %49 {strides = array<i32>} : memref<4x8x1xf32, #tpu.memory_space<vmem>>, vector<1x8x1xf32>,
    %c0_27 = arith.constant 0 : index
    %c0_28 = arith.constant 0 : index
    %c0_29 = arith.constant 0 : index
    %50 = vector.load %arg10[%c0_27, %c0_28, %c0_29] : memref<4x8x8xf32, #tpu.memory_space<vmem>>, vector<1x8x8xf32>
    %51 = vector.shape_cast %50 : vector<1x8x8xf32> to vector<8x8xf32>
    %52 = vector.broadcast %37 : vector<8x1xf32> to vector<8x8xf32>
    %53 = arith.mulf %52, %51 : vector<8x8xf32>
    %54 = arith.truncf %40 : vector<8x8xf32> to vector<8x8xbf16>
    %55 = vector.extract_strided_slice %23 {offsets = [0, 0], sizes = [8, 8], strides = [1, 1]} : vector<8x32xbf16> to vector<8x8xbf16>
    %cst_30 = arith.constant dense<0.000000e+00> : vector<8x8xf32>
    %56 = tpu.matmul %54, %55, %cst_30 {dimension_numbers = #tpu.dot_dimension_numbers<[1], [0], [0], [1], [0, 0, 1, 1], [], []>} : vector<8x8xbf16>, vector<8x8xbf16>, vector<8x8xf32> -> vector<8x8xf32>
    %57 = arith.addf %53, %56 : vector<8x8xf32>
    %c0_31 = arith.constant 0 : index
    %c0_32 = arith.constant 0 : index
    %c0_33 = arith.constant 0 : index
    %58 = vector.load %arg10[%c0_31, %c0_32, %c0_33] : memref<4x8x8xf32, #tpu.memory_space<vmem>>, vector<1x8x8xf32>
    %59 = vector.shape_cast %58 : vector<1x8x8xf32> to vector<8x8xf32>
    %60 = vector.shape_cast %57 : vector<8x8xf32> to vector<1x8x8xf32>
    tpu.vector_store %arg10[%c0_31, %c0_32, %c0_33], %60 {strides = array<i32>} : memref<4x8x8xf32, #tpu.memory_space<vmem>>, vector<1x8x8xf32>,
    %c0_34 = arith.constant 0 : index
    %c0_35 = arith.constant 0 : index
    %c0_36 = arith.constant 0 : index
    %61 = vector.load %arg8[%c0_34, %c0_35, %c0_36] : memref<4x8x1xf32, #tpu.memory_space<vmem>>, vector<1x8x1xf32>
    %62 = vector.shape_cast %61 : vector<1x8x1xf32> to vector<8x1xf32>
    %63 = vector.shape_cast %35 : vector<8x1xf32> to vector<1x8x1xf32>
    tpu.vector_store %arg8[%c0_34, %c0_35, %c0_36], %63 {strides = array<i32>} : memref<4x8x1xf32, #tpu.memory_space<vmem>>, vector<1x8x1xf32>,
    %64 = vector.extract_strided_slice %19 {offsets = [0, 8], sizes = [8, 8], strides = [1, 1]} : vector<8x32xbf16> to vector<8x8xbf16>
    %65 = vector.extract_strided_slice %21 {offsets = [0, 8], sizes = [8, 8], strides = [1, 1]} : vector<8x32xbf16> to vector<8x8xbf16>
    %cst_37 = arith.constant dense<0.000000e+00> : vector<8x8xf32>
    %66 = tpu.matmul %64, %65, %cst_37 {dimension_numbers = #tpu.dot_dimension_numbers<[1], [1], [0], [0], [0, 0, 1, 0], [], []>} : vector<8x8xbf16>, vector<8x8xbf16>, vector<8x8xf32> -> vector<8x8xf32>
    %cst_38 = arith.constant 0.353553385 : f32
    %67 = vector.broadcast %cst_38 : f32 to vector<8x8xf32>
    %68 = arith.mulf %66, %67 : vector<8x8xf32>
    %cst_39 = arith.constant -1.000000e+09 : f32
    %69 = vector.broadcast %cst_39 : f32 to vector<8x8xf32>
    %70 = arith.select %17, %68, %69 : vector<8x8xi1>, vector<8x8xf32>
    %c1 = arith.constant 1 : index
    %c0_40 = arith.constant 0 : index
    %c0_41 = arith.constant 0 : index
    %71 = vector.load %arg8[%c1, %c0_40, %c0_41] : memref<4x8x1xf32, #tpu.memory_space<vmem>>, vector<1x8x1xf32>
    %72 = vector.shape_cast %71 : vector<1x8x1xf32> to vector<8x1xf32>
    %cst_42 = arith.constant dense<0xFF800000> : vector<8xf32>
    %73 = vector.multi_reduction <maximumf>, %70, %cst_42 [1] : vector<8x8xf32> to vector<8xf32>
    %74 = vector.shape_cast %73 : vector<8xf32> to vector<8x1xf32>
    %75 = arith.maximumf %72, %74 : vector<8x1xf32>
    %76 = arith.subf %72, %75 : vector<8x1xf32>
    %77 = math.exp %76 : vector<8x1xf32>
    %78 = vector.broadcast %75 : vector<8x1xf32> to vector<8x8xf32>
    %79 = arith.subf %70, %78 : vector<8x8xf32>
    %80 = math.exp %79 : vector<8x8xf32>
    %c1_43 = arith.constant 1 : index
    %c0_44 = arith.constant 0 : index
    %c0_45 = arith.constant 0 : index
    %81 = vector.load %arg9[%c1_43, %c0_44, %c0_45] : memref<4x8x1xf32, #tpu.memory_space<vmem>>, vector<1x8x1xf32>
    %82 = vector.shape_cast %81 : vector<1x8x1xf32> to vector<8x1xf32>
    %83 = arith.mulf %77, %82 : vector<8x1xf32>
    %cst_46 = arith.constant dense<0.000000e+00> : vector<8xf32>
    %84 = vector.multi_reduction <add>, %80, %cst_46 [1] : vector<8x8xf32> to vector<8xf32>
    %85 = vector.shape_cast %84 : vector<8xf32> to vector<8x1xf32>
    %86 = arith.addf %83, %85 : vector<8x1xf32>
    %c1_47 = arith.constant 1 : index
    %c0_48 = arith.constant 0 : index
    %c0_49 = arith.constant 0 : index
    %87 = vector.load %arg9[%c1_47, %c0_48, %c0_49] : memref<4x8x1xf32, #tpu.memory_space<vmem>>, vector<1x8x1xf32>
    %88 = vector.shape_cast %87 : vector<1x8x1xf32> to vector<8x1xf32>
    %89 = vector.shape_cast %86 : vector<8x1xf32> to vector<1x8x1xf32>
    tpu.vector_store %arg9[%c1_47, %c0_48, %c0_49], %89 {strides = array<i32>} : memref<4x8x1xf32, #tpu.memory_space<vmem>>, vector<1x8x1xf32>,
    %c1_50 = arith.constant 1 : index
    %c0_51 = arith.constant 0 : index
    %c0_52 = arith.constant 0 : index
    %90 = vector.load %arg10[%c1_50, %c0_51, %c0_52] : memref<4x8x8xf32, #tpu.memory_space<vmem>>, vector<1x8x8xf32>
    %91 = vector.shape_cast %90 : vector<1x8x8xf32> to vector<8x8xf32>
    %92 = vector.broadcast %77 : vector<8x1xf32> to vector<8x8xf32>
    %93 = arith.mulf %92, %91 : vector<8x8xf32>
    %94 = arith.truncf %80 : vector<8x8xf32> to vector<8x8xbf16>
    %95 = vector.extract_strided_slice %23 {offsets = [0, 8], sizes = [8, 8], strides = [1, 1]} : vector<8x32xbf16> to vector<8x8xbf16>
    %cst_53 = arith.constant dense<0.000000e+00> : vector<8x8xf32>
    %96 = tpu.matmul %94, %95, %cst_53 {dimension_numbers = #tpu.dot_dimension_numbers<[1], [0], [0], [1], [0, 0, 1, 1], [], []>} : vector<8x8xbf16>, vector<8x8xbf16>, vector<8x8xf32> -> vector<8x8xf32>
    %97 = arith.addf %93, %96 : vector<8x8xf32>
    %c1_54 = arith.constant 1 : index
    %c0_55 = arith.constant 0 : index
    %c0_56 = arith.constant 0 : index
    %98 = vector.load %arg10[%c1_54, %c0_55, %c0_56] : memref<4x8x8xf32, #tpu.memory_space<vmem>>, vector<1x8x8xf32>
    %99 = vector.shape_cast %98 : vector<1x8x8xf32> to vector<8x8xf32>
    %100 = vector.shape_cast %97 : vector<8x8xf32> to vector<1x8x8xf32>
    tpu.vector_store %arg10[%c1_54, %c0_55, %c0_56], %100 {strides = array<i32>} : memref<4x8x8xf32, #tpu.memory_space<vmem>>, vector<1x8x8xf32>,
    %c1_57 = arith.constant 1 : index
    %c0_58 = arith.constant 0 : index
    %c0_59 = arith.constant 0 : index
    %101 = vector.load %arg8[%c1_57, %c0_58, %c0_59] : memref<4x8x1xf32, #tpu.memory_space<vmem>>, vector<1x8x1xf32>
    %102 = vector.shape_cast %101 : vector<1x8x1xf32> to vector<8x1xf32>
    %103 = vector.shape_cast %75 : vector<8x1xf32> to vector<1x8x1xf32>
    tpu.vector_store %arg8[%c1_57, %c0_58, %c0_59], %103 {strides = array<i32>} : memref<4x8x1xf32, #tpu.memory_space<vmem>>, vector<1x8x1xf32>,
    %104 = vector.extract_strided_slice %19 {offsets = [0, 16], sizes = [8, 8], strides = [1, 1]} : vector<8x32xbf16> to vector<8x8xbf16>
    %105 = vector.extract_strided_slice %21 {offsets = [0, 16], sizes = [8, 8], strides = [1, 1]} : vector<8x32xbf16> to vector<8x8xbf16>
    %cst_60 = arith.constant dense<0.000000e+00> : vector<8x8xf32>
    %106 = tpu.matmul %104, %105, %cst_60 {dimension_numbers = #tpu.dot_dimension_numbers<[1], [1], [0], [0], [0, 0, 1, 0], [], []>} : vector<8x8xbf16>, vector<8x8xbf16>, vector<8x8xf32> -> vector<8x8xf32>
    %cst_61 = arith.constant 0.353553385 : f32
    %107 = vector.broadcast %cst_61 : f32 to vector<8x8xf32>
    %108 = arith.mulf %106, %107 : vector<8x8xf32>
    %cst_62 = arith.constant -1.000000e+09 : f32
    %109 = vector.broadcast %cst_62 : f32 to vector<8x8xf32>
    %110 = arith.select %17, %108, %109 : vector<8x8xi1>, vector<8x8xf32>
    %c2 = arith.constant 2 : index
    %c0_63 = arith.constant 0 : index
    %c0_64 = arith.constant 0 : index
    %111 = vector.load %arg8[%c2, %c0_63, %c0_64] : memref<4x8x1xf32, #tpu.memory_space<vmem>>, vector<1x8x1xf32>
    %112 = vector.shape_cast %111 : vector<1x8x1xf32> to vector<8x1xf32>
    %cst_65 = arith.constant dense<0xFF800000> : vector<8xf32>
    %113 = vector.multi_reduction <maximumf>, %110, %cst_65 [1] : vector<8x8xf32> to vector<8xf32>
    %114 = vector.shape_cast %113 : vector<8xf32> to vector<8x1xf32>
    %115 = arith.maximumf %112, %114 : vector<8x1xf32>
    %116 = arith.subf %112, %115 : vector<8x1xf32>
    %117 = math.exp %116 : vector<8x1xf32>
    %118 = vector.broadcast %115 : vector<8x1xf32> to vector<8x8xf32>
    %119 = arith.subf %110, %118 : vector<8x8xf32>
    %120 = math.exp %119 : vector<8x8xf32>
    %c2_66 = arith.constant 2 : index
    %c0_67 = arith.constant 0 : index
    %c0_68 = arith.constant 0 : index
    %121 = vector.load %arg9[%c2_66, %c0_67, %c0_68] : memref<4x8x1xf32, #tpu.memory_space<vmem>>, vector<1x8x1xf32>
    %122 = vector.shape_cast %121 : vector<1x8x1xf32> to vector<8x1xf32>
    %123 = arith.mulf %117, %122 : vector<8x1xf32>
    %cst_69 = arith.constant dense<0.000000e+00> : vector<8xf32>
    %124 = vector.multi_reduction <add>, %120, %cst_69 [1] : vector<8x8xf32> to vector<8xf32>
    %125 = vector.shape_cast %124 : vector<8xf32> to vector<8x1xf32>
    %126 = arith.addf %123, %125 : vector<8x1xf32>
    %c2_70 = arith.constant 2 : index
    %c0_71 = arith.constant 0 : index
    %c0_72 = arith.constant 0 : index
    %127 = vector.load %arg9[%c2_70, %c0_71, %c0_72] : memref<4x8x1xf32, #tpu.memory_space<vmem>>, vector<1x8x1xf32>
    %128 = vector.shape_cast %127 : vector<1x8x1xf32> to vector<8x1xf32>
    %129 = vector.shape_cast %126 : vector<8x1xf32> to vector<1x8x1xf32>
    tpu.vector_store %arg9[%c2_70, %c0_71, %c0_72], %129 {strides = array<i32>} : memref<4x8x1xf32, #tpu.memory_space<vmem>>, vector<1x8x1xf32>,
    %c2_73 = arith.constant 2 : index
    %c0_74 = arith.constant 0 : index
    %c0_75 = arith.constant 0 : index
    %130 = vector.load %arg10[%c2_73, %c0_74, %c0_75] : memref<4x8x8xf32, #tpu.memory_space<vmem>>, vector<1x8x8xf32>
    %131 = vector.shape_cast %130 : vector<1x8x8xf32> to vector<8x8xf32>
    %132 = vector.broadcast %117 : vector<8x1xf32> to vector<8x8xf32>
    %133 = arith.mulf %132, %131 : vector<8x8xf32>
    %134 = arith.truncf %120 : vector<8x8xf32> to vector<8x8xbf16>
    %135 = vector.extract_strided_slice %23 {offsets = [0, 16], sizes = [8, 8], strides = [1, 1]} : vector<8x32xbf16> to vector<8x8xbf16>
    %cst_76 = arith.constant dense<0.000000e+00> : vector<8x8xf32>
    %136 = tpu.matmul %134, %135, %cst_76 {dimension_numbers = #tpu.dot_dimension_numbers<[1], [0], [0], [1], [0, 0, 1, 1], [], []>} : vector<8x8xbf16>, vector<8x8xbf16>, vector<8x8xf32> -> vector<8x8xf32>
    %137 = arith.addf %133, %136 : vector<8x8xf32>
    %c2_77 = arith.constant 2 : index
    %c0_78 = arith.constant 0 : index
    %c0_79 = arith.constant 0 : index
    %138 = vector.load %arg10[%c2_77, %c0_78, %c0_79] : memref<4x8x8xf32, #tpu.memory_space<vmem>>, vector<1x8x8xf32>
    %139 = vector.shape_cast %138 : vector<1x8x8xf32> to vector<8x8xf32>
    %140 = vector.shape_cast %137 : vector<8x8xf32> to vector<1x8x8xf32>
    tpu.vector_store %arg10[%c2_77, %c0_78, %c0_79], %140 {strides = array<i32>} : memref<4x8x8xf32, #tpu.memory_space<vmem>>, vector<1x8x8xf32>,
    %c2_80 = arith.constant 2 : index
    %c0_81 = arith.constant 0 : index
    %c0_82 = arith.constant 0 : index
    %141 = vector.load %arg8[%c2_80, %c0_81, %c0_82] : memref<4x8x1xf32, #tpu.memory_space<vmem>>, vector<1x8x1xf32>
    %142 = vector.shape_cast %141 : vector<1x8x1xf32> to vector<8x1xf32>
    %143 = vector.shape_cast %115 : vector<8x1xf32> to vector<1x8x1xf32>
    tpu.vector_store %arg8[%c2_80, %c0_81, %c0_82], %143 {strides = array<i32>} : memref<4x8x1xf32, #tpu.memory_space<vmem>>, vector<1x8x1xf32>,
    %144 = vector.extract_strided_slice %19 {offsets = [0, 24], sizes = [8, 8], strides = [1, 1]} : vector<8x32xbf16> to vector<8x8xbf16>
    %145 = vector.extract_strided_slice %21 {offsets = [0, 24], sizes = [8, 8], strides = [1, 1]} : vector<8x32xbf16> to vector<8x8xbf16>
    %cst_83 = arith.constant dense<0.000000e+00> : vector<8x8xf32>
    %146 = tpu.matmul %144, %145, %cst_83 {dimension_numbers = #tpu.dot_dimension_numbers<[1], [1], [0], [0], [0, 0, 1, 0], [], []>} : vector<8x8xbf16>, vector<8x8xbf16>, vector<8x8xf32> -> vector<8x8xf32>
    %cst_84 = arith.constant 0.353553385 : f32
    %147 = vector.broadcast %cst_84 : f32 to vector<8x8xf32>
    %148 = arith.mulf %146, %147 : vector<8x8xf32>
    %cst_85 = arith.constant -1.000000e+09 : f32
    %149 = vector.broadcast %cst_85 : f32 to vector<8x8xf32>
    %150 = arith.select %17, %148, %149 : vector<8x8xi1>, vector<8x8xf32>
    %c3 = arith.constant 3 : index
    %c0_86 = arith.constant 0 : index
    %c0_87 = arith.constant 0 : index
    %151 = vector.load %arg8[%c3, %c0_86, %c0_87] : memref<4x8x1xf32, #tpu.memory_space<vmem>>, vector<1x8x1xf32>
    %152 = vector.shape_cast %151 : vector<1x8x1xf32> to vector<8x1xf32>
    %cst_88 = arith.constant dense<0xFF800000> : vector<8xf32>
    %153 = vector.multi_reduction <maximumf>, %150, %cst_88 [1] : vector<8x8xf32> to vector<8xf32>
    %154 = vector.shape_cast %153 : vector<8xf32> to vector<8x1xf32>
    %155 = arith.maximumf %152, %154 : vector<8x1xf32>
    %156 = arith.subf %152, %155 : vector<8x1xf32>
    %157 = math.exp %156 : vector<8x1xf32>
    %158 = vector.broadcast %155 : vector<8x1xf32> to vector<8x8xf32>
    %159 = arith.subf %150, %158 : vector<8x8xf32>
    %160 = math.exp %159 : vector<8x8xf32>
    %c3_89 = arith.constant 3 : index
    %c0_90 = arith.constant 0 : index
    %c0_91 = arith.constant 0 : index
    %161 = vector.load %arg9[%c3_89, %c0_90, %c0_91] : memref<4x8x1xf32, #tpu.memory_space<vmem>>, vector<1x8x1xf32>
    %162 = vector.shape_cast %161 : vector<1x8x1xf32> to vector<8x1xf32>
    %163 = arith.mulf %157, %162 : vector<8x1xf32>
    %cst_92 = arith.constant dense<0.000000e+00> : vector<8xf32>
    %164 = vector.multi_reduction <add>, %160, %cst_92 [1] : vector<8x8xf32> to vector<8xf32>
    %165 = vector.shape_cast %164 : vector<8xf32> to vector<8x1xf32>
    %166 = arith.addf %163, %165 : vector<8x1xf32>
    %c3_93 = arith.constant 3 : index
    %c0_94 = arith.constant 0 : index
    %c0_95 = arith.constant 0 : index
    %167 = vector.load %arg9[%c3_93, %c0_94, %c0_95] : memref<4x8x1xf32, #tpu.memory_space<vmem>>, vector<1x8x1xf32>
    %168 = vector.shape_cast %167 : vector<1x8x1xf32> to vector<8x1xf32>
    %169 = vector.shape_cast %166 : vector<8x1xf32> to vector<1x8x1xf32>
    tpu.vector_store %arg9[%c3_93, %c0_94, %c0_95], %169 {strides = array<i32>} : memref<4x8x1xf32, #tpu.memory_space<vmem>>, vector<1x8x1xf32>,
    %c3_96 = arith.constant 3 : index
    %c0_97 = arith.constant 0 : index
    %c0_98 = arith.constant 0 : index
    %170 = vector.load %arg10[%c3_96, %c0_97, %c0_98] : memref<4x8x8xf32, #tpu.memory_space<vmem>>, vector<1x8x8xf32>
    %171 = vector.shape_cast %170 : vector<1x8x8xf32> to vector<8x8xf32>
    %172 = vector.broadcast %157 : vector<8x1xf32> to vector<8x8xf32>
    %173 = arith.mulf %172, %171 : vector<8x8xf32>
    %174 = arith.truncf %160 : vector<8x8xf32> to vector<8x8xbf16>
    %175 = vector.extract_strided_slice %23 {offsets = [0, 24], sizes = [8, 8], strides = [1, 1]} : vector<8x32xbf16> to vector<8x8xbf16>
    %cst_99 = arith.constant dense<0.000000e+00> : vector<8x8xf32>
    %176 = tpu.matmul %174, %175, %cst_99 {dimension_numbers = #tpu.dot_dimension_numbers<[1], [0], [0], [1], [0, 0, 1, 1], [], []>} : vector<8x8xbf16>, vector<8x8xbf16>, vector<8x8xf32> -> vector<8x8xf32>
    %177 = arith.addf %173, %176 : vector<8x8xf32>
    %c3_100 = arith.constant 3 : index
    %c0_101 = arith.constant 0 : index
    %c0_102 = arith.constant 0 : index
    %178 = vector.load %arg10[%c3_100, %c0_101, %c0_102] : memref<4x8x8xf32, #tpu.memory_space<vmem>>, vector<1x8x8xf32>
    %179 = vector.shape_cast %178 : vector<1x8x8xf32> to vector<8x8xf32>
    %180 = vector.shape_cast %177 : vector<8x8xf32> to vector<1x8x8xf32>
    tpu.vector_store %arg10[%c3_100, %c0_101, %c0_102], %180 {strides = array<i32>} : memref<4x8x8xf32, #tpu.memory_space<vmem>>, vector<1x8x8xf32>,
    %c3_103 = arith.constant 3 : index
    %c0_104 = arith.constant 0 : index
    %c0_105 = arith.constant 0 : index
    %181 = vector.load %arg8[%c3_103, %c0_104, %c0_105] : memref<4x8x1xf32, #tpu.memory_space<vmem>>, vector<1x8x1xf32>
    %182 = vector.shape_cast %181 : vector<1x8x1xf32> to vector<8x1xf32>
    %183 = vector.shape_cast %155 : vector<8x1xf32> to vector<1x8x1xf32>
    tpu.vector_store %arg8[%c3_103, %c0_104, %c0_105], %183 {strides = array<i32>} : memref<4x8x1xf32, #tpu.memory_space<vmem>>, vector<1x8x1xf32>,
    %c0_i32_106 = arith.constant 0 : i32
    %184 = arith.cmpi eq, %arg2, %c0_i32_106 : i32
    %185 = arith.extui %184 : i1 to i32
    %c0_i32_107 = arith.constant 0 : i32
    %186 = arith.cmpi ne, %185, %c0_i32_107 : i32
    scf.if %186 {
      %c0_108 = arith.constant 0 : index
      %c0_109 = arith.constant 0 : index
      %c0_110 = arith.constant 0 : index
      %187 = vector.load %arg9[%c0_108, %c0_109, %c0_110] : memref<4x8x1xf32, #tpu.memory_space<vmem>>, vector<1x8x1xf32>
      %188 = vector.shape_cast %187 : vector<1x8x1xf32> to vector<8x1xf32>
      %189 = tpu.reciprocal %188 {approx = true} : vector<8x1xf32> -> vector<8x1xf32>
      %c0_111 = arith.constant 0 : index
      %c0_112 = arith.constant 0 : index
      %c0_113 = arith.constant 0 : index
      %190 = vector.load %arg10[%c0_111, %c0_112, %c0_113] : memref<4x8x8xf32, #tpu.memory_space<vmem>>, vector<1x8x8xf32>
      %191 = vector.shape_cast %190 : vector<1x8x8xf32> to vector<8x8xf32>
      %192 = vector.broadcast %189 : vector<8x1xf32> to vector<8x8xf32>
      %193 = arith.mulf %191, %192 : vector<8x8xf32>
      %194 = arith.truncf %193 : vector<8x8xf32> to vector<8x8xbf16>
      %c0_114 = arith.constant 0 : index
      %c0_115 = arith.constant 0 : index
      %c0_116 = arith.constant 0 : index
      %195 = vector.load %arg7[%c0_114, %c0_115, %c0_116] : memref<1x8x32xbf16, #tpu.memory_space<vmem>>, vector<1x8x8xbf16>
      %196 = vector.shape_cast %195 : vector<1x8x8xbf16> to vector<8x8xbf16>
      %197 = vector.shape_cast %194 : vector<8x8xbf16> to vector<1x8x8xbf16>
      tpu.vector_store %arg7[%c0_114, %c0_115, %c0_116], %197 {strides = array<i32>} : memref<1x8x32xbf16, #tpu.memory_space<vmem>>, vector<1x8x8xbf16>,
      %c1_117 = arith.constant 1 : index
      %c0_118 = arith.constant 0 : index
      %c0_119 = arith.constant 0 : index
      %198 = vector.load %arg9[%c1_117, %c0_118, %c0_119] : memref<4x8x1xf32, #tpu.memory_space<vmem>>, vector<1x8x1xf32>
      %199 = vector.shape_cast %198 : vector<1x8x1xf32> to vector<8x1xf32>
      %200 = tpu.reciprocal %199 {approx = true} : vector<8x1xf32> -> vector<8x1xf32>
      %c1_120 = arith.constant 1 : index
      %c0_121 = arith.constant 0 : index
      %c0_122 = arith.constant 0 : index
      %201 = vector.load %arg10[%c1_120, %c0_121, %c0_122] : memref<4x8x8xf32, #tpu.memory_space<vmem>>, vector<1x8x8xf32>
      %202 = vector.shape_cast %201 : vector<1x8x8xf32> to vector<8x8xf32>
      %203 = vector.broadcast %200 : vector<8x1xf32> to vector<8x8xf32>
      %204 = arith.mulf %202, %203 : vector<8x8xf32>
      %205 = arith.truncf %204 : vector<8x8xf32> to vector<8x8xbf16>
      %c0_123 = arith.constant 0 : index
      %c0_124 = arith.constant 0 : index
      %c8 = arith.constant 8 : index
      %206 = vector.load %arg7[%c0_123, %c0_124, %c8] : memref<1x8x32xbf16, #tpu.memory_space<vmem>>, vector<1x8x8xbf16>
      %207 = vector.shape_cast %206 : vector<1x8x8xbf16> to vector<8x8xbf16>
      %208 = vector.shape_cast %205 : vector<8x8xbf16> to vector<1x8x8xbf16>
      tpu.vector_store %arg7[%c0_123, %c0_124, %c8], %208 {strides = array<i32>} : memref<1x8x32xbf16, #tpu.memory_space<vmem>>, vector<1x8x8xbf16>,
      %c2_125 = arith.constant 2 : index
      %c0_126 = arith.constant 0 : index
      %c0_127 = arith.constant 0 : index
      %209 = vector.load %arg9[%c2_125, %c0_126, %c0_127] : memref<4x8x1xf32, #tpu.memory_space<vmem>>, vector<1x8x1xf32>
      %210 = vector.shape_cast %209 : vector<1x8x1xf32> to vector<8x1xf32>
      %211 = tpu.reciprocal %210 {approx = true} : vector<8x1xf32> -> vector<8x1xf32>
      %c2_128 = arith.constant 2 : index
      %c0_129 = arith.constant 0 : index
      %c0_130 = arith.constant 0 : index
      %212 = vector.load %arg10[%c2_128, %c0_129, %c0_130] : memref<4x8x8xf32, #tpu.memory_space<vmem>>, vector<1x8x8xf32>
      %213 = vector.shape_cast %212 : vector<1x8x8xf32> to vector<8x8xf32>
      %214 = vector.broadcast %211 : vector<8x1xf32> to vector<8x8xf32>
      %215 = arith.mulf %213, %214 : vector<8x8xf32>
      %216 = arith.truncf %215 : vector<8x8xf32> to vector<8x8xbf16>
      %c0_131 = arith.constant 0 : index
      %c0_132 = arith.constant 0 : index
      %c16 = arith.constant 16 : index
      %217 = vector.load %arg7[%c0_131, %c0_132, %c16] : memref<1x8x32xbf16, #tpu.memory_space<vmem>>, vector<1x8x8xbf16>
      %218 = vector.shape_cast %217 : vector<1x8x8xbf16> to vector<8x8xbf16>
      %219 = vector.shape_cast %216 : vector<8x8xbf16> to vector<1x8x8xbf16>
      tpu.vector_store %arg7[%c0_131, %c0_132, %c16], %219 {strides = array<i32>} : memref<1x8x32xbf16, #tpu.memory_space<vmem>>, vector<1x8x8xbf16>,
      %c3_133 = arith.constant 3 : index
      %c0_134 = arith.constant 0 : index
      %c0_135 = arith.constant 0 : index
      %220 = vector.load %arg9[%c3_133, %c0_134, %c0_135] : memref<4x8x1xf32, #tpu.memory_space<vmem>>, vector<1x8x1xf32>
      %221 = vector.shape_cast %220 : vector<1x8x1xf32> to vector<8x1xf32>
      %222 = tpu.reciprocal %221 {approx = true} : vector<8x1xf32> -> vector<8x1xf32>
      %c3_136 = arith.constant 3 : index
      %c0_137 = arith.constant 0 : index
      %c0_138 = arith.constant 0 : index
      %223 = vector.load %arg10[%c3_136, %c0_137, %c0_138] : memref<4x8x8xf32, #tpu.memory_space<vmem>>, vector<1x8x8xf32>
      %224 = vector.shape_cast %223 : vector<1x8x8xf32> to vector<8x8xf32>
      %225 = vector.broadcast %222 : vector<8x1xf32> to vector<8x8xf32>
      %226 = arith.mulf %224, %225 : vector<8x8xf32>
      %227 = arith.truncf %226 : vector<8x8xf32> to vector<8x8xbf16>
      %c0_139 = arith.constant 0 : index
      %c0_140 = arith.constant 0 : index
      %c24 = arith.constant 24 : index
      %228 = vector.load %arg7[%c0_139, %c0_140, %c24] : memref<1x8x32xbf16, #tpu.memory_space<vmem>>, vector<1x8x8xbf16>
      %229 = vector.shape_cast %228 : vector<1x8x8xbf16> to vector<8x8xbf16>
      %230 = vector.shape_cast %227 : vector<8x8xbf16> to vector<1x8x8xbf16>
      tpu.vector_store %arg7[%c0_139, %c0_140, %c24], %230 {strides = array<i32>} : memref<1x8x32xbf16, #tpu.memory_space<vmem>>, vector<1x8x8xbf16>,
    } else {
    }
    return
  }
  func.func @transform_0(%arg0: i32, %arg1: i32, %arg2: i32) -> (i32, i32, i32) {
    %c0_i32 = arith.constant 0 : i32
    %c0_i32_0 = arith.constant 0 : i32
    return %arg0, %arg1, %c0_i32 : i32, i32, i32
  }
  func.func @transform_1(%arg0: i32, %arg1: i32, %arg2: i32) -> (i32, i32, i32) {
    %c0_i32 = arith.constant 0 : i32
    %c0_i32_0 = arith.constant 0 : i32
    return %arg0, %arg2, %c0_i32 : i32, i32, i32
  }
  func.func @transform_2(%arg0: i32, %arg1: i32, %arg2: i32) -> (i32, i32, i32) {
    %c0_i32 = arith.constant 0 : i32
    %c0_i32_0 = arith.constant 0 : i32
    return %arg0, %arg2, %c0_i32 : i32, i32, i32
  }
  func.func @transform_3(%arg0: i32, %arg1: i32, %arg2: i32) -> (i32, i32, i32) {
    %c0_i32 = arith.constant 0 : i32
    %c0_i32_0 = arith.constant 0 : i32
    return %arg0, %c0_i32, %arg2 : i32, i32, i32
  }
  func.func @transform_4(%arg0: i32, %arg1: i32, %arg2: i32) -> (i32, i32, i32) {
    %c0_i32 = arith.constant 0 : i32
    %c0_i32_0 = arith.constant 0 : i32
    return %arg0, %arg1, %c0_i32 : i32, i32, i32
  }
}

module attributes {stable_mosaic.version = 11 : i64} {
  func.func @_matmul_kernel(%arg0: i32, %arg1: i32, %arg2: i32, %arg3: memref<16x32xbf16, #tpu.memory_space<vmem>>, %arg4: memref<32x32xbf16, #tpu.memory_space<vmem>>, %arg5: memref<1x32xf32, #tpu.memory_space<vmem>>, %arg6: memref<16x32xbf16, #tpu.memory_space<vmem>>, %arg7: memref<16x32xf32, #tpu.memory_space<vmem>>) attributes {dimension_semantics = [#tpu.dimension_semantics<parallel>, #tpu.dimension_semantics<parallel>, #tpu.dimension_semantics<arbitrary>], iteration_bounds = array<i64: 1, 1, 1>, scalar_prefetch = 0 : i64, scratch_operands = 1 : i64, tpu.core_type = #tpu.core_type<tc>, window_params = [{transform_indices = @transform_0, window_bounds = array<i64: 16, 32>}, {transform_indices = @transform_1, window_bounds = array<i64: 32, 32>}, {transform_indices = @transform_2, window_bounds = array<i64: 1, 32>}, {transform_indices = @transform_3, window_bounds = array<i64: 16, 32>}]} {
    %c0_i32 = arith.constant 0 : i32
    %0 = arith.cmpi eq, %arg2, %c0_i32 : i32
    %1 = arith.extui %0 : i1 to i32
    %c0_i32_0 = arith.constant 0 : i32
    %2 = arith.cmpi ne, %1, %c0_i32_0 : i32
    scf.if %2 {
      %cst_10 = arith.constant 0.000000e+00 : f32
      %12 = vector.broadcast %cst_10 : f32 to vector<16x32xf32>
      %c0_11 = arith.constant 0 : index
      %c0_12 = arith.constant 0 : index
      %13 = vector.load %arg7[%c0_11, %c0_12] : memref<16x32xf32, #tpu.memory_space<vmem>>, vector<16x32xf32>
      tpu.vector_store %arg7[%c0_11, %c0_12], %12 {strides = array<i32>} : memref<16x32xf32, #tpu.memory_space<vmem>>, vector<16x32xf32>,
    } else {
    }
    %c0 = arith.constant 0 : index
    %c0_1 = arith.constant 0 : index
    %3 = vector.load %arg7[%c0, %c0_1] : memref<16x32xf32, #tpu.memory_space<vmem>>, vector<16x32xf32>
    %c0_2 = arith.constant 0 : index
    %c0_3 = arith.constant 0 : index
    %4 = vector.load %arg3[%c0_2, %c0_3] : memref<16x32xbf16, #tpu.memory_space<vmem>>, vector<16x32xbf16>
    %c0_4 = arith.constant 0 : index
    %c0_5 = arith.constant 0 : index
    %5 = vector.load %arg4[%c0_4, %c0_5] : memref<32x32xbf16, #tpu.memory_space<vmem>>, vector<32x32xbf16>
    %cst = arith.constant dense<0.000000e+00> : vector<16x32xf32>
    %6 = tpu.matmul %4, %5, %cst {dimension_numbers = #tpu.dot_dimension_numbers<[1], [0], [0], [1], [0, 0, 1, 1], [], []>} : vector<16x32xbf16>, vector<32x32xbf16>, vector<16x32xf32> -> vector<16x32xf32>
    %7 = arith.addf %3, %6 : vector<16x32xf32>
    %c0_6 = arith.constant 0 : index
    %c0_7 = arith.constant 0 : index
    %8 = vector.load %arg7[%c0_6, %c0_7] : memref<16x32xf32, #tpu.memory_space<vmem>>, vector<16x32xf32>
    tpu.vector_store %arg7[%c0_6, %c0_7], %7 {strides = array<i32>} : memref<16x32xf32, #tpu.memory_space<vmem>>, vector<16x32xf32>,
    %c0_i32_8 = arith.constant 0 : i32
    %9 = arith.cmpi eq, %arg2, %c0_i32_8 : i32
    %10 = arith.extui %9 : i1 to i32
    %c0_i32_9 = arith.constant 0 : i32
    %11 = arith.cmpi ne, %10, %c0_i32_9 : i32
    scf.if %11 {
      %c0_10 = arith.constant 0 : index
      %c0_11 = arith.constant 0 : index
      %12 = vector.load %arg7[%c0_10, %c0_11] : memref<16x32xf32, #tpu.memory_space<vmem>>, vector<16x32xf32>
      %c0_12 = arith.constant 0 : index
      %c0_13 = arith.constant 0 : index
      %13 = vector.load %arg5[%c0_12, %c0_13] : memref<1x32xf32, #tpu.memory_space<vmem>>, vector<1x32xf32>
      %14 = vector.broadcast %13 : vector<1x32xf32> to vector<16x32xf32>
      %15 = arith.addf %12, %14 : vector<16x32xf32>
      %16 = arith.truncf %15 : vector<16x32xf32> to vector<16x32xbf16>
      %c0_14 = arith.constant 0 : index
      %c0_15 = arith.constant 0 : index
      %17 = vector.load %arg6[%c0_14, %c0_15] : memref<16x32xbf16, #tpu.memory_space<vmem>>, vector<16x32xbf16>
      tpu.vector_store %arg6[%c0_14, %c0_15], %16 {strides = array<i32>} : memref<16x32xbf16, #tpu.memory_space<vmem>>, vector<16x32xbf16>,
    } else {
    }
    return
  }
  func.func @transform_0(%arg0: i32, %arg1: i32, %arg2: i32) -> (i32, i32) {
    %c0_i32 = arith.constant 0 : i32
    return %arg0, %arg2 : i32, i32
  }
  func.func @transform_1(%arg0: i32, %arg1: i32, %arg2: i32) -> (i32, i32) {
    %c0_i32 = arith.constant 0 : i32
    return %arg2, %arg1 : i32, i32
  }
  func.func @transform_2(%arg0: i32, %arg1: i32, %arg2: i32) -> (i32, i32) {
    %c0_i32 = arith.constant 0 : i32
    %c0_i32_0 = arith.constant 0 : i32
    return %c0_i32, %arg1 : i32, i32
  }
  func.func @transform_3(%arg0: i32, %arg1: i32, %arg2: i32) -> (i32, i32) {
    %c0_i32 = arith.constant 0 : i32
    return %arg0, %arg1 : i32, i32
  }
}

module attributes {stable_mosaic.version = 11 : i64} {
  func.func @_matmul_kernel(%arg0: i32, %arg1: i32, %arg2: i32, %arg3: memref<16x32xbf16, #tpu.memory_space<vmem>>, %arg4: memref<32x128xbf16, #tpu.memory_space<vmem>>, %arg5: memref<1x128xf32, #tpu.memory_space<vmem>>, %arg6: memref<16x128xf32, #tpu.memory_space<vmem>>, %arg7: memref<16x128xf32, #tpu.memory_space<vmem>>) attributes {dimension_semantics = [#tpu.dimension_semantics<parallel>, #tpu.dimension_semantics<parallel>, #tpu.dimension_semantics<arbitrary>], iteration_bounds = array<i64: 1, 1, 1>, scalar_prefetch = 0 : i64, scratch_operands = 1 : i64, tpu.core_type = #tpu.core_type<tc>, window_params = [{transform_indices = @transform_0, window_bounds = array<i64: 16, 32>}, {transform_indices = @transform_1, window_bounds = array<i64: 32, 128>}, {transform_indices = @transform_2, window_bounds = array<i64: 1, 128>}, {transform_indices = @transform_3, window_bounds = array<i64: 16, 128>}]} {
    %c0_i32 = arith.constant 0 : i32
    %0 = arith.cmpi eq, %arg2, %c0_i32 : i32
    %1 = arith.extui %0 : i1 to i32
    %c0_i32_0 = arith.constant 0 : i32
    %2 = arith.cmpi ne, %1, %c0_i32_0 : i32
    scf.if %2 {
      %cst_10 = arith.constant 0.000000e+00 : f32
      %12 = vector.broadcast %cst_10 : f32 to vector<16x128xf32>
      %c0_11 = arith.constant 0 : index
      %c0_12 = arith.constant 0 : index
      %13 = vector.load %arg7[%c0_11, %c0_12] : memref<16x128xf32, #tpu.memory_space<vmem>>, vector<16x128xf32>
      tpu.vector_store %arg7[%c0_11, %c0_12], %12 {strides = array<i32>} : memref<16x128xf32, #tpu.memory_space<vmem>>, vector<16x128xf32>,
    } else {
    }
    %c0 = arith.constant 0 : index
    %c0_1 = arith.constant 0 : index
    %3 = vector.load %arg7[%c0, %c0_1] : memref<16x128xf32, #tpu.memory_space<vmem>>, vector<16x128xf32>
    %c0_2 = arith.constant 0 : index
    %c0_3 = arith.constant 0 : index
    %4 = vector.load %arg3[%c0_2, %c0_3] : memref<16x32xbf16, #tpu.memory_space<vmem>>, vector<16x32xbf16>
    %c0_4 = arith.constant 0 : index
    %c0_5 = arith.constant 0 : index
    %5 = vector.load %arg4[%c0_4, %c0_5] : memref<32x128xbf16, #tpu.memory_space<vmem>>, vector<32x128xbf16>
    %cst = arith.constant dense<0.000000e+00> : vector<16x128xf32>
    %6 = tpu.matmul %4, %5, %cst {dimension_numbers = #tpu.dot_dimension_numbers<[1], [0], [0], [1], [0, 0, 1, 1], [], []>} : vector<16x32xbf16>, vector<32x128xbf16>, vector<16x128xf32> -> vector<16x128xf32>
    %7 = arith.addf %3, %6 : vector<16x128xf32>
    %c0_6 = arith.constant 0 : index
    %c0_7 = arith.constant 0 : index
    %8 = vector.load %arg7[%c0_6, %c0_7] : memref<16x128xf32, #tpu.memory_space<vmem>>, vector<16x128xf32>
    tpu.vector_store %arg7[%c0_6, %c0_7], %7 {strides = array<i32>} : memref<16x128xf32, #tpu.memory_space<vmem>>, vector<16x128xf32>,
    %c0_i32_8 = arith.constant 0 : i32
    %9 = arith.cmpi eq, %arg2, %c0_i32_8 : i32
    %10 = arith.extui %9 : i1 to i32
    %c0_i32_9 = arith.constant 0 : i32
    %11 = arith.cmpi ne, %10, %c0_i32_9 : i32
    scf.if %11 {
      %c0_10 = arith.constant 0 : index
      %c0_11 = arith.constant 0 : index
      %12 = vector.load %arg7[%c0_10, %c0_11] : memref<16x128xf32, #tpu.memory_space<vmem>>, vector<16x128xf32>
      %c0_12 = arith.constant 0 : index
      %c0_13 = arith.constant 0 : index
      %13 = vector.load %arg5[%c0_12, %c0_13] : memref<1x128xf32, #tpu.memory_space<vmem>>, vector<1x128xf32>
      %14 = vector.broadcast %13 : vector<1x128xf32> to vector<16x128xf32>
      %15 = arith.addf %12, %14 : vector<16x128xf32>
      %c0_14 = arith.constant 0 : index
      %c0_15 = arith.constant 0 : index
      %16 = vector.load %arg6[%c0_14, %c0_15] : memref<16x128xf32, #tpu.memory_space<vmem>>, vector<16x128xf32>
      tpu.vector_store %arg6[%c0_14, %c0_15], %15 {strides = array<i32>} : memref<16x128xf32, #tpu.memory_space<vmem>>, vector<16x128xf32>,
    } else {
    }
    return
  }
  func.func @transform_0(%arg0: i32, %arg1: i32, %arg2: i32) -> (i32, i32) {
    %c0_i32 = arith.constant 0 : i32
    return %arg0, %arg2 : i32, i32
  }
  func.func @transform_1(%arg0: i32, %arg1: i32, %arg2: i32) -> (i32, i32) {
    %c0_i32 = arith.constant 0 : i32
    return %arg2, %arg1 : i32, i32
  }
  func.func @transform_2(%arg0: i32, %arg1: i32, %arg2: i32) -> (i32, i32) {
    %c0_i32 = arith.constant 0 : i32
    %c0_i32_0 = arith.constant 0 : i32
    return %c0_i32, %arg1 : i32, i32
  }
  func.func @transform_3(%arg0: i32, %arg1: i32, %arg2: i32) -> (i32, i32) {
    %c0_i32 = arith.constant 0 : i32
    return %arg0, %arg1 : i32, i32
  }
}

</mosaic_0001>

<bundles_post_ra>
// kernel: transformer_forward.32
= control target key start
LH: loop header
LB: loop body
LE: loop exit
PB: predicated region body
PF: predicated region fallthrough
CT: control target
= control target key end

     0   :  { %v155_v0 = vmov 0.0   ;;  %vm156_vm0 = vmmov 0   ;;  %vm46_vm1 = vcmask 261120   ;;  %s192_s1 = inlined_call_operand.vmem [shape: bf16[32,128], index: 1, kind: input, shape index: {}]   ;;  %s193_s0 = inlined_call_operand.vmem [shape: bf16[16,32], index: 0, kind: input, shape index: {}]   ;;  %s194_s2 = inlined_call_operand.vmem [shape: f32[1,128], index: 2, kind: input, shape index: {}]   ;;  %s195_s3 = inlined_call_operand.vmem [shape: bf16[16,128], index: 3, kind: output, shape index: {}]  }
   0x1   :  { %142 = vmatprep.subr.bf16.mxu0 %v155_v0  ;;  %v152_v1 = vld [vmem:[%s192_s1] sm:$0xff]   ;;  %146 = vmatprep.mubr.msk.bf16.mxu0 %vm156_vm0, %v155_v0  ;;  %v153_v2 = vld [vmem:[%s192_s1 + $0x8] sm:$0xff]  }
   0x2   :  { %143 = vmatpush3.bf16.msra.mxu0 %v152_v1  ;;  %v154_v3 = vld [vmem:[%s193_s0] sm:$0xff]  }
   0x3   :  { %144 = vmatprep.subr.bf16.mxu0 %v155_v0  ;;  %v129_v4 = vld [vmem:[%s194_s2] ss:$0 sm:$0xff] }
   0x6   :  { %145 = vmatpush3.bf16.msra.mxu0 %v153_v2 }
   0x9   :  { %147 = vmatmul.mubr.msk.bf16.vlgmr.msra.gmra.mrb[0].mxu0 %vm46_vm1, %v154_v3 }
  0xdc   :  { %v84_v5 = vpop.f32.mrb[0].mxu0 }
  0xdd   :  { %v107_v6 = vadd.f32 %v129_v4, %v84_v5  ;;  %v148_v7 = vpop.f32.mrb[1].mxu0 }
  0xde   :  { %v87_v8 = vpop.f32.mrb[2].mxu0 }
  0xdf   :  { %v108_v9 = vadd.f32 %v129_v4, %v87_v8  ;;  %v149_v10 = vpop.f32.mrb[3].mxu0  ;;  %v109_v11 = vmax.f32 %v107_v6, 0.0 }
  0xe1   :  { %v110_v12 = vmax.f32 %v108_v9, 0.0 }
  0xe3   :  { %v137_v13 = vpack.c.bf16 %v110_v12, %v109_v11 }
  0xe5   :  { %138 = vst [vmem:[%s195_s3] sm:$0xff] %v137_v13  }

// kernel: transformer_forward.31
= control target key start
LH: loop header
LB: loop body
LE: loop exit
PB: predicated region body
PF: predicated region fallthrough
CT: control target
= control target key end

     0   :  { %vm28_vm0 = vcmask 261120   ;;  %v220_v0 = vmov 0.0   ;;  %vm221_vm1 = vmmov 0   ;;  %vm178_vm2 = vcmask 257024   ;;  %s293_s1 = inlined_call_operand.vmem [shape: bf16[32,32], index: 1, kind: input, shape index: {}]   ;;  %s294_s0 = inlined_call_operand.vmem [shape: bf16[16,32], index: 0, kind: input, shape index: {}]   ;;  %s295_s3 = inlined_call_operand.vmem [shape: bf16[16,32], index: 3, kind: input, shape index: {}]   ;;  %s296_s2 = inlined_call_operand.vmem [shape: f32[1,32], index: 2, kind: input, shape index: {}]   ;;  %s297_s4 = inlined_call_operand.vmem [shape: f32[1,32], index: 4, kind: input, shape index: {}]   ;;  %s298_s5 = inlined_call_operand.vmem [shape: f32[1,32], index: 5, kind: input, shape index: {}]   ;;  %s299_s6 = inlined_call_operand.vmem [shape: bf16[16,32], index: 6, kind: output, shape index: {}]  }
   0x1   :  { %203 = vmatprep.subr.bf16.mxu0 %v220_v0  ;;  %v213_v1 = vld [vmem:[%s293_s1] sm:$0xff]   ;;  %207 = vmatprep.mubr.msk.bf16.mxu0 %vm221_vm1, %v220_v0  ;;  %29 = vst.msk [vmem:[#allocation2] sm:$0xff] %vm28_vm0, %v220_v0  ;;  %30 = vst.msk [vmem:[#allocation2 + $0x8] sm:$0xff] %vm28_vm0, %v220_v0  ;;  %v214_v2 = vld [vmem:[%s293_s1 + $0x8] sm:$0xff]  }
   0x2   :  { %204 = vmatpush3.bf16.msra.mxu0 %v213_v1  ;;  %v215_v3 = vld [vmem:[%s294_s0] sm:$0xff]  }
   0x3   :  { %205 = vmatprep.subr.bf16.mxu0 %v220_v0  ;;  %v197_v12 = vld [vmem:[%s295_s3] sm:$0xff]  }
   0x4   :  { %v189_v13 = vld [vmem:[%s296_s2] ss:$0 sm:$0xff]  ;;  %v198_v14 = vunpack.c.l.bf16 %v197_v12  ;;  %v199_v17 = vunpack.c.h.bf16 %v197_v12 }
   0x5   :  { %v190_v41 = vld [vmem:[%s297_s4] ss:$0 sm:$0xff] }
   0x6   :  { %206 = vmatpush3.bf16.msra.mxu0 %v214_v2  ;;  %v191_v43 = vld [vmem:[%s298_s5] ss:$0 sm:$0xff] }
   0x8   :  { %v31_v4 = vld [vmem:[#allocation2] sm:$0xff]  ;;  %v32_v6 = vld [vmem:[#allocation2 + $0x8] sm:$0xff] }
   0x9   :  { %208 = vmatmul.mubr.msk.bf16.vlgmr.msra.gmra.mrb[0].mxu0 %vm28_vm0, %v215_v3 }
  0xdc   :  { %v94_v5 = vpop.f32.mrb[0].mxu0 }
  0xdd   :  { %v101_v7 = vadd.f32 %v94_v5, %v31_v4  ;;  %v209_v8 = vpop.f32.mrb[1].mxu0 }
  0xde   :  { %v97_v9 = vpop.f32.mrb[2].mxu0 }
  0xdf   :  { %103 = vst.msk [vmem:[#allocation2] sm:$0xff] %vm28_vm0, %v101_v7  ;;  %v102_v10 = vadd.f32 %v97_v9, %v32_v6  ;;  %v210_v11 = vpop.f32.mrb[3].mxu0 }
  0xe1   :  { %104 = vst.msk [vmem:[#allocation2 + $0x8] sm:$0xff] %vm28_vm0, %v102_v10 }
  0xe6   :  { %v108_v15 = vld [vmem:[#allocation2] sm:$0xff] }
  0xe7   :  { %v117_v16 = vadd.f32 %v189_v13, %v108_v15 }
  0xe8   :  { %v109_v18 = vld [vmem:[#allocation2 + $0x8] sm:$0xff] }
  0xe9   :  { %v123_v19 = vadd.f32 %v198_v14, %v117_v16  ;;  %v118_v20 = vadd.f32 %v189_v13, %v109_v18 }
  0xeb   :  { %v125_v21 = vsel %vm28_vm0, %v123_v19, 0.0  ;;  %v124_v22 = vadd.f32 %v199_v17, %v118_v20 }
  0xec   :  { %126 = vadd.xlane.f32.xlu0 %v125_v21 }
  0xed   :  { %v128_v23 = vsel %vm28_vm0, %v124_v22, 0.0 }
  0xf0   :  { %129 = vadd.xlane.f32.xlu0 %v128_v23 }
 0x179   :  { %v127_v24 = vpop.xlane.xlu0 %126 }
 0x17a   :  { %v132_v25 = vmul.f32 0.03125, %v127_v24 }
 0x17c   :  { %v134_v26 = vsub.f32 %v123_v19, %v132_v25 }
 0x17d   :  { %v130_v27 = vpop.xlane.xlu0 %129 }
 0x17e   :  { %v133_v28 = vmul.f32 0.03125, %v130_v27  ;;  %v136_v29 = vmul.f32 %v134_v26, %v134_v26 }
 0x180   :  { %v135_v30 = vsub.f32 %v124_v22, %v133_v28  ;;  %v138_v31 = vsel %vm28_vm0, %v136_v29, 0.0 }
 0x181   :  { %139 = vadd.xlane.f32.xlu1 %v138_v31 }
 0x182   :  { %v137_v32 = vmul.f32 %v135_v30, %v135_v30 }
 0x184   :  { %v141_v33 = vsel %vm28_vm0, %v137_v32, 0.0 }
 0x185   :  { %142 = vadd.xlane.f32.xlu1 %v141_v33 }
 0x20e   :  { %v140_v34 = vpop.xlane.xlu1 %139 }
 0x20f   :  { %v144_v35 = vmul.f32 0.03125, %v140_v34 }
 0x211   :  { %v146_v36 = vadd.f32 1e-06, %v144_v35 }
 0x212   :  { %v143_v37 = vpop.xlane.xlu1 %142 }
 0x213   :  { %216 = vrsqrt.f32 %v146_v36  ;;  %v145_v38 = vmul.f32 0.03125, %v143_v37 }
 0x215   :  { %v147_v39 = vadd.f32 1e-06, %v145_v38 }
 0x217   :  { %218 = vrsqrt.f32 %v147_v39 }
 0x21d   :  { %v217_v40 = vpop.eup %216 }
 0x21e   :  { %v150_v42 = vmul.f32 %v217_v40, %v134_v26 }
 0x220   :  { %v159_v44 = vmul.f32 %v190_v41, %v150_v42 }
 0x221   :  { %v219_v45 = vpop.eup %218 }
 0x222   :  { %v168_v46 = vadd.f32 %v191_v43, %v159_v44  ;;  %v151_v47 = vmul.f32 %v219_v45, %v135_v30 }
 0x224   :  { %v194_v48 = vpack.c.bf16 %v168_v46, %v168_v46  ;;  %v160_v49 = vmul.f32 %v190_v41, %v151_v47 }
 0x226   :  { %179 = vst.msk [vmem:[%s299_s6] sm:$0xf] %vm178_vm2, %v194_v48  ;;  %v169_v50 = vadd.f32 %v191_v43, %v160_v49 }
 0x228   :  { %v195_v51 = vpack.c.bf16 %v169_v50, %v169_v50 }
 0x22a   :  { %180 = vst.msk [vmem:[%s299_s6 + $0x4] sm:$0xf] %vm178_vm2, %v195_v51 }

// kernel: transformer_forward.29
= control target key start
LH: loop header
LB: loop body
LE: loop exit
PB: predicated region body
PF: predicated region fallthrough
CT: control target
= control target key end

     0   :  { %vm19_vm0 = vcmask 785408   ;;  %v151_v0 = vmov 0.0   ;;  %vm152_vm1 = vmmov 0   ;;  %vm47_vm2 = vcmask 261120   ;;  %s195_s1 = inlined_call_operand.vmem [shape: bf16[32,96], index: 1, kind: input, shape index: {}]   ;;  %s196_s0 = inlined_call_operand.vmem [shape: bf16[16,32], index: 0, kind: input, shape index: {}]   ;;  %s197_s2 = inlined_call_operand.vmem [shape: f32[1,96], index: 2, kind: input, shape index: {}]   ;;  %s198_s3 = inlined_call_operand.vmem [shape: bf16[16,96], index: 3, kind: output, shape index: {}]  }
   0x1   :  { %138 = vmatprep.subr.bf16.mxu0 %v151_v0  ;;  %v148_v1 = vld [vmem:[%s195_s1] sm:$0xff]   ;;  %142 = vmatprep.mubr.msk.bf16.mxu0 %vm152_vm1, %v151_v0  ;;  %20 = vst.msk [vmem:[#allocation2] sm:$0xff] %vm19_vm0, %v151_v0  ;;  %21 = vst.msk [vmem:[#allocation2 + $0x8] sm:$0xff] %vm19_vm0, %v151_v0  ;;  %v149_v2 = vld [vmem:[%s195_s1 + $0x8] sm:$0xff]   ;;  %vm119_vm3 = vcmask 781312  }
   0x2   :  { %139 = vmatpush3.bf16.msra.mxu0 %v148_v1  ;;  %v150_v3 = vld [vmem:[%s196_s0] sm:$0xff]  }
   0x3   :  { %140 = vmatprep.subr.bf16.mxu0 %v151_v0  ;;  %v130_v12 = vld [vmem:[%s197_s2] ss:$0 sm:$0xff] }
   0x6   :  { %141 = vmatpush3.bf16.msra.mxu0 %v149_v2 }
   0x8   :  { %v22_v4 = vld [vmem:[#allocation2] sm:$0xff]  ;;  %v23_v6 = vld [vmem:[#allocation2 + $0x8] sm:$0xff] }
   0x9   :  { %143 = vmatmul.mubr.msk.bf16.vlgmr.msra.gmra.mrb[0].mxu0 %vm47_vm2, %v150_v3 }
  0xdc   :  { %v85_v5 = vpop.f32.mrb[0].mxu0 }
  0xdd   :  { %v92_v7 = vadd.f32 %v85_v5, %v22_v4  ;;  %v144_v8 = vpop.f32.mrb[1].mxu0 }
  0xde   :  { %v88_v9 = vpop.f32.mrb[2].mxu0 }
  0xdf   :  { %95 = vst.msk [vmem:[#allocation2] sm:$0xff] %vm19_vm0, %v92_v7  ;;  %v93_v10 = vadd.f32 %v88_v9, %v23_v6  ;;  %v145_v11 = vpop.f32.mrb[3].mxu0 }
  0xe1   :  { %96 = vst.msk [vmem:[#allocation2 + $0x8] sm:$0xff] %vm19_vm0, %v93_v10 }
  0xe6   :  { %v100_v13 = vld [vmem:[#allocation2] sm:$0xff] }
  0xe7   :  { %v109_v14 = vadd.f32 %v130_v12, %v100_v13 }
  0xe8   :  { %v101_v15 = vld [vmem:[#allocation2 + $0x8] sm:$0xff] }
  0xe9   :  { %v133_v16 = vpack.c.bf16 %v109_v14, %v109_v14  ;;  %v110_v17 = vadd.f32 %v130_v12, %v101_v15 }
  0xeb   :  { %120 = vst.msk [vmem:[%s198_s3] sm:$0xf] %vm119_vm3, %v133_v16  ;;  %v134_v18 = vpack.c.bf16 %v110_v17, %v110_v17 }
  0xed   :  { %121 = vst.msk [vmem:[%s198_s3 + $0x4] sm:$0xf] %vm119_vm3, %v134_v18 }

// kernel: transformer_forward.30
= control target key start
LH: loop header
LB: loop body
LE: loop exit
PB: predicated region body
PF: predicated region fallthrough
CT: control target
= control target key end

     0   :  { %s1294_s15 = smov 0   ;;  %s1296_s16 = smov 0   ;;  %s1477_s0 = inlined_call_operand.vmem [shape: bf16[2,8,32], index: 0, kind: input, shape index: {}]   ;;  %s1478_s1 = inlined_call_operand.vmem [shape: bf16[2,8,32], index: 1, kind: input, shape index: {}]   ;;  %s1479_s2 = inlined_call_operand.vmem [shape: bf16[2,8,32], index: 2, kind: input, shape index: {}]   ;;  %s1480_s3 = inlined_call_operand.vmem [shape: f32[2,1,8], index: 3, kind: input, shape index: {}]   ;;  %s1481_s4 = inlined_call_operand.vmem [shape: bf16[2,8,32], index: 4, kind: output, shape index: {}]  }
   0x1   :  { %s1298_s17 = smov 0  }
   0x2 LB: > { %s33_s18 = sadd.s32 1, %s1253_s16  ;;  %p1085_p0 = scmp.ge.s32.totalorder %s1257_s17, 1  ;;  %s1257_s17 = sphi %s1298_s17, %s14_s17   ;;  %s1253_s16 = sphi %s1296_s16, %s1483_s16   ;;  %s1249_s15 = sphi %s1294_s15, %s1482_s15  }
   0x3   : > { %p35_p1 = scmp.ge.s32.totalorder %s33_s18, 2  ;;  %p228_p2 = scmp.lt.s32.totalorder %s1257_s17, 3 }
   0x5   : > { %s1485_s18 = smov (%p35_p1, %s33_s18), 0  ;;  %p229_p3 = pnand %p1085_p0, %p228_p2 }
   0x6   : > { %p278_p4 = scmp.lt.s32.totalorder (!%p229_p3), %s1249_s15, 1  ;;  %vm326_vm0 = vcmask (!%p229_p3), 64512   ;;  %v1259_v0 = vmov (!%p229_p3), 0.0   ;;  %vm1260_vm1 = vmmov (!%p229_p3), 0   ;;  %v1261_v4 = vmov (!%p229_p3), 0   ;;  %s1263_s29 = smov (!%p229_p3), 120  }
   0x7   : > { %232 = sbr.rel (%p229_p3) target bundleno = 1470 (0x5be), region = 36  ;;  %1125 = vmatprep.subr.bf16.mxu0 (!%p229_p3), %v1259_v0  ;;  %327 = vst.msk [vmem:[#allocation4] sm:$0xff] (!%p229_p3), %vm326_vm0, %v1259_v0  ;;  %328 = vst.msk [vmem:[#allocation4 + $0x8] sm:$0xff] (!%p229_p3), %vm326_vm0, %v1259_v0  ;;  %1127 = vmatprep.mubr.msk.bf16.mxu0 (!%p229_p3), %vm1260_vm1, %v1259_v0  ;;  %vm317_vm2 = vcmask (!%p229_p3), 7168   ;;  %v1262_v5 = vmov (!%p229_p3), -1e+30   ;;  %v385_v6 = vlaneseq (!%p229_p3) }
   0x8   : > { %329 = vst.msk [vmem:[#allocation4 + $0x10] sm:$0xff] (!%p229_p3), %vm326_vm0, %v1259_v0  ;;  %330 = vst.msk [vmem:[#allocation4 + $0x18] sm:$0xff] (!%p229_p3), %vm326_vm0, %v1259_v0  ;;  %1131 = vmatprep.subr.bf16.mxu1 (!%p229_p3), %v1259_v0  ;;  %1133 = vmatprep.mubr.msk.bf16.mxu1 (!%p229_p3), %vm1260_vm1, %v1259_v0  ;;  %s1264_s30 = smov (!%p229_p3), 112   ;;  %s1265_s5 = smov (!%p229_p3), 104   ;;  %vm426_vm5 = vcmask (!%p229_p3), 1043456   ;;  %vm906_vm6 = vcmask (!%p229_p3), 60416  }
   0x9   : > { %1207 = vset.pattern.permute.xlu0 (!%p229_p3), %v1261_v4  ;;  %1208 = vset.pattern.permute.xlu1 (!%p229_p3), %v1261_v4  ;;  %318 = vst.msk [vmem:[#allocation2] sm:$0xff] (!%p229_p3), %vm317_vm2, %v1262_v5  ;;  %319 = vst.msk [vmem:[#allocation2 + $0x8] sm:$0xff] (!%p229_p3), %vm317_vm2, %v1262_v5  ;;  %v386_v8 = vshrl.u32 (!%p229_p3), %v385_v6, 7  ;;  %s1266_s12 = smov (!%p229_p3), 8   ;;  %s1267_s13 = smov (!%p229_p3), 16   ;;  %vm924_vm7 = vcmask (!%p229_p3), 126016  }
   0xa   : > { %320 = vst.msk [vmem:[#allocation2 + $0x10] sm:$0xff] (!%p229_p3), %vm317_vm2, %v1262_v5  ;;  %321 = vst.msk [vmem:[#allocation2 + $0x18] sm:$0xff] (!%p229_p3), %vm317_vm2, %v1262_v5  ;;  %s1268_s14 = smov (!%p229_p3), 24   ;;  %vm942_vm8 = vcmask (!%p229_p3), 191616   ;;  %vm960_vm9 = vcmask (!%p229_p3), 257216  }
   0xb   : > { %322 = vst.msk [vmem:[#allocation3] sm:$0xff] (!%p229_p3), %vm317_vm2, %v1259_v0  ;;  %323 = vst.msk [vmem:[#allocation3 + $0x8] sm:$0xff] (!%p229_p3), %vm317_vm2, %v1259_v0  ;;  %v387_v9 = vsub.s32 (!%p229_p3), 0, %v386_v8 }
   0xc   : > { %324 = vst.msk [vmem:[#allocation3 + $0x10] sm:$0xff] (!%p229_p3), %vm317_vm2, %v1259_v0  ;;  %325 = vst.msk [vmem:[#allocation3 + $0x18] sm:$0xff] (!%p229_p3), %vm317_vm2, %v1259_v0 }
   0xe   : > { %s1487_s15 = smov (!%p278_p4, %s1249_s15), 1 }
   0xf   : > { %s1326_s19 = sshll.u32 %s1487_s15, 2  ;;  %s304_s28 = scalar_lea.vmem %s1480_s3, %s1487_s15 }
  0x10   : > { %s291_s22 = scalar_lea.vmem %s1478_s1, %s1326_s19  ;;  %s284_s25 = scalar_lea.vmem %s1477_s0, %s1326_s19  ;;  %v331_v7 = vld [vmem:[%s304_s28] sm:$0x1] }
  0x11   : > { %v334_v1 = vld [vmem:[%s291_s22] sm:$0xf]  ;;  %vm332_vm3 = vcmp.gt.f32.partialorder %v331_v7, 0.0  ;;  %s298_s8 = scalar_lea.vmem %s1479_s2, %s1326_s19  ;;  %v672_v7 = vld [vmem:[#allocation2 + $0x10] sm:$0xff]  ;;  %s1459_s11 = scalar_lea.vmem %s1481_s4, %s1326_s19 }
  0x12   : > { %v341_v2 = vsel %vm326_vm0, %v334_v1, 0  ;;  %v333_v3 = vld [vmem:[%s284_s25] sm:$0xf]  ;;  %v384_v10 = vsel %vm332_vm3, 1, %v1261_v4  ;;  %v1093_v19 = vcombine.low %v334_v1, %v334_v1 }
  0x13   : > { %1126 = vmatpush3.bf16.xpose.msra.mxu0 %v341_v2  ;;  %v1356_v11 = vrot.slane %v384_v10, %v387_v9  ;;  %v1092_v20 = vcombine.low %v333_v3, %v333_v3  ;;  %v1368_v21 = vld [vmem:[#allocation2] sm:$0xff] }
  0x14   : > { %1143 = vmatprep.subr.bf16.mxu0 %v1259_v0  ;;  %481 = vrot.lane.b32.xlu1 %v1093_v19, %s1263_s29  ;;  %v1382_v25 = vld [vmem:[%s298_s8] sm:$0xf] }
  0x15   : > { %vm389_vm4 = vcmp.eq.s32.totalorder %v1356_v11, 1  ;;  %v428_v26 = vsel %vm426_vm5, %v1382_v25, 0  ;;  %v809_v11 = vld [vmem:[#allocation2 + $0x18] sm:$0xff] }
  0x16   : > { %1132 = vmatpush3.bf16.msra.mxu1 %v428_v26 }
  0x17   : > { %1137 = vmatprep.subr.bf16.mxu1 %v1259_v0 }
  0x18   : > { %476 = vrot.lane.b32.xlu1 %v1092_v20, %s1263_s29 }
  0x1a   : > { %1128 = vmatmul.mubr.msk.bf16.vlgmr.msra.gmra.mrb[0].mxu0 %vm326_vm0, %v333_v3  ;;  %v1417_v3 = vld [vmem:[#allocation2 + $0x8] sm:$0xff] }
  0x1b   : > { %1145 = vmatprep.mubr.msk.bf16.mxu0 %vm1260_vm1, %v1259_v0 }
  0x1c   : > { %621 = vrot.lane.b32.xlu1 %v1093_v19, %s1264_s30 }
  0x20   : > { %619 = vrot.lane.b32.xlu1 %v1092_v20, %s1264_s30 }
  0x24   : > { %758 = vrot.lane.b32.xlu1 %v1093_v19, %s1265_s5 }
  0x28   : > { %756 = vrot.lane.b32.xlu1 %v1092_v20, %s1265_s5 }
  0x86   : > { %v482_v30 = vpop.permute.xlu1 %481 }
  0x87   : > { %v487_v33 = vsel %vm326_vm0, %v482_v30, 0 }
  0x8a   : > { %v477_v31 = vpop.permute.xlu1 %476 }
  0x8e   : > { %v622_v35 = vpop.permute.xlu1 %621 }
  0x8f   : > { %v627_v37 = vsel %vm326_vm0, %v622_v35, 0 }
  0x92   : > { %v620_v36 = vpop.permute.xlu1 %619 }
  0x96   : > { %v759_v38 = vpop.permute.xlu1 %758 }
  0x97   : > { %v764_v39 = vsel %vm326_vm0, %v759_v38, 0 }
  0x9a   : > { %v757_v40 = vpop.permute.xlu1 %756 }
  0xed   : > { %v377_v12 = vpop.f32.mrb[0].mxu0 }
  0xee   : > { %v383_v13 = vmul.f32 0.35355338, %v377_v12  ;;  %v1129_v14 = vpop.f32.mrb[1].mxu0 }
  0xef   : > { %v380_v15 = vpop.f32.mrb[2].mxu0  ;;  %v1095_v14 = vcombine.low %v1382_v25, %v1382_v25 }
  0xf0   : > { %v1130_v16 = vpop.f32.mrb[3].mxu0  ;;  %v390_v17 = vsel %vm389_vm4, %v383_v13, -1e+09 }
  0xf1   : > { %v392_v18 = vsel %vm326_vm0, %v390_v17, -inf }
  0xf2   : > { %393 = vmax.xlane.f32.xlu0 %v392_v18 }
 0x17f   : > { %v394_v22 = vpop.xlane.xlu0 %393 }
 0x180   : > { %v1371_v23 = vmax.f32 %v1368_v21, %v394_v22 }
 0x182   : > { %v396_v24 = vsub.f32 %v1368_v21, %v1371_v23  ;;  %472 = vst.msk [vmem:[#allocation2] sm:$0xff] %vm317_vm2, %v1371_v23  ;;  %401 = vperm.xlu0 %1207, %v1371_v23  }
 0x201   : > { %v402_v27 = vpop.permute.xlu0 %401 }
 0x202   : > { %v404_v28 = vsub.f32 %v390_v17, %v402_v27 }
 0x204   : > { %v405_v29 = vmul.f32 1.442695, %v404_v28 }
 0x206   : > { %1211 = vpow2.f32 %v405_v29 }
 0x210   : > { %v1387_v32 = vpop.eup %1211 }
 0x211   : > { %v422_v34 = vpack.c.bf16 %v1387_v32, %v1387_v32  ;;  %v409_v16 = vsel %vm326_vm0, %v1387_v32, 0.0 }
 0x213   : > { %1134 = vmatmul.mubr.msk.bf16.vlgmr.msra.gmra.mrb[0].mxu1 %vm326_vm0, %v422_v34 }
 0x214   : > { %1138 = vmatpush3.bf16.xpose.msra.mxu1 %v487_v33  ;;  %1139 = vmatprep.mubr.msk.bf16.mxu1 %vm1260_vm1, %v1259_v0 }
 0x215   : > { %1149 = vmatprep.subr.bf16.mxu1 %v1259_v0 }
 0x21b   : > { %1140 = vmatmul.mubr.msk.bf16.vlgmr.msra.gmra.mrb[4].mxu1 %vm326_vm0, %v477_v31 }
 0x21c   : > { %1150 = vmatpush3.bf16.xpose.msra.mxu1 %v627_v37  ;;  %1151 = vmatprep.mubr.msk.bf16.mxu1 %vm1260_vm1, %v1259_v0 }
 0x21d   : > { %1161 = vmatprep.subr.bf16.mxu1 %v1259_v0 }
 0x223   : > { %1152 = vmatmul.mubr.msk.bf16.vlgmr.msra.gmra.mrb[8].mxu1 %vm326_vm0, %v620_v36 }
 0x224   : > { %1162 = vmatpush3.bf16.xpose.msra.mxu1 %v764_v39  ;;  %1163 = vmatprep.mubr.msk.bf16.mxu1 %vm1260_vm1, %v1259_v0 }
 0x22b   : > { %1164 = vmatmul.mubr.msk.bf16.vlgmr.msra.gmra.mrb[12].mxu1 %vm326_vm0, %v757_v40 }
 0x2e6   : > { %v1406_v41 = vpop.f32.mrb[0].mxu1 }
 0x2e7   : > { %v1135_v42 = vpop.f32.mrb[1].mxu1 }
 0x2e8   : > { %v467_v43 = vpop.f32.mrb[2].mxu1 }
 0x2e9   : > { %v1136_v44 = vpop.f32.mrb[3].mxu1  ;;  %v397_v43 = vmul.f32 1.442695, %v396_v24 }
 0x2ee   : > { %v523_v45 = vpop.f32.mrb[4].mxu1 }
 0x2ef   : > { %v529_v46 = vmul.f32 0.35355338, %v523_v45  ;;  %v1141_v47 = vpop.f32.mrb[5].mxu1 }
 0x2f0   : > { %v526_v48 = vpop.f32.mrb[6].mxu1 }
 0x2f1   : > { %v1142_v49 = vpop.f32.mrb[7].mxu1  ;;  %v530_v50 = vsel %vm389_vm4, %v529_v46, -1e+09 }
 0x2f2   : > { %v533_v51 = vsel %vm326_vm0, %v530_v50, -inf }
 0x2f3   : > { %534 = vmax.xlane.f32.xlu1 %v533_v51 }
 0x2f6   : > { %v663_v52 = vpop.f32.mrb[8].mxu1 }
 0x2f7   : > { %v669_v53 = vmul.f32 0.35355338, %v663_v52  ;;  %v1153_v54 = vpop.f32.mrb[9].mxu1 }
 0x2f8   : > { %v666_v55 = vpop.f32.mrb[10].mxu1 }
 0x2f9   : > { %v1154_v56 = vpop.f32.mrb[11].mxu1  ;;  %v670_v57 = vsel %vm389_vm4, %v669_v53, -1e+09  ;;  %v549_v55 = vld [vmem:[#allocation3 + $0x8] sm:$0xff] }
 0x2fa   : > { %v673_v58 = vsel %vm326_vm0, %v670_v57, -inf }
 0x2fb   : > { %674 = vmax.xlane.f32.xlu0 %v673_v58 }
 0x2fe   : > { %v800_v59 = vpop.f32.mrb[12].mxu1 }
 0x2ff   : > { %v806_v60 = vmul.f32 0.35355338, %v800_v59  ;;  %v1165_v61 = vpop.f32.mrb[13].mxu1  ;;  %v689_v59 = vld [vmem:[#allocation3 + $0x10] sm:$0xff] }
 0x300   : > { %v803_v62 = vpop.f32.mrb[14].mxu1 }
 0x301   : > { %v1166_v63 = vpop.f32.mrb[15].mxu1  ;;  %v807_v1 = vsel %vm389_vm4, %v806_v60, -1e+09 }
 0x302   : > { %v810_v2 = vsel %vm326_vm0, %v807_v1, -inf }
 0x303   : > { %811 = vmax.xlane.f32.xlu1 %v810_v2  ;;  %v415_v2 = vld [vmem:[#allocation4] sm:$0xff] }
 0x380   : > { %v535_v4 = vpop.xlane.xlu1 %534 }
 0x381   : > { %v536_v5 = vmax.f32 %v1417_v3, %v535_v4 }
 0x383   : > { %v537_v6 = vsub.f32 %v1417_v3, %v536_v5  ;;  %618 = vst.msk [vmem:[#allocation2 + $0x8] sm:$0xff] %vm317_vm2, %v536_v5  ;;  %542 = vperm.xlu1 %1208, %v536_v5  }
 0x385   : > { %v538_v45 = vmul.f32 1.442695, %v537_v6 }
 0x388   : > { %v675_v8 = vpop.xlane.xlu0 %674 }
 0x389   : > { %v676_v9 = vmax.f32 %v672_v7, %v675_v8 }
 0x38b   : > { %v677_v10 = vsub.f32 %v672_v7, %v676_v9  ;;  %755 = vst.msk [vmem:[#allocation2 + $0x10] sm:$0xff] %vm317_vm2, %v676_v9  ;;  %682 = vperm.xlu0 %1207, %v676_v9  }
 0x38d   : > { %v678_v47 = vmul.f32 1.442695, %v677_v10 }
 0x390   : > { %v812_v12 = vpop.xlane.xlu1 %811 }
 0x391   : > { %v813_v13 = vmax.f32 %v809_v11, %v812_v12 }
 0x393   : > { %v814_v15 = vsub.f32 %v809_v11, %v813_v13  ;;  %892 = vst.msk [vmem:[#allocation2 + $0x18] sm:$0xff] %vm317_vm2, %v813_v13  ;;  %819 = vperm.xlu1 %1208, %v813_v13  }
 0x395   : > { %v815_v46 = vmul.f32 1.442695, %v814_v15 }
 0x397   : > { %568 = vrot.lane.b32.xlu1 %v1095_v14, %s1263_s29 }
 0x39b   : > { %705 = vrot.lane.b32.xlu1 %v1095_v14, %s1264_s30 }
 0x39f   : > { %842 = vrot.lane.b32.xlu1 %v1095_v14, %s1265_s5 }
 0x3c3   : > { %410 = vadd.xlane.f32.xlu1 %v409_v16 }
 0x402   : > { %v543_v17 = vpop.permute.xlu1 %542 }
 0x403   : > { %v545_v18 = vsub.f32 %v530_v50, %v543_v17  ;;  %v407_v50 = vld [vmem:[#allocation3] sm:$0xff] }
 0x405   : > { %v546_v19 = vmul.f32 1.442695, %v545_v18 }
 0x407   : > { %1213 = vpow2.f32 %v546_v19  ;;  %v557_v19 = vld [vmem:[#allocation4 + $0x8] sm:$0xff] }
 0x40a   : > { %v683_v20 = vpop.permute.xlu0 %682 }
 0x40b   : > { %v685_v22 = vsub.f32 %v670_v57, %v683_v20 }
 0x40d   : > { %v686_v25 = vmul.f32 1.442695, %v685_v22 }
 0x40f   : > { %1215 = vpow2.f32 %v686_v25 }
 0x411   : > { %v1214_v26 = vpop.eup %1213 }
 0x412   : > { %v820_v27 = vpop.permute.xlu1 %819  ;;  %v551_v28 = vsel %vm326_vm0, %v1214_v26, 0.0  ;;  %v564_v34 = vpack.c.bf16 %v1214_v26, %v1214_v26 }
 0x413   : > { %v822_v29 = vsub.f32 %v807_v1, %v820_v27  ;;  %552 = vadd.xlane.f32.xlu0 %v551_v28  ;;  %v826_v1 = vld [vmem:[#allocation3 + $0x18] sm:$0xff] }
 0x415   : > { %v823_v30 = vmul.f32 1.442695, %v822_v29  ;;  %v697_v29 = vld [vmem:[#allocation4 + $0x10] sm:$0xff] }
 0x416   : > { %v569_v31 = vpop.permute.xlu1 %568 }
 0x417   : > { %1217 = vpow2.f32 %v823_v30  ;;  %v574_v32 = vsel %vm426_vm5, %v569_v31, 0 }
 0x418   : > { %1144 = vmatpush3.bf16.msra.mxu0 %v574_v32  ;;  %1219 = vpow2.f32 %v397_v43 }
 0x419   : > { %v1216_v33 = vpop.eup %1215  ;;  %1155 = vmatprep.subr.bf16.mxu0 %v1259_v0  ;;  %1221 = vpow2.f32 %v538_v45 }
 0x41a   : > { %v691_v35 = vsel %vm326_vm0, %v1216_v33, 0.0  ;;  %v706_v36 = vpop.permute.xlu1 %705  ;;  %v704_v40 = vpack.c.bf16 %v1216_v33, %v1216_v33  ;;  %1223 = vpow2.f32 %v815_v46 }
 0x41b   : > { %692 = vadd.xlane.f32.xlu0 %v691_v35  ;;  %1146 = vmatmul.mubr.msk.bf16.vlgmr.msra.gmra.mrb[4].mxu0 %vm326_vm0, %v564_v34  ;;  %v711_v37 = vsel %vm426_vm5, %v706_v36, 0  ;;  %1225 = vpow2.f32 %v678_v47  ;;  %v834_v36 = vld [vmem:[#allocation4 + $0x18] sm:$0xff] }
 0x41c   : > { %1156 = vmatpush3.bf16.msra.mxu0 %v711_v37  ;;  %1157 = vmatprep.mubr.msk.bf16.mxu0 %vm1260_vm1, %v1259_v0 }
 0x41d   : > { %1167 = vmatprep.subr.bf16.mxu0 %v1259_v0 }
 0x41e   : > { %v843_v38 = vpop.permute.xlu1 %842 }
 0x41f   : > { %v848_v42 = vsel %vm426_vm5, %v843_v38, 0 }
 0x421   : > { %v1218_v39 = vpop.eup %1217 }
 0x422   : > { %v828_v44 = vsel %vm326_vm0, %v1218_v39, 0.0  ;;  %v841_v48 = vpack.c.bf16 %v1218_v39, %v1218_v39  ;;  %v1220_v21 = vpop.eup %1219 }
 0x423   : > { %1158 = vmatmul.mubr.msk.bf16.vlgmr.msra.gmra.mrb[8].mxu0 %vm326_vm0, %v704_v40  ;;  %829 = vadd.xlane.f32.xlu1 %v828_v44  ;;  %v1222_v23 = vpop.eup %1221 }
 0x424   : > { %1168 = vmatpush3.bf16.msra.mxu0 %v848_v42  ;;  %1169 = vmatprep.mubr.msk.bf16.mxu0 %vm1260_vm1, %v1259_v0  ;;  %v1224_v24 = vpop.eup %1223  ;;  %v408_v0 = vmul.f32 %v1220_v21, %v407_v50  ;;  %v550_v56 = vmul.f32 %v1222_v23, %v549_v55 }
 0x425   : > { %v1226_v49 = vpop.eup %1225  ;;  %v827_v3 = vmul.f32 %v1224_v24, %v826_v1 }
 0x426   : > { %v690_v60 = vmul.f32 %v1226_v49, %v689_v59 }
 0x42b   : > { %1170 = vmatmul.mubr.msk.bf16.vlgmr.msra.gmra.mrb[12].mxu0 %vm326_vm0, %v841_v48 }
 0x431   : > { %418 = vperm.xlu0 %1207, %v1220_v21  }
 0x434   : > { %560 = vperm.xlu1 %1208, %v1222_v23  }
 0x435   : > { %837 = vperm.xlu0 %1207, %v1224_v24  }
 0x438   : > { %700 = vperm.xlu1 %1208, %v1226_v49  }
 0x450   : > { %v411_v51 = vpop.xlane.xlu1 %410 }
 0x451   : > { %v412_v52 = vadd.f32 %v411_v51, %v408_v0 }
 0x453   : > { %414 = vst.msk [vmem:[#allocation3] sm:$0xff] %vm317_vm2, %v412_v52 }
 0x45a   : > { %v896_v53 = vld [vmem:[#allocation3] sm:$0xff] }
 0x45b   : > { %1227 = vrcp.f32 %v896_v53 }
 0x465   : > { %v1228_v54 = vpop.eup %1227 }
 0x466   : > { %901 = vperm.xlu1 %1208, %v1228_v54  }
 0x4a0   : > { %v553_v57 = vpop.xlane.xlu0 %552 }
 0x4a1   : > { %v554_v58 = vadd.f32 %v553_v57, %v550_v56 }
 0x4a3   : > { %555 = vst.msk [vmem:[#allocation3 + $0x8] sm:$0xff] %vm317_vm2, %v554_v58 }
 0x4a8   : > { %v693_v61 = vpop.xlane.xlu0 %692 }
 0x4a9   : > { %v694_v62 = vadd.f32 %v693_v61, %v690_v60 }
 0x4aa   : > { %v908_v63 = vld [vmem:[#allocation3 + $0x8] sm:$0xff] }
 0x4ab   : > { %695 = vst.msk [vmem:[#allocation3 + $0x10] sm:$0xff] %vm317_vm2, %v694_v62  ;;  %1229 = vrcp.f32 %v908_v63 }
 0x4b0   : > { %v830_v4 = vpop.xlane.xlu1 %829  ;;  %v419_v5 = vpop.permute.xlu0 %418 }
 0x4b1   : > { %v831_v6 = vadd.f32 %v830_v4, %v827_v3  ;;  %v421_v7 = vmul.f32 %v419_v5, %v415_v2 }
 0x4b2   : > { %v926_v8 = vld [vmem:[#allocation3 + $0x10] sm:$0xff] }
 0x4b3   : > { %832 = vst.msk [vmem:[#allocation3 + $0x18] sm:$0xff] %vm317_vm2, %v831_v6  ;;  %v470_v9 = vadd.f32 %v1406_v41, %v421_v7  ;;  %1231 = vrcp.f32 %v926_v8 }
 0x4b4   : > { %v561_v14 = vpop.permute.xlu1 %560  ;;  %v838_v37 = vpop.permute.xlu0 %837 }
 0x4b5   : > { %v1230_v10 = vpop.eup %1229  ;;  %471 = vst.msk [vmem:[#allocation4] sm:$0xff] %vm326_vm0, %v470_v9  ;;  %v563_v20 = vmul.f32 %v561_v14, %v557_v19  ;;  %v840_v38 = vmul.f32 %v838_v37, %v834_v36 }
 0x4b6   : > { %913 = vperm.xlu0 %1207, %v1230_v10  }
 0x4b8   : > { %v701_v15 = vpop.permute.xlu1 %700 }
 0x4b9   : > { %v703_v30 = vmul.f32 %v701_v15, %v697_v29 }
 0x4ba   : > { %v944_v11 = vld [vmem:[#allocation3 + $0x18] sm:$0xff] }
 0x4bb   : > { %1233 = vrcp.f32 %v944_v11 }
 0x4bc   : > { %v898_v16 = vld [vmem:[#allocation4] sm:$0xff] }
 0x4bd   : > { %v1232_v12 = vpop.eup %1231 }
 0x4be   : > { %931 = vperm.xlu0 %1207, %v1232_v12  }
 0x4c5   : > { %v1234_v13 = vpop.eup %1233 }
 0x4c6   : > { %949 = vperm.xlu0 %1207, %v1234_v13  }
 0x4e5   : > { %v902_v17 = vpop.permute.xlu1 %901 }
 0x4e6   : > { %v904_v18 = vmul.f32 %v902_v17, %v898_v16 }
 0x4e8   : > { %v905_v41 = vpack.c.bf16 %v904_v18, %v904_v18 }
 0x4ea   : > { %907 = vst.msk [vmem:[%s1459_s11] sm:$0xf] %vm906_vm6, %v905_v41 }
 0x4ee   : > { %v610_v22 = vpop.f32.mrb[4].mxu0 }
 0x4ef   : > { %v616_v25 = vadd.f32 %v610_v22, %v563_v20  ;;  %v1147_v26 = vpop.f32.mrb[5].mxu0 }
 0x4f0   : > { %v613_v27 = vpop.f32.mrb[6].mxu0 }
 0x4f1   : > { %617 = vst.msk [vmem:[#allocation4 + $0x8] sm:$0xff] %vm326_vm0, %v616_v25  ;;  %v1148_v28 = vpop.f32.mrb[7].mxu0 }
 0x4f6   : > { %v747_v31 = vpop.f32.mrb[8].mxu0 }
 0x4f7   : > { %v753_v32 = vadd.f32 %v747_v31, %v703_v30  ;;  %v1159_v33 = vpop.f32.mrb[9].mxu0 }
 0x4f8   : > { %v750_v34 = vpop.f32.mrb[10].mxu0  ;;  %v910_v46 = vld [vmem:[#allocation4 + $0x8] sm:$0xff] }
 0x4f9   : > { %754 = vst.msk [vmem:[#allocation4 + $0x10] sm:$0xff] %vm326_vm0, %v753_v32  ;;  %v1160_v35 = vpop.f32.mrb[11].mxu0 }
 0x4fe   : > { %v884_v39 = vpop.f32.mrb[12].mxu0 }
 0x4ff   : > { %v890_v40 = vadd.f32 %v884_v39, %v840_v38  ;;  %v1171_v42 = vpop.f32.mrb[13].mxu0 }
 0x500   : > { %v887_v43 = vpop.f32.mrb[14].mxu0  ;;  %v928_v23 = vld [vmem:[#allocation4 + $0x10] sm:$0xff] }
 0x501   : > { %891 = vst.msk [vmem:[#allocation4 + $0x18] sm:$0xff] %vm326_vm0, %v890_v40  ;;  %v1172_v44 = vpop.f32.mrb[15].mxu0 }
 0x508   : > { %v946_v0 = vld [vmem:[#allocation4 + $0x18] sm:$0xff] }
 0x535   : > { %v914_v45 = vpop.permute.xlu0 %913 }
 0x536   : > { %v916_v47 = vmul.f32 %v914_v45, %v910_v46 }
 0x538   : > { %v1106_v48 = vpack.c.bf16 %v916_v47, %v916_v47 }
 0x53a   : > { %921 = vrot.lane.b32.xlu1 %v1106_v48, %s1266_s12 }
 0x53d   : > { %v932_v21 = vpop.permute.xlu0 %931 }
 0x53e   : > { %v934_v24 = vmul.f32 %v932_v21, %v928_v23 }
 0x540   : > { %v1107_v49 = vpack.c.bf16 %v934_v24, %v934_v24 }
 0x542   : > { %939 = vrot.lane.b32.xlu1 %v1107_v49, %s1267_s13 }
 0x545   : > { %v950_v50 = vpop.permute.xlu0 %949 }
 0x546   : > { %v952_v51 = vmul.f32 %v950_v50, %v946_v0 }
 0x548   : > { %v1108_v52 = vpack.c.bf16 %v952_v51, %v952_v51 }
 0x54a   : > { %957 = vrot.lane.b32.xlu1 %v1108_v52, %s1268_s14 }
 0x5ac   : > { %v922_v53 = vpop.permute.xlu1 %921 }
 0x5ad   : > { %925 = vst.msk [vmem:[%s1459_s11] sm:$0xf] %vm924_vm7, %v922_v53 }
 0x5b4   : > { %v940_v54 = vpop.permute.xlu1 %939 }
 0x5b5   : > { %943 = vst.msk [vmem:[%s1459_s11] sm:$0xf] %vm942_vm8, %v940_v54 }
 0x5bc   : > { %v958_v55 = vpop.permute.xlu1 %957 }
 0x5bd   : > { %961 = vst.msk [vmem:[%s1459_s11] sm:$0xf] %vm960_vm9, %v958_v55 }
 0x5be PF: > { %s14_s17 = sadd.s32 1, %s1257_s17   ;;  %s1482_s15 = smov %s1253_s16 }
 0x5bf   : > { %p11_p5 = scmp.ge.s32.totalorder %s14_s17, 4   ;;  %s1483_s16 = smov %s1485_s18 }
 0x5c1   :  { %13 = sbr.rel (!%p11_p5) target bundleno = 2 (0x2), region = 92 }

// kernel: transformer_forward.43
= control target key start
LH: loop header
LB: loop body
LE: loop exit
PB: predicated region body
PF: predicated region fallthrough
CT: control target
= control target key end

     0   :  { %vm19_vm0 = vcmask 523264   ;;  %v151_v0 = vmov 0.0   ;;  %vm152_vm1 = vmmov 0   ;;  %vm47_vm2 = vcmask 261120   ;;  %s195_s1 = inlined_call_operand.vmem [shape: bf16[32,64], index: 1, kind: input, shape index: {}]   ;;  %s196_s0 = inlined_call_operand.vmem [shape: bf16[16,32], index: 0, kind: input, shape index: {}]   ;;  %s197_s2 = inlined_call_operand.vmem [shape: f32[1,64], index: 2, kind: input, shape index: {}]   ;;  %s198_s3 = inlined_call_operand.vmem [shape: bf16[16,64], index: 3, kind: output, shape index: {}]  }
   0x1   :  { %138 = vmatprep.subr.bf16.mxu0 %v151_v0  ;;  %v148_v1 = vld [vmem:[%s195_s1] sm:$0xff]   ;;  %142 = vmatprep.mubr.msk.bf16.mxu0 %vm152_vm1, %v151_v0  ;;  %20 = vst.msk [vmem:[#allocation2] sm:$0xff] %vm19_vm0, %v151_v0  ;;  %21 = vst.msk [vmem:[#allocation2 + $0x8] sm:$0xff] %vm19_vm0, %v151_v0  ;;  %v149_v2 = vld [vmem:[%s195_s1 + $0x8] sm:$0xff]   ;;  %vm119_vm3 = vcmask 519168  }
   0x2   :  { %139 = vmatpush3.bf16.msra.mxu0 %v148_v1  ;;  %v150_v3 = vld [vmem:[%s196_s0] sm:$0xff]  }
   0x3   :  { %140 = vmatprep.subr.bf16.mxu0 %v151_v0  ;;  %v130_v12 = vld [vmem:[%s197_s2] ss:$0 sm:$0xff] }
   0x6   :  { %141 = vmatpush3.bf16.msra.mxu0 %v149_v2 }
   0x8   :  { %v22_v4 = vld [vmem:[#allocation2] sm:$0xff]  ;;  %v23_v6 = vld [vmem:[#allocation2 + $0x8] sm:$0xff] }
   0x9   :  { %143 = vmatmul.mubr.msk.bf16.vlgmr.msra.gmra.mrb[0].mxu0 %vm47_vm2, %v150_v3 }
  0xdc   :  { %v85_v5 = vpop.f32.mrb[0].mxu0 }
  0xdd   :  { %v92_v7 = vadd.f32 %v85_v5, %v22_v4  ;;  %v144_v8 = vpop.f32.mrb[1].mxu0 }
  0xde   :  { %v88_v9 = vpop.f32.mrb[2].mxu0 }
  0xdf   :  { %95 = vst.msk [vmem:[#allocation2] sm:$0xff] %vm19_vm0, %v92_v7  ;;  %v93_v10 = vadd.f32 %v88_v9, %v23_v6  ;;  %v145_v11 = vpop.f32.mrb[3].mxu0 }
  0xe1   :  { %96 = vst.msk [vmem:[#allocation2 + $0x8] sm:$0xff] %vm19_vm0, %v93_v10 }
  0xe6   :  { %v100_v13 = vld [vmem:[#allocation2] sm:$0xff] }
  0xe7   :  { %v109_v14 = vadd.f32 %v130_v12, %v100_v13 }
  0xe8   :  { %v101_v15 = vld [vmem:[#allocation2 + $0x8] sm:$0xff] }
  0xe9   :  { %v133_v16 = vpack.c.bf16 %v109_v14, %v109_v14  ;;  %v110_v17 = vadd.f32 %v130_v12, %v101_v15 }
  0xeb   :  { %120 = vst.msk [vmem:[%s198_s3] sm:$0xf] %vm119_vm3, %v133_v16  ;;  %v134_v18 = vpack.c.bf16 %v110_v17, %v110_v17 }
  0xed   :  { %121 = vst.msk [vmem:[%s198_s3 + $0x4] sm:$0xf] %vm119_vm3, %v134_v18 }

// kernel: transformer_forward.33
= control target key start
LH: loop header
LB: loop body
LE: loop exit
PB: predicated region body
PF: predicated region fallthrough
CT: control target
= control target key end

     0   :  { %vm28_vm0 = vcmask 261120   ;;  %v295_v0 = vmov 0.0   ;;  %vm296_vm1 = vmmov 0   ;;  %vm224_vm2 = vcmask 257024   ;;  %s385_s1 = inlined_call_operand.vmem [shape: bf16[128,32], index: 1, kind: input, shape index: {}]   ;;  %s386_s0 = inlined_call_operand.vmem [shape: bf16[16,128], index: 0, kind: input, shape index: {}]   ;;  %s387_s3 = inlined_call_operand.vmem [shape: bf16[16,32], index: 3, kind: input, shape index: {}]   ;;  %s388_s2 = inlined_call_operand.vmem [shape: f32[1,32], index: 2, kind: input, shape index: {}]   ;;  %s389_s4 = inlined_call_operand.vmem [shape: f32[1,32], index: 4, kind: input, shape index: {}]   ;;  %s390_s5 = inlined_call_operand.vmem [shape: f32[1,32], index: 5, kind: input, shape index: {}]   ;;  %s391_s6 = inlined_call_operand.vmem [shape: bf16[16,32], index: 6, kind: output, shape index: {}]  }
   0x1   :  { %260 = vmatprep.subr.bf16.mxu0 %v295_v0  ;;  %v282_v1 = vld [vmem:[%s385_s1] sm:$0xff]   ;;  %276 = vmatprep.mubr.msk.bf16.mxu0 %vm296_vm1, %v295_v0  ;;  %29 = vst.msk [vmem:[#allocation2] sm:$0xff] %vm28_vm0, %v295_v0  ;;  %30 = vst.msk [vmem:[#allocation2 + $0x8] sm:$0xff] %vm28_vm0, %v295_v0  ;;  %v283_v2 = vld [vmem:[%s385_s1 + $0x8] sm:$0xff]  }
   0x2   :  { %261 = vmatpush3.bf16.msra.mxu0 %v282_v1  ;;  %v284_v3 = vld [vmem:[%s385_s1 + $0x10] sm:$0xff]   ;;  %v285_v4 = vld [vmem:[%s385_s1 + $0x18] sm:$0xff]   ;;  %v286_v5 = vld [vmem:[%s385_s1 + $0x20] sm:$0xff]  }
   0x3   :  { %262 = vmatprep.subr.bf16.mxu0 %v295_v0  ;;  %v287_v6 = vld [vmem:[%s385_s1 + $0x28] sm:$0xff]   ;;  %v288_v7 = vld [vmem:[%s385_s1 + $0x30] sm:$0xff]   ;;  %v289_v8 = vld [vmem:[%s385_s1 + $0x38] sm:$0xff]  }
   0x4   :  { %v290_v9 = vld [vmem:[%s386_s0] sm:$0xff]  }
   0x5   :  { %v248_v18 = vld [vmem:[%s387_s3] sm:$0xff]  }
   0x6   :  { %263 = vmatpush3.bf16.msra.mxu0 %v283_v2  ;;  %v240_v19 = vld [vmem:[%s388_s2] ss:$0 sm:$0xff]  ;;  %v249_v20 = vunpack.c.l.bf16 %v248_v18  ;;  %v250_v23 = vunpack.c.h.bf16 %v248_v18 }
   0x7   :  { %264 = vmatprep.subr.bf16.mxu0 %v295_v0  ;;  %v241_v47 = vld [vmem:[%s389_s4] ss:$0 sm:$0xff] }
   0x8   :  { %v31_v10 = vld [vmem:[#allocation2] sm:$0xff]  ;;  %v32_v12 = vld [vmem:[#allocation2 + $0x8] sm:$0xff] }
   0x9   :  { %v242_v49 = vld [vmem:[%s390_s5] ss:$0 sm:$0xff] }
   0xa   :  { %265 = vmatpush3.bf16.msra.mxu0 %v284_v3 }
   0xb   :  { %266 = vmatprep.subr.bf16.mxu0 %v295_v0 }
   0xe   :  { %267 = vmatpush3.bf16.msra.mxu0 %v285_v4 }
   0xf   :  { %268 = vmatprep.subr.bf16.mxu0 %v295_v0 }
  0x12   :  { %269 = vmatpush3.bf16.msra.mxu0 %v286_v5 }
  0x13   :  { %270 = vmatprep.subr.bf16.mxu0 %v295_v0 }
  0x16   :  { %271 = vmatpush3.bf16.msra.mxu0 %v287_v6 }
  0x17   :  { %272 = vmatprep.subr.bf16.mxu0 %v295_v0 }
  0x1a   :  { %273 = vmatpush3.bf16.msra.mxu0 %v288_v7 }
  0x1b   :  { %274 = vmatprep.subr.bf16.mxu0 %v295_v0 }
  0x1e   :  { %275 = vmatpush3.bf16.msra.mxu0 %v289_v8 }
  0x21   :  { %277 = vmatmul.mubr.bf16.vlgmr.msra.gmra.mrb[0].mxu0 %v290_v9 }
  0xf4   :  { %v139_v11 = vpop.f32.mrb[0].mxu0 }
  0xf5   :  { %v146_v13 = vadd.f32 %v139_v11, %v31_v10  ;;  %v278_v14 = vpop.f32.mrb[1].mxu0 }
  0xf6   :  { %v142_v15 = vpop.f32.mrb[2].mxu0 }
  0xf7   :  { %149 = vst.msk [vmem:[#allocation2] sm:$0xff] %vm28_vm0, %v146_v13  ;;  %v147_v16 = vadd.f32 %v142_v15, %v32_v12  ;;  %v279_v17 = vpop.f32.mrb[3].mxu0 }
  0xf9   :  { %150 = vst.msk [vmem:[#allocation2 + $0x8] sm:$0xff] %vm28_vm0, %v147_v16 }
  0xfe   :  { %v154_v21 = vld [vmem:[#allocation2] sm:$0xff] }
  0xff   :  { %v163_v22 = vadd.f32 %v240_v19, %v154_v21 }
 0x100   :  { %v155_v24 = vld [vmem:[#allocation2 + $0x8] sm:$0xff] }
 0x101   :  { %v169_v25 = vadd.f32 %v249_v20, %v163_v22  ;;  %v164_v26 = vadd.f32 %v240_v19, %v155_v24 }
 0x103   :  { %v171_v27 = vsel %vm28_vm0, %v169_v25, 0.0  ;;  %v170_v28 = vadd.f32 %v250_v23, %v164_v26 }
 0x104   :  { %172 = vadd.xlane.f32.xlu0 %v171_v27 }
 0x105   :  { %v174_v29 = vsel %vm28_vm0, %v170_v28, 0.0 }
 0x108   :  { %175 = vadd.xlane.f32.xlu0 %v174_v29 }
 0x191   :  { %v173_v30 = vpop.xlane.xlu0 %172 }
 0x192   :  { %v178_v31 = vmul.f32 0.03125, %v173_v30 }
 0x194   :  { %v180_v32 = vsub.f32 %v169_v25, %v178_v31 }
 0x195   :  { %v176_v33 = vpop.xlane.xlu0 %175 }
 0x196   :  { %v179_v34 = vmul.f32 0.03125, %v176_v33  ;;  %v182_v35 = vmul.f32 %v180_v32, %v180_v32 }
 0x198   :  { %v181_v36 = vsub.f32 %v170_v28, %v179_v34  ;;  %v184_v37 = vsel %vm28_vm0, %v182_v35, 0.0 }
 0x199   :  { %185 = vadd.xlane.f32.xlu1 %v184_v37 }
 0x19a   :  { %v183_v38 = vmul.f32 %v181_v36, %v181_v36 }
 0x19c   :  { %v187_v39 = vsel %vm28_vm0, %v183_v38, 0.0 }
 0x19d   :  { %188 = vadd.xlane.f32.xlu1 %v187_v39 }
 0x226   :  { %v186_v40 = vpop.xlane.xlu1 %185 }
 0x227   :  { %v190_v41 = vmul.f32 0.03125, %v186_v40 }
 0x229   :  { %v192_v42 = vadd.f32 1e-06, %v190_v41 }
 0x22a   :  { %v189_v43 = vpop.xlane.xlu1 %188 }
 0x22b   :  { %291 = vrsqrt.f32 %v192_v42  ;;  %v191_v44 = vmul.f32 0.03125, %v189_v43 }
 0x22d   :  { %v193_v45 = vadd.f32 1e-06, %v191_v44 }
 0x22f   :  { %293 = vrsqrt.f32 %v193_v45 }
 0x235   :  { %v292_v46 = vpop.eup %291 }
 0x236   :  { %v196_v48 = vmul.f32 %v292_v46, %v180_v32 }
 0x238   :  { %v205_v50 = vmul.f32 %v241_v47, %v196_v48 }
 0x239   :  { %v294_v51 = vpop.eup %293 }
 0x23a   :  { %v214_v52 = vadd.f32 %v242_v49, %v205_v50  ;;  %v197_v53 = vmul.f32 %v294_v51, %v181_v36 }
 0x23c   :  { %v245_v54 = vpack.c.bf16 %v214_v52, %v214_v52  ;;  %v206_v55 = vmul.f32 %v241_v47, %v197_v53 }
 0x23e   :  { %225 = vst.msk [vmem:[%s391_s6] sm:$0xf] %vm224_vm2, %v245_v54  ;;  %v215_v56 = vadd.f32 %v242_v49, %v206_v55 }
 0x240   :  { %v246_v57 = vpack.c.bf16 %v215_v56, %v215_v56 }
 0x242   :  { %226 = vst.msk [vmem:[%s391_s6 + $0x4] sm:$0xf] %vm224_vm2, %v246_v57 }

// kernel: transformer_forward.42
= control target key start
LH: loop header
LB: loop body
LE: loop exit
PB: predicated region body
PF: predicated region fallthrough
CT: control target
= control target key end

     0   :  { %vm19_vm0 = vcmask 261120   ;;  %v150_v0 = vmov 0.0   ;;  %vm151_vm1 = vmmov 0   ;;  %vm118_vm2 = vcmask 257024   ;;  %s195_s1 = inlined_call_operand.vmem [shape: bf16[32,32], index: 1, kind: input, shape index: {}]   ;;  %s196_s0 = inlined_call_operand.vmem [shape: bf16[16,32], index: 0, kind: input, shape index: {}]   ;;  %s197_s2 = inlined_call_operand.vmem [shape: f32[1,32], index: 2, kind: input, shape index: {}]   ;;  %s198_s3 = inlined_call_operand.vmem [shape: bf16[16,32], index: 3, kind: output, shape index: {}]  }
   0x1   :  { %137 = vmatprep.subr.bf16.mxu0 %v150_v0  ;;  %v147_v1 = vld [vmem:[%s195_s1] sm:$0xff]   ;;  %141 = vmatprep.mubr.msk.bf16.mxu0 %vm151_vm1, %v150_v0  ;;  %20 = vst.msk [vmem:[#allocation2] sm:$0xff] %vm19_vm0, %v150_v0  ;;  %21 = vst.msk [vmem:[#allocation2 + $0x8] sm:$0xff] %vm19_vm0, %v150_v0  ;;  %v148_v2 = vld [vmem:[%s195_s1 + $0x8] sm:$0xff]  }
   0x2   :  { %138 = vmatpush3.bf16.msra.mxu0 %v147_v1  ;;  %v149_v3 = vld [vmem:[%s196_s0] sm:$0xff]  }
   0x3   :  { %139 = vmatprep.subr.bf16.mxu0 %v150_v0  ;;  %v129_v12 = vld [vmem:[%s197_s2] ss:$0 sm:$0xff] }
   0x6   :  { %140 = vmatpush3.bf16.msra.mxu0 %v148_v2 }
   0x8   :  { %v22_v4 = vld [vmem:[#allocation2] sm:$0xff]  ;;  %v23_v6 = vld [vmem:[#allocation2 + $0x8] sm:$0xff] }
   0x9   :  { %142 = vmatmul.mubr.msk.bf16.vlgmr.msra.gmra.mrb[0].mxu0 %vm19_vm0, %v149_v3 }
  0xdc   :  { %v85_v5 = vpop.f32.mrb[0].mxu0 }
  0xdd   :  { %v92_v7 = vadd.f32 %v85_v5, %v22_v4  ;;  %v143_v8 = vpop.f32.mrb[1].mxu0 }
  0xde   :  { %v88_v9 = vpop.f32.mrb[2].mxu0 }
  0xdf   :  { %94 = vst.msk [vmem:[#allocation2] sm:$0xff] %vm19_vm0, %v92_v7  ;;  %v93_v10 = vadd.f32 %v88_v9, %v23_v6  ;;  %v144_v11 = vpop.f32.mrb[3].mxu0 }
  0xe1   :  { %95 = vst.msk [vmem:[#allocation2 + $0x8] sm:$0xff] %vm19_vm0, %v93_v10 }
  0xe6   :  { %v99_v13 = vld [vmem:[#allocation2] sm:$0xff] }
  0xe7   :  { %v108_v14 = vadd.f32 %v129_v12, %v99_v13 }
  0xe8   :  { %v100_v15 = vld [vmem:[#allocation2 + $0x8] sm:$0xff] }
  0xe9   :  { %v132_v16 = vpack.c.bf16 %v108_v14, %v108_v14  ;;  %v109_v17 = vadd.f32 %v129_v12, %v100_v15 }
  0xeb   :  { %119 = vst.msk [vmem:[%s198_s3] sm:$0xf] %vm118_vm2, %v132_v16  ;;  %v133_v18 = vpack.c.bf16 %v109_v17, %v109_v17 }
  0xed   :  { %120 = vst.msk [vmem:[%s198_s3 + $0x4] sm:$0xf] %vm118_vm2, %v133_v18 }

// kernel: transformer_forward.57
= control target key start
LH: loop header
LB: loop body
LE: loop exit
PB: predicated region body
PF: predicated region fallthrough
CT: control target
= control target key end

     0   :  { %v136_v0 = vmov 0.0   ;;  %vm137_vm0 = vmmov 0   ;;  %vm46_vm1 = vcmask 261120   ;;  %s176_s1 = inlined_call_operand.vmem [shape: bf16[32,128], index: 1, kind: input, shape index: {}]   ;;  %s177_s0 = inlined_call_operand.vmem [shape: bf16[16,32], index: 0, kind: input, shape index: {}]   ;;  %s178_s2 = inlined_call_operand.vmem [shape: f32[1,128], index: 2, kind: input, shape index: {}]   ;;  %s179_s3 = inlined_call_operand.vmem [shape: f32[16,128], index: 3, kind: output, shape index: {}]  }
   0x1   :  { %123 = vmatprep.subr.bf16.mxu0 %v136_v0  ;;  %v133_v1 = vld [vmem:[%s176_s1] sm:$0xff]   ;;  %127 = vmatprep.mubr.msk.bf16.mxu0 %vm137_vm0, %v136_v0  ;;  %v134_v2 = vld [vmem:[%s176_s1 + $0x8] sm:$0xff]  }
   0x2   :  { %124 = vmatpush3.bf16.msra.mxu0 %v133_v1  ;;  %v135_v3 = vld [vmem:[%s177_s0] sm:$0xff]  }
   0x3   :  { %125 = vmatprep.subr.bf16.mxu0 %v136_v0  ;;  %v119_v4 = vld [vmem:[%s178_s2] ss:$0 sm:$0xff] }
   0x6   :  { %126 = vmatpush3.bf16.msra.mxu0 %v134_v2 }
   0x9   :  { %128 = vmatmul.mubr.msk.bf16.vlgmr.msra.gmra.mrb[0].mxu0 %vm46_vm1, %v135_v3 }
  0xdc   :  { %v84_v5 = vpop.f32.mrb[0].mxu0 }
  0xdd   :  { %v107_v6 = vadd.f32 %v119_v4, %v84_v5  ;;  %v129_v7 = vpop.f32.mrb[1].mxu0 }
  0xde   :  { %v87_v8 = vpop.f32.mrb[2].mxu0 }
  0xdf   :  { %109 = vst [vmem:[%s179_s3] sm:$0xff] %v107_v6  ;;  %v108_v9 = vadd.f32 %v119_v4, %v87_v8  ;;  %v130_v10 = vpop.f32.mrb[3].mxu0 }
  0xe1   :  { %110 = vst [vmem:[%s179_s3 + $0x8] sm:$0xff] %v108_v9 }

// kernel: transformer_forward.40
= control target key start
LH: loop header
LB: loop body
LE: loop exit
PB: predicated region body
PF: predicated region fallthrough
CT: control target
= control target key end

     0   :  { %s1306_s15 = smov 0   ;;  %s1308_s16 = smov 0   ;;  %s1490_s0 = inlined_call_operand.vmem [shape: bf16[2,8,32], index: 0, kind: input, shape index: {}]   ;;  %s1491_s1 = inlined_call_operand.vmem [shape: bf16[2,8,32], index: 1, kind: input, shape index: {}]   ;;  %s1492_s2 = inlined_call_operand.vmem [shape: bf16[2,8,32], index: 2, kind: input, shape index: {}]   ;;  %s1493_s3 = inlined_call_operand.vmem [shape: f32[2,1,8], index: 3, kind: input, shape index: {}]   ;;  %s1494_s4 = inlined_call_operand.vmem [shape: bf16[2,8,32], index: 4, kind: output, shape index: {}]  }
   0x1   :  { %s1310_s17 = smov 0  }
   0x2 LB: > { %s33_s18 = sadd.s32 1, %s1265_s16  ;;  %p1097_p0 = scmp.ge.s32.totalorder %s1269_s17, 1  ;;  %s1269_s17 = sphi %s1310_s17, %s14_s17   ;;  %s1265_s16 = sphi %s1308_s16, %s1498_s16   ;;  %s1261_s15 = sphi %s1306_s15, %s1497_s15  }
   0x3   : > { %p35_p1 = scmp.ge.s32.totalorder %s33_s18, 2  ;;  %p228_p2 = scmp.lt.s32.totalorder %s1269_s17, 3 }
   0x5   : > { %s1500_s18 = smov (%p35_p1, %s33_s18), 0  ;;  %p229_p3 = pnand %p1097_p0, %p228_p2 }
   0x6   : > { %p278_p4 = scmp.lt.s32.totalorder (!%p229_p3), %s1261_s15, 1  ;;  %vm326_vm0 = vcmask (!%p229_p3), 64512   ;;  %v1271_v0 = vmov (!%p229_p3), 0.0   ;;  %vm1272_vm1 = vmmov (!%p229_p3), 0   ;;  %v1273_v4 = vmov (!%p229_p3), 0   ;;  %s1275_s29 = smov (!%p229_p3), 120  }
   0x7   : > { %232 = sbr.rel (%p229_p3) target bundleno = 1470 (0x5be), region = 36  ;;  %1137 = vmatprep.subr.bf16.mxu0 (!%p229_p3), %v1271_v0  ;;  %327 = vst.msk [vmem:[#allocation4] sm:$0xff] (!%p229_p3), %vm326_vm0, %v1271_v0  ;;  %328 = vst.msk [vmem:[#allocation4 + $0x8] sm:$0xff] (!%p229_p3), %vm326_vm0, %v1271_v0  ;;  %1139 = vmatprep.mubr.msk.bf16.mxu0 (!%p229_p3), %vm1272_vm1, %v1271_v0  ;;  %vm317_vm2 = vcmask (!%p229_p3), 7168   ;;  %v1274_v5 = vmov (!%p229_p3), -1e+30   ;;  %v334_v6 = vlaneseq (!%p229_p3) }
   0x8   : > { %329 = vst.msk [vmem:[#allocation4 + $0x10] sm:$0xff] (!%p229_p3), %vm326_vm0, %v1271_v0  ;;  %330 = vst.msk [vmem:[#allocation4 + $0x18] sm:$0xff] (!%p229_p3), %vm326_vm0, %v1271_v0  ;;  %1143 = vmatprep.subr.bf16.mxu1 (!%p229_p3), %v1271_v0  ;;  %1145 = vmatprep.mubr.msk.bf16.mxu1 (!%p229_p3), %vm1272_vm1, %v1271_v0  ;;  %s1276_s30 = smov (!%p229_p3), 112   ;;  %s1277_s5 = smov (!%p229_p3), 104   ;;  %vm438_vm7 = vcmask (!%p229_p3), 1043456   ;;  %vm918_vm8 = vcmask (!%p229_p3), 60416  }
   0x9   : > { %1219 = vset.pattern.permute.xlu0 (!%p229_p3), %v1273_v4  ;;  %1220 = vset.pattern.permute.xlu1 (!%p229_p3), %v1273_v4  ;;  %318 = vst.msk [vmem:[#allocation2] sm:$0xff] (!%p229_p3), %vm317_vm2, %v1274_v5  ;;  %319 = vst.msk [vmem:[#allocation2 + $0x8] sm:$0xff] (!%p229_p3), %vm317_vm2, %v1274_v5  ;;  %v335_v8 = vshrl.u32 (!%p229_p3), %v334_v6, 7  ;;  %v340_v11 = vand.u32 (!%p229_p3), 127, %v334_v6  ;;  %s1278_s12 = smov (!%p229_p3), 8   ;;  %s1279_s13 = smov (!%p229_p3), 16  }
   0xa   : > { %320 = vst.msk [vmem:[#allocation2 + $0x10] sm:$0xff] (!%p229_p3), %vm317_vm2, %v1274_v5  ;;  %321 = vst.msk [vmem:[#allocation2 + $0x18] sm:$0xff] (!%p229_p3), %vm317_vm2, %v1274_v5  ;;  %s1280_s14 = smov (!%p229_p3), 24   ;;  %vm936_vm9 = vcmask (!%p229_p3), 126016   ;;  %vm954_vm10 = vcmask (!%p229_p3), 191616   ;;  %vm972_vm11 = vcmask (!%p229_p3), 257216  }
   0xb   : > { %322 = vst.msk [vmem:[#allocation3] sm:$0xff] (!%p229_p3), %vm317_vm2, %v1271_v0  ;;  %323 = vst.msk [vmem:[#allocation3 + $0x8] sm:$0xff] (!%p229_p3), %vm317_vm2, %v1271_v0  ;;  %v347_v9 = vsub.s32 (!%p229_p3), 0, %v335_v8  ;;  %vm343_vm4 = vcmp.le.s32.totalorder (!%p229_p3), %v340_v11, %v335_v8 }
   0xc   : > { %324 = vst.msk [vmem:[#allocation3 + $0x10] sm:$0xff] (!%p229_p3), %vm317_vm2, %v1271_v0  ;;  %325 = vst.msk [vmem:[#allocation3 + $0x18] sm:$0xff] (!%p229_p3), %vm317_vm2, %v1271_v0 }
   0xe   : > { %s1502_s15 = smov (!%p278_p4, %s1261_s15), 1 }
   0xf   : > { %s1338_s19 = sshll.u32 %s1502_s15, 2  ;;  %s304_s28 = scalar_lea.vmem %s1493_s3, %s1502_s15 }
  0x10   : > { %s291_s22 = scalar_lea.vmem %s1491_s1, %s1338_s19  ;;  %s284_s25 = scalar_lea.vmem %s1490_s0, %s1338_s19  ;;  %v331_v7 = vld [vmem:[%s304_s28] sm:$0x1]  ;;  %v1430_v5 = vld [vmem:[#allocation2 + $0x8] sm:$0xff] }
  0x11   : > { %v352_v1 = vld [vmem:[%s291_s22] sm:$0xf]  ;;  %vm332_vm3 = vcmp.gt.f32.partialorder %v331_v7, 0.0  ;;  %s298_s8 = scalar_lea.vmem %s1492_s2, %s1338_s19  ;;  %s1472_s11 = scalar_lea.vmem %s1494_s4, %s1338_s19 }
  0x12   : > { %v359_v2 = vsel %vm326_vm0, %v352_v1, 0  ;;  %v351_v3 = vld [vmem:[%s284_s25] sm:$0xf]  ;;  %v344_v10 = vsel %vm332_vm3, 1, %v1273_v4  ;;  %v1105_v21 = vcombine.low %v352_v1, %v352_v1 }
  0x13   : > { %1138 = vmatpush3.bf16.xpose.msra.mxu0 %v359_v2  ;;  %v348_v12 = vrot.slane %v344_v10, %v347_v9  ;;  %v1104_v22 = vcombine.low %v351_v3, %v351_v3  ;;  %v1381_v23 = vld [vmem:[#allocation2] sm:$0xff]  ;;  %v684_v9 = vld [vmem:[#allocation2 + $0x10] sm:$0xff] }
  0x14   : > { %1155 = vmatprep.subr.bf16.mxu0 %v1271_v0  ;;  %493 = vrot.lane.b32.xlu1 %v1105_v21, %s1275_s29  ;;  %v1395_v27 = vld [vmem:[%s298_s8] sm:$0xf] }
  0x15   : > { %vm349_vm5 = vcmp.eq.s32.totalorder %v348_v12, 1  ;;  %v440_v28 = vsel %vm438_vm7, %v1395_v27, 0 }
  0x16   : > { %vm1368_vm6 = vmand %vm349_vm5, %vm343_vm4  ;;  %1144 = vmatpush3.bf16.msra.mxu1 %v440_v28 }
  0x17   : > { %1149 = vmatprep.subr.bf16.mxu1 %v1271_v0 }
  0x18   : > { %488 = vrot.lane.b32.xlu1 %v1104_v22, %s1275_s29 }
  0x1a   : > { %1140 = vmatmul.mubr.msk.bf16.vlgmr.msra.gmra.mrb[0].mxu0 %vm326_vm0, %v351_v3 }
  0x1b   : > { %1157 = vmatprep.mubr.msk.bf16.mxu0 %vm1272_vm1, %v1271_v0 }
  0x1c   : > { %633 = vrot.lane.b32.xlu1 %v1105_v21, %s1276_s30 }
  0x20   : > { %631 = vrot.lane.b32.xlu1 %v1104_v22, %s1276_s30 }
  0x24   : > { %770 = vrot.lane.b32.xlu1 %v1105_v21, %s1277_s5 }
  0x28   : > { %768 = vrot.lane.b32.xlu1 %v1104_v22, %s1277_s5 }
  0x86   : > { %v494_v32 = vpop.permute.xlu1 %493 }
  0x87   : > { %v499_v35 = vsel %vm326_vm0, %v494_v32, 0 }
  0x8a   : > { %v489_v33 = vpop.permute.xlu1 %488 }
  0x8e   : > { %v634_v37 = vpop.permute.xlu1 %633 }
  0x8f   : > { %v639_v39 = vsel %vm326_vm0, %v634_v37, 0 }
  0x92   : > { %v632_v38 = vpop.permute.xlu1 %631 }
  0x96   : > { %v771_v40 = vpop.permute.xlu1 %770 }
  0x97   : > { %v776_v41 = vsel %vm326_vm0, %v771_v40, 0 }
  0x9a   : > { %v769_v42 = vpop.permute.xlu1 %768 }
  0xed   : > { %v395_v13 = vpop.f32.mrb[0].mxu0 }
  0xee   : > { %v401_v15 = vmul.f32 0.35355338, %v395_v13  ;;  %v1141_v16 = vpop.f32.mrb[1].mxu0  ;;  %v821_v13 = vld [vmem:[#allocation2 + $0x18] sm:$0xff] }
  0xef   : > { %v398_v17 = vpop.f32.mrb[2].mxu0  ;;  %v1107_v16 = vcombine.low %v1395_v27, %v1395_v27 }
  0xf0   : > { %v1142_v18 = vpop.f32.mrb[3].mxu0  ;;  %v402_v19 = vsel %vm1368_vm6, %v401_v15, -1e+09 }
  0xf1   : > { %v404_v20 = vsel %vm326_vm0, %v402_v19, -inf }
  0xf2   : > { %405 = vmax.xlane.f32.xlu0 %v404_v20 }
 0x17f   : > { %v406_v24 = vpop.xlane.xlu0 %405 }
 0x180   : > { %v1384_v25 = vmax.f32 %v1381_v23, %v406_v24 }
 0x182   : > { %v408_v26 = vsub.f32 %v1381_v23, %v1384_v25  ;;  %484 = vst.msk [vmem:[#allocation2] sm:$0xff] %vm317_vm2, %v1384_v25  ;;  %413 = vperm.xlu0 %1219, %v1384_v25  }
 0x201   : > { %v414_v29 = vpop.permute.xlu0 %413 }
 0x202   : > { %v416_v30 = vsub.f32 %v402_v19, %v414_v29 }
 0x204   : > { %v417_v31 = vmul.f32 1.442695, %v416_v30 }
 0x206   : > { %1223 = vpow2.f32 %v417_v31 }
 0x210   : > { %v1400_v34 = vpop.eup %1223 }
 0x211   : > { %v434_v36 = vpack.c.bf16 %v1400_v34, %v1400_v34  ;;  %v421_v18 = vsel %vm326_vm0, %v1400_v34, 0.0 }
 0x213   : > { %1146 = vmatmul.mubr.msk.bf16.vlgmr.msra.gmra.mrb[0].mxu1 %vm326_vm0, %v434_v36 }
 0x214   : > { %1150 = vmatpush3.bf16.xpose.msra.mxu1 %v499_v35  ;;  %1151 = vmatprep.mubr.msk.bf16.mxu1 %vm1272_vm1, %v1271_v0 }
 0x215   : > { %1161 = vmatprep.subr.bf16.mxu1 %v1271_v0 }
 0x21b   : > { %1152 = vmatmul.mubr.msk.bf16.vlgmr.msra.gmra.mrb[4].mxu1 %vm326_vm0, %v489_v33 }
 0x21c   : > { %1162 = vmatpush3.bf16.xpose.msra.mxu1 %v639_v39  ;;  %1163 = vmatprep.mubr.msk.bf16.mxu1 %vm1272_vm1, %v1271_v0 }
 0x21d   : > { %1173 = vmatprep.subr.bf16.mxu1 %v1271_v0 }
 0x223   : > { %1164 = vmatmul.mubr.msk.bf16.vlgmr.msra.gmra.mrb[8].mxu1 %vm326_vm0, %v632_v38 }
 0x224   : > { %1174 = vmatpush3.bf16.xpose.msra.mxu1 %v776_v41  ;;  %1175 = vmatprep.mubr.msk.bf16.mxu1 %vm1272_vm1, %v1271_v0 }
 0x22b   : > { %1176 = vmatmul.mubr.msk.bf16.vlgmr.msra.gmra.mrb[12].mxu1 %vm326_vm0, %v769_v42 }
 0x2e6   : > { %v1419_v43 = vpop.f32.mrb[0].mxu1 }
 0x2e7   : > { %v1147_v44 = vpop.f32.mrb[1].mxu1 }
 0x2e8   : > { %v479_v45 = vpop.f32.mrb[2].mxu1 }
 0x2e9   : > { %v1148_v46 = vpop.f32.mrb[3].mxu1  ;;  %v409_v45 = vmul.f32 1.442695, %v408_v26 }
 0x2ee   : > { %v535_v47 = vpop.f32.mrb[4].mxu1 }
 0x2ef   : > { %v541_v48 = vmul.f32 0.35355338, %v535_v47  ;;  %v1153_v49 = vpop.f32.mrb[5].mxu1 }
 0x2f0   : > { %v538_v50 = vpop.f32.mrb[6].mxu1 }
 0x2f1   : > { %v1154_v51 = vpop.f32.mrb[7].mxu1  ;;  %v542_v52 = vsel %vm1368_vm6, %v541_v48, -1e+09 }
 0x2f2   : > { %v545_v53 = vsel %vm326_vm0, %v542_v52, -inf }
 0x2f3   : > { %546 = vmax.xlane.f32.xlu1 %v545_v53 }
 0x2f6   : > { %v675_v54 = vpop.f32.mrb[8].mxu1 }
 0x2f7   : > { %v681_v55 = vmul.f32 0.35355338, %v675_v54  ;;  %v1165_v56 = vpop.f32.mrb[9].mxu1 }
 0x2f8   : > { %v678_v57 = vpop.f32.mrb[10].mxu1 }
 0x2f9   : > { %v1166_v58 = vpop.f32.mrb[11].mxu1  ;;  %v682_v59 = vsel %vm1368_vm6, %v681_v55, -1e+09  ;;  %v561_v57 = vld [vmem:[#allocation3 + $0x8] sm:$0xff] }
 0x2fa   : > { %v685_v60 = vsel %vm326_vm0, %v682_v59, -inf }
 0x2fb   : > { %686 = vmax.xlane.f32.xlu0 %v685_v60 }
 0x2fe   : > { %v812_v61 = vpop.f32.mrb[12].mxu1 }
 0x2ff   : > { %v818_v62 = vmul.f32 0.35355338, %v812_v61  ;;  %v1177_v63 = vpop.f32.mrb[13].mxu1  ;;  %v701_v61 = vld [vmem:[#allocation3 + $0x10] sm:$0xff] }
 0x300   : > { %v815_v1 = vpop.f32.mrb[14].mxu1 }
 0x301   : > { %v1178_v2 = vpop.f32.mrb[15].mxu1  ;;  %v819_v3 = vsel %vm1368_vm6, %v818_v62, -1e+09 }
 0x302   : > { %v822_v4 = vsel %vm326_vm0, %v819_v3, -inf }
 0x303   : > { %823 = vmax.xlane.f32.xlu1 %v822_v4  ;;  %v427_v4 = vld [vmem:[#allocation4] sm:$0xff] }
 0x380   : > { %v547_v6 = vpop.xlane.xlu1 %546 }
 0x381   : > { %v548_v7 = vmax.f32 %v1430_v5, %v547_v6 }
 0x383   : > { %v549_v8 = vsub.f32 %v1430_v5, %v548_v7  ;;  %630 = vst.msk [vmem:[#allocation2 + $0x8] sm:$0xff] %vm317_vm2, %v548_v7  ;;  %554 = vperm.xlu1 %1220, %v548_v7  }
 0x385   : > { %v550_v47 = vmul.f32 1.442695, %v549_v8 }
 0x388   : > { %v687_v10 = vpop.xlane.xlu0 %686 }
 0x389   : > { %v688_v11 = vmax.f32 %v684_v9, %v687_v10 }
 0x38b   : > { %v689_v12 = vsub.f32 %v684_v9, %v688_v11  ;;  %767 = vst.msk [vmem:[#allocation2 + $0x10] sm:$0xff] %vm317_vm2, %v688_v11  ;;  %694 = vperm.xlu0 %1219, %v688_v11  }
 0x38d   : > { %v690_v49 = vmul.f32 1.442695, %v689_v12 }
 0x390   : > { %v824_v14 = vpop.xlane.xlu1 %823 }
 0x391   : > { %v825_v15 = vmax.f32 %v821_v13, %v824_v14 }
 0x393   : > { %v826_v17 = vsub.f32 %v821_v13, %v825_v15  ;;  %904 = vst.msk [vmem:[#allocation2 + $0x18] sm:$0xff] %vm317_vm2, %v825_v15  ;;  %831 = vperm.xlu1 %1220, %v825_v15  }
 0x395   : > { %v827_v48 = vmul.f32 1.442695, %v826_v17 }
 0x397   : > { %580 = vrot.lane.b32.xlu1 %v1107_v16, %s1275_s29 }
 0x39b   : > { %717 = vrot.lane.b32.xlu1 %v1107_v16, %s1276_s30 }
 0x39f   : > { %854 = vrot.lane.b32.xlu1 %v1107_v16, %s1277_s5 }
 0x3c3   : > { %422 = vadd.xlane.f32.xlu1 %v421_v18 }
 0x402   : > { %v555_v19 = vpop.permute.xlu1 %554 }
 0x403   : > { %v557_v20 = vsub.f32 %v542_v52, %v555_v19  ;;  %v419_v52 = vld [vmem:[#allocation3] sm:$0xff] }
 0x405   : > { %v558_v21 = vmul.f32 1.442695, %v557_v20 }
 0x407   : > { %1225 = vpow2.f32 %v558_v21  ;;  %v569_v21 = vld [vmem:[#allocation4 + $0x8] sm:$0xff] }
 0x40a   : > { %v695_v22 = vpop.permute.xlu0 %694 }
 0x40b   : > { %v697_v24 = vsub.f32 %v682_v59, %v695_v22 }
 0x40d   : > { %v698_v27 = vmul.f32 1.442695, %v697_v24 }
 0x40f   : > { %1227 = vpow2.f32 %v698_v27 }
 0x411   : > { %v1226_v28 = vpop.eup %1225 }
 0x412   : > { %v832_v29 = vpop.permute.xlu1 %831  ;;  %v563_v30 = vsel %vm326_vm0, %v1226_v28, 0.0  ;;  %v576_v36 = vpack.c.bf16 %v1226_v28, %v1226_v28 }
 0x413   : > { %v834_v31 = vsub.f32 %v819_v3, %v832_v29  ;;  %564 = vadd.xlane.f32.xlu0 %v563_v30  ;;  %v838_v3 = vld [vmem:[#allocation3 + $0x18] sm:$0xff] }
 0x415   : > { %v835_v32 = vmul.f32 1.442695, %v834_v31  ;;  %v709_v31 = vld [vmem:[#allocation4 + $0x10] sm:$0xff] }
 0x416   : > { %v581_v33 = vpop.permute.xlu1 %580 }
 0x417   : > { %1229 = vpow2.f32 %v835_v32  ;;  %v586_v34 = vsel %vm438_vm7, %v581_v33, 0 }
 0x418   : > { %1156 = vmatpush3.bf16.msra.mxu0 %v586_v34  ;;  %1231 = vpow2.f32 %v409_v45 }
 0x419   : > { %v1228_v35 = vpop.eup %1227  ;;  %1167 = vmatprep.subr.bf16.mxu0 %v1271_v0  ;;  %1233 = vpow2.f32 %v550_v47 }
 0x41a   : > { %v703_v37 = vsel %vm326_vm0, %v1228_v35, 0.0  ;;  %v718_v38 = vpop.permute.xlu1 %717  ;;  %v716_v42 = vpack.c.bf16 %v1228_v35, %v1228_v35  ;;  %1235 = vpow2.f32 %v827_v48 }
 0x41b   : > { %704 = vadd.xlane.f32.xlu0 %v703_v37  ;;  %1158 = vmatmul.mubr.msk.bf16.vlgmr.msra.gmra.mrb[4].mxu0 %vm326_vm0, %v576_v36  ;;  %v723_v39 = vsel %vm438_vm7, %v718_v38, 0  ;;  %1237 = vpow2.f32 %v690_v49  ;;  %v846_v38 = vld [vmem:[#allocation4 + $0x18] sm:$0xff] }
 0x41c   : > { %1168 = vmatpush3.bf16.msra.mxu0 %v723_v39  ;;  %1169 = vmatprep.mubr.msk.bf16.mxu0 %vm1272_vm1, %v1271_v0 }
 0x41d   : > { %1179 = vmatprep.subr.bf16.mxu0 %v1271_v0 }
 0x41e   : > { %v855_v40 = vpop.permute.xlu1 %854 }
 0x41f   : > { %v860_v44 = vsel %vm438_vm7, %v855_v40, 0 }
 0x421   : > { %v1230_v41 = vpop.eup %1229 }
 0x422   : > { %v840_v46 = vsel %vm326_vm0, %v1230_v41, 0.0  ;;  %v853_v50 = vpack.c.bf16 %v1230_v41, %v1230_v41  ;;  %v1232_v23 = vpop.eup %1231 }
 0x423   : > { %1170 = vmatmul.mubr.msk.bf16.vlgmr.msra.gmra.mrb[8].mxu0 %vm326_vm0, %v716_v42  ;;  %841 = vadd.xlane.f32.xlu1 %v840_v46  ;;  %v1234_v25 = vpop.eup %1233 }
 0x424   : > { %1180 = vmatpush3.bf16.msra.mxu0 %v860_v44  ;;  %1181 = vmatprep.mubr.msk.bf16.mxu0 %vm1272_vm1, %v1271_v0  ;;  %v1236_v26 = vpop.eup %1235  ;;  %v420_v0 = vmul.f32 %v1232_v23, %v419_v52  ;;  %v562_v58 = vmul.f32 %v1234_v25, %v561_v57 }
 0x425   : > { %v1238_v51 = vpop.eup %1237  ;;  %v839_v5 = vmul.f32 %v1236_v26, %v838_v3 }
 0x426   : > { %v702_v62 = vmul.f32 %v1238_v51, %v701_v61 }
 0x42b   : > { %1182 = vmatmul.mubr.msk.bf16.vlgmr.msra.gmra.mrb[12].mxu0 %vm326_vm0, %v853_v50 }
 0x431   : > { %430 = vperm.xlu0 %1219, %v1232_v23  }
 0x434   : > { %572 = vperm.xlu1 %1220, %v1234_v25  }
 0x435   : > { %849 = vperm.xlu0 %1219, %v1236_v26  }
 0x438   : > { %712 = vperm.xlu1 %1220, %v1238_v51  }
 0x450   : > { %v423_v53 = vpop.xlane.xlu1 %422 }
 0x451   : > { %v424_v54 = vadd.f32 %v423_v53, %v420_v0 }
 0x453   : > { %426 = vst.msk [vmem:[#allocation3] sm:$0xff] %vm317_vm2, %v424_v54 }
 0x45a   : > { %v908_v55 = vld [vmem:[#allocation3] sm:$0xff] }
 0x45b   : > { %1239 = vrcp.f32 %v908_v55 }
 0x465   : > { %v1240_v56 = vpop.eup %1239 }
 0x466   : > { %913 = vperm.xlu1 %1220, %v1240_v56  }
 0x4a0   : > { %v565_v59 = vpop.xlane.xlu0 %564 }
 0x4a1   : > { %v566_v60 = vadd.f32 %v565_v59, %v562_v58 }
 0x4a3   : > { %567 = vst.msk [vmem:[#allocation3 + $0x8] sm:$0xff] %vm317_vm2, %v566_v60 }
 0x4a8   : > { %v705_v63 = vpop.xlane.xlu0 %704 }
 0x4a9   : > { %v706_v1 = vadd.f32 %v705_v63, %v702_v62 }
 0x4aa   : > { %v920_v2 = vld [vmem:[#allocation3 + $0x8] sm:$0xff] }
 0x4ab   : > { %707 = vst.msk [vmem:[#allocation3 + $0x10] sm:$0xff] %vm317_vm2, %v706_v1  ;;  %1241 = vrcp.f32 %v920_v2 }
 0x4b0   : > { %v842_v6 = vpop.xlane.xlu1 %841  ;;  %v431_v7 = vpop.permute.xlu0 %430 }
 0x4b1   : > { %v843_v8 = vadd.f32 %v842_v6, %v839_v5  ;;  %v433_v9 = vmul.f32 %v431_v7, %v427_v4 }
 0x4b2   : > { %v938_v10 = vld [vmem:[#allocation3 + $0x10] sm:$0xff] }
 0x4b3   : > { %844 = vst.msk [vmem:[#allocation3 + $0x18] sm:$0xff] %vm317_vm2, %v843_v8  ;;  %v482_v11 = vadd.f32 %v1419_v43, %v433_v9  ;;  %1243 = vrcp.f32 %v938_v10 }
 0x4b4   : > { %v573_v16 = vpop.permute.xlu1 %572  ;;  %v850_v39 = vpop.permute.xlu0 %849 }
 0x4b5   : > { %v1242_v12 = vpop.eup %1241  ;;  %483 = vst.msk [vmem:[#allocation4] sm:$0xff] %vm326_vm0, %v482_v11  ;;  %v575_v22 = vmul.f32 %v573_v16, %v569_v21  ;;  %v852_v40 = vmul.f32 %v850_v39, %v846_v38 }
 0x4b6   : > { %925 = vperm.xlu0 %1219, %v1242_v12  }
 0x4b8   : > { %v713_v17 = vpop.permute.xlu1 %712 }
 0x4b9   : > { %v715_v32 = vmul.f32 %v713_v17, %v709_v31 }
 0x4ba   : > { %v956_v13 = vld [vmem:[#allocation3 + $0x18] sm:$0xff] }
 0x4bb   : > { %1245 = vrcp.f32 %v956_v13 }
 0x4bc   : > { %v910_v18 = vld [vmem:[#allocation4] sm:$0xff] }
 0x4bd   : > { %v1244_v14 = vpop.eup %1243 }
 0x4be   : > { %943 = vperm.xlu0 %1219, %v1244_v14  }
 0x4c5   : > { %v1246_v15 = vpop.eup %1245 }
 0x4c6   : > { %961 = vperm.xlu0 %1219, %v1246_v15  }
 0x4e5   : > { %v914_v19 = vpop.permute.xlu1 %913 }
 0x4e6   : > { %v916_v20 = vmul.f32 %v914_v19, %v910_v18 }
 0x4e8   : > { %v917_v43 = vpack.c.bf16 %v916_v20, %v916_v20 }
 0x4ea   : > { %919 = vst.msk [vmem:[%s1472_s11] sm:$0xf] %vm918_vm8, %v917_v43 }
 0x4ee   : > { %v622_v24 = vpop.f32.mrb[4].mxu0 }
 0x4ef   : > { %v628_v27 = vadd.f32 %v622_v24, %v575_v22  ;;  %v1159_v28 = vpop.f32.mrb[5].mxu0 }
 0x4f0   : > { %v625_v29 = vpop.f32.mrb[6].mxu0 }
 0x4f1   : > { %629 = vst.msk [vmem:[#allocation4 + $0x8] sm:$0xff] %vm326_vm0, %v628_v27  ;;  %v1160_v30 = vpop.f32.mrb[7].mxu0 }
 0x4f6   : > { %v759_v33 = vpop.f32.mrb[8].mxu0 }
 0x4f7   : > { %v765_v34 = vadd.f32 %v759_v33, %v715_v32  ;;  %v1171_v35 = vpop.f32.mrb[9].mxu0 }
 0x4f8   : > { %v762_v36 = vpop.f32.mrb[10].mxu0  ;;  %v922_v48 = vld [vmem:[#allocation4 + $0x8] sm:$0xff] }
 0x4f9   : > { %766 = vst.msk [vmem:[#allocation4 + $0x10] sm:$0xff] %vm326_vm0, %v765_v34  ;;  %v1172_v37 = vpop.f32.mrb[11].mxu0 }
 0x4fe   : > { %v896_v41 = vpop.f32.mrb[12].mxu0 }
 0x4ff   : > { %v902_v42 = vadd.f32 %v896_v41, %v852_v40  ;;  %v1183_v44 = vpop.f32.mrb[13].mxu0 }
 0x500   : > { %v899_v45 = vpop.f32.mrb[14].mxu0  ;;  %v940_v25 = vld [vmem:[#allocation4 + $0x10] sm:$0xff] }
 0x501   : > { %903 = vst.msk [vmem:[#allocation4 + $0x18] sm:$0xff] %vm326_vm0, %v902_v42  ;;  %v1184_v46 = vpop.f32.mrb[15].mxu0 }
 0x508   : > { %v958_v0 = vld [vmem:[#allocation4 + $0x18] sm:$0xff] }
 0x535   : > { %v926_v47 = vpop.permute.xlu0 %925 }
 0x536   : > { %v928_v49 = vmul.f32 %v926_v47, %v922_v48 }
 0x538   : > { %v1118_v50 = vpack.c.bf16 %v928_v49, %v928_v49 }
 0x53a   : > { %933 = vrot.lane.b32.xlu1 %v1118_v50, %s1278_s12 }
 0x53d   : > { %v944_v23 = vpop.permute.xlu0 %943 }
 0x53e   : > { %v946_v26 = vmul.f32 %v944_v23, %v940_v25 }
 0x540   : > { %v1119_v51 = vpack.c.bf16 %v946_v26, %v946_v26 }
 0x542   : > { %951 = vrot.lane.b32.xlu1 %v1119_v51, %s1279_s13 }
 0x545   : > { %v962_v52 = vpop.permute.xlu0 %961 }
 0x546   : > { %v964_v53 = vmul.f32 %v962_v52, %v958_v0 }
 0x548   : > { %v1120_v54 = vpack.c.bf16 %v964_v53, %v964_v53 }
 0x54a   : > { %969 = vrot.lane.b32.xlu1 %v1120_v54, %s1280_s14 }
 0x5ac   : > { %v934_v55 = vpop.permute.xlu1 %933 }
 0x5ad   : > { %937 = vst.msk [vmem:[%s1472_s11] sm:$0xf] %vm936_vm9, %v934_v55 }
 0x5b4   : > { %v952_v56 = vpop.permute.xlu1 %951 }
 0x5b5   : > { %955 = vst.msk [vmem:[%s1472_s11] sm:$0xf] %vm954_vm10, %v952_v56 }
 0x5bc   : > { %v970_v57 = vpop.permute.xlu1 %969 }
 0x5bd   : > { %973 = vst.msk [vmem:[%s1472_s11] sm:$0xf] %vm972_vm11, %v970_v57 }
 0x5be PF: > { %s14_s17 = sadd.s32 1, %s1269_s17   ;;  %s1497_s15 = smov %s1265_s16 }
 0x5bf   : > { %p11_p5 = scmp.ge.s32.totalorder %s14_s17, 4   ;;  %s1498_s16 = smov %s1500_s18 }
 0x5c1   :  { %13 = sbr.rel (!%p11_p5) target bundleno = 2 (0x2), region = 92 }

</bundles_post_ra>
